<compile_context>
chip_gen: v5e
topology: v5e:2x2
jax: 0.10.0
libtpu: 0.0.40
codegen_flags: <defaults>
</compile_context>

<pallas_src>
import functools
from typing import NamedTuple

import jax
import jax.numpy as jnp
from jax import lax
from jax.experimental import pallas as pl
from jax.experimental.pallas import tpu as pltpu


# ----------------------------------------------------------------------------
# Pallas kernel: fused (weight @ patches) + InstanceNorm + LeakyReLU
# ----------------------------------------------------------------------------
def _conv_in_lrelu_kernel(p_ref, w_ref, o_ref, acc_ref, *,
                          apply_norm, apply_act, eps, slope):
    # p_ref:   (1, tk, M)   bf16 im2col patches (K-tile) for one sample
    # w_ref:   (tco, tk)    bf16 flattened conv weight tile
    # o_ref:   (1, tco, M)  bf16 output (NCHW-flat: channels x spatial)
    # acc_ref: (tco, M)     f32 accumulator (resident across the K grid axis)
    k = pl.program_id(2)

    @pl.when(k == 0)
    def _init():
        acc_ref[...] = jnp.zeros_like(acc_ref)

    acc_ref[...] += jnp.dot(w_ref[...], p_ref[0],
                            preferred_element_type=jnp.float32)

    @pl.when(k == pl.num_programs(2) - 1)
    def _finalize():
        y = acc_ref[...]
        if apply_norm:
            # InstanceNorm2d (affine=False, eps=1e-5): per-(sample, channel)
            # stats over the spatial (lane) axis, biased variance.
            mean = jnp.mean(y, axis=1, keepdims=True)
            var = jnp.mean(jnp.square(y - mean), axis=1, keepdims=True)
            y = (y - mean) * lax.rsqrt(var + eps)
        if apply_act:
            y = jnp.where(y >= 0.0, y, slope * y)
        o_ref[0] = y.astype(o_ref.dtype)


# ----------------------------------------------------------------------------
# Tiling helpers (all static / trace-time)
# ----------------------------------------------------------------------------
def _pick_k_tiling(K, max_k_block):
    """Return (K_pad, tk). tk == K_pad == K means one-shot (no K tiling)."""
    if K <= max_k_block:
        return K, K
    best = None
    for tk in (2048, 1024, 512):          # multiples of 128 (weight lane dim)
        if tk > max_k_block:
            continue
        k_pad = -(-K // tk) * tk
        if best is None or (k_pad, -tk) < (best[0], -best[1]):
            best = (k_pad, tk)
    if best is None:
        return K, K
    return best


def _pick_co_tile(c_out, max_co_block):
    """Largest divisor of c_out that is <= max_co_block (multiple of 8)."""
    if c_out <= max_co_block:
        return c_out
    start = max_co_block - (max_co_block % 8)
    for t in range(start, 0, -8):
        if c_out % t == 0:
            return t
    return c_out


# ----------------------------------------------------------------------------
# Layer planning: reshape / cast / pad weights once, outside the forward pass
# ----------------------------------------------------------------------------
class ConvPlan(NamedTuple):
    wf: jax.Array      # (C_out, K_pad) bf16 flattened conv weight
    ksize: int
    stride: int
    pad: int
    c_out: int
    K: int
    K_pad: int
    tk: int
    tco: int
    norm: bool
    act: bool


def plan_conv_layer(w, *, stride, pad, norm, act,
                    max_k_block=2048, max_co_block=256):
    c_out, c_in, ksize, _ = w.shape
    K = c_in * ksize * ksize
    K_pad, tk = _pick_k_tiling(K, max_k_block)
    tco = _pick_co_tile(c_out, max_co_block)
    wf = w.reshape(c_out, K).astype(jnp.bfloat16)
    if K_pad > K:
        wf = jnp.pad(wf, ((0, 0), (0, K_pad - K)))
    return ConvPlan(wf, ksize, stride, pad, c_out, K, K_pad, tk, tco, norm, act)


# ----------------------------------------------------------------------------
# im2col glue: (N, C, H, W) -> bf16 patches (N, K_pad, M), K ordered (C, kh, kw)
# ----------------------------------------------------------------------------
def _im2col_km(x, ksize, stride, pad, k_pad, dtype=jnp.bfloat16):
    N, C, H, W = x.shape
    x = x.astype(dtype)
    xp = jnp.pad(x, ((0, 0), (0, 0), (pad, pad), (pad, pad)))
    h_out = (H + 2 * pad - ksize) // stride + 1
    w_out = (W + 2 * pad - ksize) // stride + 1
    cols = []
    for di in range(ksize):
        for dj in range(ksize):
            cols.append(xp[:, :,
                           di:di + stride * h_out:stride,
                           dj:dj + stride * w_out:stride])
    patches = jnp.stack(cols, axis=2)                       # (N, C, k*k, Ho, Wo)
    patches = patches.reshape(N, C * ksize * ksize, h_out * w_out)
    K = C * ksize * ksize
    if k_pad > K:
        patches = jnp.pad(patches, ((0, 0), (0, k_pad - K), (0, 0)))
    return patches, h_out, w_out


# ----------------------------------------------------------------------------
# One Conv + InstanceNorm + LeakyReLU layer
# ----------------------------------------------------------------------------
def conv_block(x, plan):
    N = x.shape[0]
    patches, h_out, w_out = _im2col_km(x, plan.ksize, plan.stride, plan.pad,
                                       plan.K_pad)
    M = h_out * w_out
    nk = plan.K_pad // plan.tk
    nco = plan.c_out // plan.tco

    kernel = functools.partial(_conv_in_lrelu_kernel,
                               apply_norm=plan.norm, apply_act=plan.act,
                               eps=1e-5, slope=0.2)

    cost = pl.CostEstimate(
        flops=2 * N * plan.c_out * plan.K_pad * M,
        transcendentals=N * plan.c_out,
        bytes_accessed=(N * plan.K_pad * M * 2            # bf16 patches
                        + N * plan.c_out * plan.K_pad * 2  # bf16 weight reads
                        + N * plan.c_out * M * 2))         # bf16 output

    out = pl.pallas_call(
        kernel,
        out_shape=jax.ShapeDtypeStruct((N, plan.c_out, M), jnp.bfloat16),
        grid_spec=pltpu.PrefetchScalarGridSpec(
            num_scalar_prefetch=0,
            grid=(N, nco, nk),
            in_specs=[
                pl.BlockSpec((1, plan.tk, M), lambda n, co, k: (n, k, 0)),
                pl.BlockSpec((plan.tco, plan.tk), lambda n, co, k: (co, k)),
            ],
            out_specs=pl.BlockSpec((1, plan.tco, M),
                                   lambda n, co, k: (n, co, 0)),
            scratch_shapes=[pltpu.VMEM((plan.tco, M), jnp.float32)],
        ),
        compiler_params=pltpu.CompilerParams(
            dimension_semantics=("parallel", "parallel", "arbitrary"),
            vmem_limit_bytes=64 * 1024 * 1024),
        cost_estimate=cost,
    )(patches, plan.wf)

    # (N, C_out, M) is already NCHW-flat -> pure reshape, no transpose.
    return out.reshape(N, plan.c_out, h_out, w_out)


def _final_conv(x, w6):
    # conv6: Conv2d(ndf*16, 1, 5, 2, 1, bias=False) producing a single value
    # per sample.  A Pallas call here (im2col + (1,K)@(K,1) padded to MXU
    # tiles) is pure fixed overhead, so run it as a plain XLA conv.
    return lax.conv_general_dilated(
        x, w6.astype(x.dtype),
        window_strides=(2, 2), padding=((1, 1), (1, 1)),
        dimension_numbers=("NCHW", "OIHW", "NCHW"),
        preferred_element_type=jnp.float32)


# ----------------------------------------------------------------------------
# Full Discriminator forward
# ----------------------------------------------------------------------------
def discriminator_forward(x, plans, w6):
    # conv1..conv5: Conv(k=5, s=2, p=2) + InstanceNorm + LeakyReLU(0.2)
    for plan in plans:
        x = conv_block(x, plan)
    # conv6: Conv(k=5, s=2, p=1), no norm, no activation
    return _final_conv(x, w6)


if __name__ == "__main__":
    # Small, forward-consistent shapes: ndf=8 (instead of 96), batch=2,
    # in_channels=2, spatial=80 so every stride-2 conv (incl. conv6) is valid:
    # 80 -> 40 -> 20 -> 10 -> 5 -> 3 -> 1.
    ndf = 8
    N, C_in, H, W = 2, 2, 80, 80

    key = jax.random.PRNGKey(0)
    kx, k1, k2, k3, k4, k5, k6 = jax.random.split(key, 7)
    x = jax.random.normal(kx, (N, C_in, H, W), dtype=jnp.float32)

    layer_channels = [
        (C_in, ndf),          # conv1
        (ndf, ndf * 2),       # conv2
        (ndf * 2, ndf * 4),   # conv3
        (ndf * 4, ndf * 8),   # conv4
        (ndf * 8, ndf * 16),  # conv5
        (ndf * 16, 1),        # conv6
    ]
    wkeys = [k1, k2, k3, k4, k5, k6]
    weights = [
        0.05 * jax.random.normal(wk, (co, ci, 5, 5), dtype=jnp.float32)
        for wk, (ci, co) in zip(wkeys, layer_channels)
    ]

    # Prepare (reshape / cast / pad) conv1..conv5 weights once, outside the
    # forward.  max_k_block=512 is deliberately small so BOTH the single-shot
    # (layers 1-3) and K-tiled reduction (layers 4-5) kernel paths are
    # exercised at these test shapes.
    plans = [
        plan_conv_layer(w, stride=2, pad=2, norm=True, act=True,
                        max_k_block=512)
        for w in weights[:5]
    ]
    w6 = weights[5]

    fwd = jax.jit(lambda inp: discriminator_forward(inp, plans, w6))
    out = jax.block_until_ready(fwd(x))
    assert out.shape == (N, 1, 1, 1), out.shape
    assert out.dtype == jnp.float32, out.dtype
    print("KERNEL_OK")
</pallas_src>

<mosaic_0001>
module attributes {stable_mosaic.version = 11 : i64} {
  func.func @_conv_in_lrelu_kernel(%arg0: i32, %arg1: i32, %arg2: i32, %arg3: memref<1x50x1600xbf16, #tpu.memory_space<vmem>>, %arg4: memref<8x50xbf16, #tpu.memory_space<vmem>>, %arg5: memref<1x8x1600xbf16, #tpu.memory_space<vmem>>, %arg6: memref<8x1600xf32, #tpu.memory_space<vmem>>) attributes {dimension_semantics = [#tpu.dimension_semantics<parallel>, #tpu.dimension_semantics<parallel>, #tpu.dimension_semantics<arbitrary>], iteration_bounds = array<i64: 2, 1, 1>, scalar_prefetch = 0 : i64, scratch_operands = 1 : i64, tpu.core_type = #tpu.core_type<tc>, window_params = [{transform_indices = @transform_0, window_bounds = array<i64: 1, 50, 1600>}, {transform_indices = @transform_1, window_bounds = array<i64: 8, 50>}, {transform_indices = @transform_2, window_bounds = array<i64: 1, 8, 1600>}]} {
    %c0_i32 = arith.constant 0 : i32
    %0 = arith.cmpi eq, %arg2, %c0_i32 : i32
    %1 = arith.extui %0 : i1 to i32
    %c0_i32_0 = arith.constant 0 : i32
    %2 = arith.cmpi ne, %1, %c0_i32_0 : i32
    scf.if %2 {
      %cst_11 = arith.constant 0.000000e+00 : f32
      %13 = vector.broadcast %cst_11 : f32 to vector<8x1600xf32>
      %c0_12 = arith.constant 0 : index
      %c0_13 = arith.constant 0 : index
      %14 = vector.load %arg6[%c0_12, %c0_13] : memref<8x1600xf32, #tpu.memory_space<vmem>>, vector<8x1600xf32>
      tpu.vector_store %arg6[%c0_12, %c0_13], %13 {strides = array<i32>} : memref<8x1600xf32, #tpu.memory_space<vmem>>, vector<8x1600xf32>,
    } else {
    }
    %c0 = arith.constant 0 : index
    %c0_1 = arith.constant 0 : index
    %3 = vector.load %arg6[%c0, %c0_1] : memref<8x1600xf32, #tpu.memory_space<vmem>>, vector<8x1600xf32>
    %c0_2 = arith.constant 0 : index
    %c0_3 = arith.constant 0 : index
    %4 = vector.load %arg4[%c0_2, %c0_3] : memref<8x50xbf16, #tpu.memory_space<vmem>>, vector<8x50xbf16>
    %c0_4 = arith.constant 0 : index
    %c0_5 = arith.constant 0 : index
    %c0_6 = arith.constant 0 : index
    %5 = vector.load %arg3[%c0_4, %c0_5, %c0_6] : memref<1x50x1600xbf16, #tpu.memory_space<vmem>>, vector<1x50x1600xbf16>
    %6 = vector.shape_cast %5 : vector<1x50x1600xbf16> to vector<50x1600xbf16>
    %cst = arith.constant dense<0.000000e+00> : vector<8x1600xf32>
    %7 = tpu.matmul %4, %6, %cst {dimension_numbers = #tpu.dot_dimension_numbers<[1], [0], [0], [1], [0, 0, 1, 1], [], []>} : vector<8x50xbf16>, vector<50x1600xbf16>, vector<8x1600xf32> -> vector<8x1600xf32>
    %8 = arith.addf %3, %7 : vector<8x1600xf32>
    %c0_7 = arith.constant 0 : index
    %c0_8 = arith.constant 0 : index
    %9 = vector.load %arg6[%c0_7, %c0_8] : memref<8x1600xf32, #tpu.memory_space<vmem>>, vector<8x1600xf32>
    tpu.vector_store %arg6[%c0_7, %c0_8], %8 {strides = array<i32>} : memref<8x1600xf32, #tpu.memory_space<vmem>>, vector<8x1600xf32>,
    %c0_i32_9 = arith.constant 0 : i32
    %10 = arith.cmpi eq, %arg2, %c0_i32_9 : i32
    %11 = arith.extui %10 : i1 to i32
    %c0_i32_10 = arith.constant 0 : i32
    %12 = arith.cmpi ne, %11, %c0_i32_10 : i32
    scf.if %12 {
      %c0_11 = arith.constant 0 : index
      %c0_12 = arith.constant 0 : index
      %13 = vector.load %arg6[%c0_11, %c0_12] : memref<8x1600xf32, #tpu.memory_space<vmem>>, vector<8x1600xf32>
      %cst_13 = arith.constant dense<0.000000e+00> : vector<8xf32>
      %14 = vector.multi_reduction <add>, %13, %cst_13 [1] : vector<8x1600xf32> to vector<8xf32>
      %15 = vector.shape_cast %14 : vector<8xf32> to vector<8x1xf32>
      %cst_14 = arith.constant 1.600000e+03 : f32
      %16 = vector.broadcast %cst_14 : f32 to vector<8x1xf32>
      %17 = arith.divf %15, %16 : vector<8x1xf32>
      %18 = vector.broadcast %17 : vector<8x1xf32> to vector<8x1600xf32>
      %19 = arith.subf %13, %18 : vector<8x1600xf32>
      %20 = arith.mulf %19, %19 : vector<8x1600xf32>
      %cst_15 = arith.constant dense<0.000000e+00> : vector<8xf32>
      %21 = vector.multi_reduction <add>, %20, %cst_15 [1] : vector<8x1600xf32> to vector<8xf32>
      %22 = vector.shape_cast %21 : vector<8xf32> to vector<8x1xf32>
      %cst_16 = arith.constant 1.600000e+03 : f32
      %23 = vector.broadcast %cst_16 : f32 to vector<8x1xf32>
      %24 = arith.divf %22, %23 : vector<8x1xf32>
      %25 = vector.broadcast %17 : vector<8x1xf32> to vector<8x1600xf32>
      %26 = arith.subf %13, %25 : vector<8x1600xf32>
      %cst_17 = arith.constant 9.99999974E-6 : f32
      %27 = vector.broadcast %cst_17 : f32 to vector<8x1xf32>
      %28 = arith.addf %24, %27 : vector<8x1xf32>
      %29 = math.rsqrt %28 : vector<8x1xf32>
      %30 = vector.broadcast %29 : vector<8x1xf32> to vector<8x1600xf32>
      %31 = arith.mulf %26, %30 : vector<8x1600xf32>
      %cst_18 = arith.constant 0.000000e+00 : f32
      %32 = vector.broadcast %cst_18 : f32 to vector<8x1600xf32>
      %33 = arith.cmpf oge, %31, %32 : vector<8x1600xf32>
      %cst_19 = arith.constant 2.000000e-01 : f32
      %34 = vector.broadcast %cst_19 : f32 to vector<8x1600xf32>
      %35 = arith.mulf %34, %31 : vector<8x1600xf32>
      %36 = arith.select %33, %31, %35 : vector<8x1600xi1>, vector<8x1600xf32>
      %37 = arith.truncf %36 : vector<8x1600xf32> to vector<8x1600xbf16>
      %c0_20 = arith.constant 0 : index
      %c0_21 = arith.constant 0 : index
      %c0_22 = arith.constant 0 : index
      %38 = vector.load %arg5[%c0_20, %c0_21, %c0_22] : memref<1x8x1600xbf16, #tpu.memory_space<vmem>>, vector<1x8x1600xbf16>
      %39 = vector.shape_cast %38 : vector<1x8x1600xbf16> to vector<8x1600xbf16>
      %40 = vector.shape_cast %37 : vector<8x1600xbf16> to vector<1x8x1600xbf16>
      tpu.vector_store %arg5[%c0_20, %c0_21, %c0_22], %40 {strides = array<i32>} : memref<1x8x1600xbf16, #tpu.memory_space<vmem>>, vector<1x8x1600xbf16>,
    } else {
    }
    return
  }
  func.func @transform_0(%arg0: i32, %arg1: i32, %arg2: i32) -> (i32, i32, i32) {
    %c0_i32 = arith.constant 0 : i32
    %c0_i32_0 = arith.constant 0 : i32
    return %arg0, %arg2, %c0_i32 : i32, i32, i32
  }
  func.func @transform_1(%arg0: i32, %arg1: i32, %arg2: i32) -> (i32, i32) {
    %c0_i32 = arith.constant 0 : i32
    return %arg1, %arg2 : i32, i32
  }
  func.func @transform_2(%arg0: i32, %arg1: i32, %arg2: i32) -> (i32, i32, i32) {
    %c0_i32 = arith.constant 0 : i32
    %c0_i32_0 = arith.constant 0 : i32
    return %arg0, %arg1, %c0_i32 : i32, i32, i32
  }
}

module attributes {stable_mosaic.version = 11 : i64} {
  func.func @_conv_in_lrelu_kernel(%arg0: i32, %arg1: i32, %arg2: i32, %arg3: memref<1x200x400xbf16, #tpu.memory_space<vmem>>, %arg4: memref<16x200xbf16, #tpu.memory_space<vmem>>, %arg5: memref<1x16x400xbf16, #tpu.memory_space<vmem>>, %arg6: memref<16x400xf32, #tpu.memory_space<vmem>>) attributes {dimension_semantics = [#tpu.dimension_semantics<parallel>, #tpu.dimension_semantics<parallel>, #tpu.dimension_semantics<arbitrary>], iteration_bounds = array<i64: 2, 1, 1>, scalar_prefetch = 0 : i64, scratch_operands = 1 : i64, tpu.core_type = #tpu.core_type<tc>, window_params = [{transform_indices = @transform_0, window_bounds = array<i64: 1, 200, 400>}, {transform_indices = @transform_1, window_bounds = array<i64: 16, 200>}, {transform_indices = @transform_2, window_bounds = array<i64: 1, 16, 400>}]} {
    %c0_i32 = arith.constant 0 : i32
    %0 = arith.cmpi eq, %arg2, %c0_i32 : i32
    %1 = arith.extui %0 : i1 to i32
    %c0_i32_0 = arith.constant 0 : i32
    %2 = arith.cmpi ne, %1, %c0_i32_0 : i32
    scf.if %2 {
      %cst_11 = arith.constant 0.000000e+00 : f32
      %13 = vector.broadcast %cst_11 : f32 to vector<16x400xf32>
      %c0_12 = arith.constant 0 : index
      %c0_13 = arith.constant 0 : index
      %14 = vector.load %arg6[%c0_12, %c0_13] : memref<16x400xf32, #tpu.memory_space<vmem>>, vector<16x400xf32>
      tpu.vector_store %arg6[%c0_12, %c0_13], %13 {strides = array<i32>} : memref<16x400xf32, #tpu.memory_space<vmem>>, vector<16x400xf32>,
    } else {
    }
    %c0 = arith.constant 0 : index
    %c0_1 = arith.constant 0 : index
    %3 = vector.load %arg6[%c0, %c0_1] : memref<16x400xf32, #tpu.memory_space<vmem>>, vector<16x400xf32>
    %c0_2 = arith.constant 0 : index
    %c0_3 = arith.constant 0 : index
    %4 = vector.load %arg4[%c0_2, %c0_3] : memref<16x200xbf16, #tpu.memory_space<vmem>>, vector<16x200xbf16>
    %c0_4 = arith.constant 0 : index
    %c0_5 = arith.constant 0 : index
    %c0_6 = arith.constant 0 : index
    %5 = vector.load %arg3[%c0_4, %c0_5, %c0_6] : memref<1x200x400xbf16, #tpu.memory_space<vmem>>, vector<1x200x400xbf16>
    %6 = vector.shape_cast %5 : vector<1x200x400xbf16> to vector<200x400xbf16>
    %cst = arith.constant dense<0.000000e+00> : vector<16x400xf32>
    %7 = tpu.matmul %4, %6, %cst {dimension_numbers = #tpu.dot_dimension_numbers<[1], [0], [0], [1], [0, 0, 1, 1], [], []>} : vector<16x200xbf16>, vector<200x400xbf16>, vector<16x400xf32> -> vector<16x400xf32>
    %8 = arith.addf %3, %7 : vector<16x400xf32>
    %c0_7 = arith.constant 0 : index
    %c0_8 = arith.constant 0 : index
    %9 = vector.load %arg6[%c0_7, %c0_8] : memref<16x400xf32, #tpu.memory_space<vmem>>, vector<16x400xf32>
    tpu.vector_store %arg6[%c0_7, %c0_8], %8 {strides = array<i32>} : memref<16x400xf32, #tpu.memory_space<vmem>>, vector<16x400xf32>,
    %c0_i32_9 = arith.constant 0 : i32
    %10 = arith.cmpi eq, %arg2, %c0_i32_9 : i32
    %11 = arith.extui %10 : i1 to i32
    %c0_i32_10 = arith.constant 0 : i32
    %12 = arith.cmpi ne, %11, %c0_i32_10 : i32
    scf.if %12 {
      %c0_11 = arith.constant 0 : index
      %c0_12 = arith.constant 0 : index
      %13 = vector.load %arg6[%c0_11, %c0_12] : memref<16x400xf32, #tpu.memory_space<vmem>>, vector<16x400xf32>
      %cst_13 = arith.constant dense<0.000000e+00> : vector<16xf32>
      %14 = vector.multi_reduction <add>, %13, %cst_13 [1] : vector<16x400xf32> to vector<16xf32>
      %15 = vector.shape_cast %14 : vector<16xf32> to vector<16x1xf32>
      %cst_14 = arith.constant 4.000000e+02 : f32
      %16 = vector.broadcast %cst_14 : f32 to vector<16x1xf32>
      %17 = arith.divf %15, %16 : vector<16x1xf32>
      %18 = vector.broadcast %17 : vector<16x1xf32> to vector<16x400xf32>
      %19 = arith.subf %13, %18 : vector<16x400xf32>
      %20 = arith.mulf %19, %19 : vector<16x400xf32>
      %cst_15 = arith.constant dense<0.000000e+00> : vector<16xf32>
      %21 = vector.multi_reduction <add>, %20, %cst_15 [1] : vector<16x400xf32> to vector<16xf32>
      %22 = vector.shape_cast %21 : vector<16xf32> to vector<16x1xf32>
      %cst_16 = arith.constant 4.000000e+02 : f32
      %23 = vector.broadcast %cst_16 : f32 to vector<16x1xf32>
      %24 = arith.divf %22, %23 : vector<16x1xf32>
      %25 = vector.broadcast %17 : vector<16x1xf32> to vector<16x400xf32>
      %26 = arith.subf %13, %25 : vector<16x400xf32>
      %cst_17 = arith.constant 9.99999974E-6 : f32
      %27 = vector.broadcast %cst_17 : f32 to vector<16x1xf32>
      %28 = arith.addf %24, %27 : vector<16x1xf32>
      %29 = math.rsqrt %28 : vector<16x1xf32>
      %30 = vector.broadcast %29 : vector<16x1xf32> to vector<16x400xf32>
      %31 = arith.mulf %26, %30 : vector<16x400xf32>
      %cst_18 = arith.constant 0.000000e+00 : f32
      %32 = vector.broadcast %cst_18 : f32 to vector<16x400xf32>
      %33 = arith.cmpf oge, %31, %32 : vector<16x400xf32>
      %cst_19 = arith.constant 2.000000e-01 : f32
      %34 = vector.broadcast %cst_19 : f32 to vector<16x400xf32>
      %35 = arith.mulf %34, %31 : vector<16x400xf32>
      %36 = arith.select %33, %31, %35 : vector<16x400xi1>, vector<16x400xf32>
      %37 = arith.truncf %36 : vector<16x400xf32> to vector<16x400xbf16>
      %c0_20 = arith.constant 0 : index
      %c0_21 = arith.constant 0 : index
      %c0_22 = arith.constant 0 : index
      %38 = vector.load %arg5[%c0_20, %c0_21, %c0_22] : memref<1x16x400xbf16, #tpu.memory_space<vmem>>, vector<1x16x400xbf16>
      %39 = vector.shape_cast %38 : vector<1x16x400xbf16> to vector<16x400xbf16>
      %40 = vector.shape_cast %37 : vector<16x400xbf16> to vector<1x16x400xbf16>
      tpu.vector_store %arg5[%c0_20, %c0_21, %c0_22], %40 {strides = array<i32>} : memref<1x16x400xbf16, #tpu.memory_space<vmem>>, vector<1x16x400xbf16>,
    } else {
    }
    return
  }
  func.func @transform_0(%arg0: i32, %arg1: i32, %arg2: i32) -> (i32, i32, i32) {
    %c0_i32 = arith.constant 0 : i32
    %c0_i32_0 = arith.constant 0 : i32
    return %arg0, %arg2, %c0_i32 : i32, i32, i32
  }
  func.func @transform_1(%arg0: i32, %arg1: i32, %arg2: i32) -> (i32, i32) {
    %c0_i32 = arith.constant 0 : i32
    return %arg1, %arg2 : i32, i32
  }
  func.func @transform_2(%arg0: i32, %arg1: i32, %arg2: i32) -> (i32, i32, i32) {
    %c0_i32 = arith.constant 0 : i32
    %c0_i32_0 = arith.constant 0 : i32
    return %arg0, %arg1, %c0_i32 : i32, i32, i32
  }
}

module attributes {stable_mosaic.version = 11 : i64} {
  func.func @_conv_in_lrelu_kernel(%arg0: i32, %arg1: i32, %arg2: i32, %arg3: memref<1x400x100xbf16, #tpu.memory_space<vmem>>, %arg4: memref<32x400xbf16, #tpu.memory_space<vmem>>, %arg5: memref<1x32x100xbf16, #tpu.memory_space<vmem>>, %arg6: memref<32x100xf32, #tpu.memory_space<vmem>>) attributes {dimension_semantics = [#tpu.dimension_semantics<parallel>, #tpu.dimension_semantics<parallel>, #tpu.dimension_semantics<arbitrary>], iteration_bounds = array<i64: 2, 1, 1>, scalar_prefetch = 0 : i64, scratch_operands = 1 : i64, tpu.core_type = #tpu.core_type<tc>, window_params = [{transform_indices = @transform_0, window_bounds = array<i64: 1, 400, 100>}, {transform_indices = @transform_1, window_bounds = array<i64: 32, 400>}, {transform_indices = @transform_2, window_bounds = array<i64: 1, 32, 100>}]} {
    %c0_i32 = arith.constant 0 : i32
    %0 = arith.cmpi eq, %arg2, %c0_i32 : i32
    %1 = arith.extui %0 : i1 to i32
    %c0_i32_0 = arith.constant 0 : i32
    %2 = arith.cmpi ne, %1, %c0_i32_0 : i32
    scf.if %2 {
      %cst_11 = arith.constant 0.000000e+00 : f32
      %13 = vector.broadcast %cst_11 : f32 to vector<32x100xf32>
      %c0_12 = arith.constant 0 : index
      %c0_13 = arith.constant 0 : index
      %14 = vector.load %arg6[%c0_12, %c0_13] : memref<32x100xf32, #tpu.memory_space<vmem>>, vector<32x100xf32>
      tpu.vector_store %arg6[%c0_12, %c0_13], %13 {strides = array<i32>} : memref<32x100xf32, #tpu.memory_space<vmem>>, vector<32x100xf32>,
    } else {
    }
    %c0 = arith.constant 0 : index
    %c0_1 = arith.constant 0 : index
    %3 = vector.load %arg6[%c0, %c0_1] : memref<32x100xf32, #tpu.memory_space<vmem>>, vector<32x100xf32>
    %c0_2 = arith.constant 0 : index
    %c0_3 = arith.constant 0 : index
    %4 = vector.load %arg4[%c0_2, %c0_3] : memref<32x400xbf16, #tpu.memory_space<vmem>>, vector<32x400xbf16>
    %c0_4 = arith.constant 0 : index
    %c0_5 = arith.constant 0 : index
    %c0_6 = arith.constant 0 : index
    %5 = vector.load %arg3[%c0_4, %c0_5, %c0_6] : memref<1x400x100xbf16, #tpu.memory_space<vmem>>, vector<1x400x100xbf16>
    %6 = vector.shape_cast %5 : vector<1x400x100xbf16> to vector<400x100xbf16>
    %cst = arith.constant dense<0.000000e+00> : vector<32x100xf32>
    %7 = tpu.matmul %4, %6, %cst {dimension_numbers = #tpu.dot_dimension_numbers<[1], [0], [0], [1], [0, 0, 1, 1], [], []>} : vector<32x400xbf16>, vector<400x100xbf16>, vector<32x100xf32> -> vector<32x100xf32>
    %8 = arith.addf %3, %7 : vector<32x100xf32>
    %c0_7 = arith.constant 0 : index
    %c0_8 = arith.constant 0 : index
    %9 = vector.load %arg6[%c0_7, %c0_8] : memref<32x100xf32, #tpu.memory_space<vmem>>, vector<32x100xf32>
    tpu.vector_store %arg6[%c0_7, %c0_8], %8 {strides = array<i32>} : memref<32x100xf32, #tpu.memory_space<vmem>>, vector<32x100xf32>,
    %c0_i32_9 = arith.constant 0 : i32
    %10 = arith.cmpi eq, %arg2, %c0_i32_9 : i32
    %11 = arith.extui %10 : i1 to i32
    %c0_i32_10 = arith.constant 0 : i32
    %12 = arith.cmpi ne, %11, %c0_i32_10 : i32
    scf.if %12 {
      %c0_11 = arith.constant 0 : index
      %c0_12 = arith.constant 0 : index
      %13 = vector.load %arg6[%c0_11, %c0_12] : memref<32x100xf32, #tpu.memory_space<vmem>>, vector<32x100xf32>
      %cst_13 = arith.constant dense<0.000000e+00> : vector<32xf32>
      %14 = vector.multi_reduction <add>, %13, %cst_13 [1] : vector<32x100xf32> to vector<32xf32>
      %15 = vector.shape_cast %14 : vector<32xf32> to vector<32x1xf32>
      %cst_14 = arith.constant 1.000000e+02 : f32
      %16 = vector.broadcast %cst_14 : f32 to vector<32x1xf32>
      %17 = arith.divf %15, %16 : vector<32x1xf32>
      %18 = vector.broadcast %17 : vector<32x1xf32> to vector<32x100xf32>
      %19 = arith.subf %13, %18 : vector<32x100xf32>
      %20 = arith.mulf %19, %19 : vector<32x100xf32>
      %cst_15 = arith.constant dense<0.000000e+00> : vector<32xf32>
      %21 = vector.multi_reduction <add>, %20, %cst_15 [1] : vector<32x100xf32> to vector<32xf32>
      %22 = vector.shape_cast %21 : vector<32xf32> to vector<32x1xf32>
      %cst_16 = arith.constant 1.000000e+02 : f32
      %23 = vector.broadcast %cst_16 : f32 to vector<32x1xf32>
      %24 = arith.divf %22, %23 : vector<32x1xf32>
      %25 = vector.broadcast %17 : vector<32x1xf32> to vector<32x100xf32>
      %26 = arith.subf %13, %25 : vector<32x100xf32>
      %cst_17 = arith.constant 9.99999974E-6 : f32
      %27 = vector.broadcast %cst_17 : f32 to vector<32x1xf32>
      %28 = arith.addf %24, %27 : vector<32x1xf32>
      %29 = math.rsqrt %28 : vector<32x1xf32>
      %30 = vector.broadcast %29 : vector<32x1xf32> to vector<32x100xf32>
      %31 = arith.mulf %26, %30 : vector<32x100xf32>
      %cst_18 = arith.constant 0.000000e+00 : f32
      %32 = vector.broadcast %cst_18 : f32 to vector<32x100xf32>
      %33 = arith.cmpf oge, %31, %32 : vector<32x100xf32>
      %cst_19 = arith.constant 2.000000e-01 : f32
      %34 = vector.broadcast %cst_19 : f32 to vector<32x100xf32>
      %35 = arith.mulf %34, %31 : vector<32x100xf32>
      %36 = arith.select %33, %31, %35 : vector<32x100xi1>, vector<32x100xf32>
      %37 = arith.truncf %36 : vector<32x100xf32> to vector<32x100xbf16>
      %c0_20 = arith.constant 0 : index
      %c0_21 = arith.constant 0 : index
      %c0_22 = arith.constant 0 : index
      %38 = vector.load %arg5[%c0_20, %c0_21, %c0_22] : memref<1x32x100xbf16, #tpu.memory_space<vmem>>, vector<1x32x100xbf16>
      %39 = vector.shape_cast %38 : vector<1x32x100xbf16> to vector<32x100xbf16>
      %40 = vector.shape_cast %37 : vector<32x100xbf16> to vector<1x32x100xbf16>
      tpu.vector_store %arg5[%c0_20, %c0_21, %c0_22], %40 {strides = array<i32>} : memref<1x32x100xbf16, #tpu.memory_space<vmem>>, vector<1x32x100xbf16>,
    } else {
    }
    return
  }
  func.func @transform_0(%arg0: i32, %arg1: i32, %arg2: i32) -> (i32, i32, i32) {
    %c0_i32 = arith.constant 0 : i32
    %c0_i32_0 = arith.constant 0 : i32
    return %arg0, %arg2, %c0_i32 : i32, i32, i32
  }
  func.func @transform_1(%arg0: i32, %arg1: i32, %arg2: i32) -> (i32, i32) {
    %c0_i32 = arith.constant 0 : i32
    return %arg1, %arg2 : i32, i32
  }
  func.func @transform_2(%arg0: i32, %arg1: i32, %arg2: i32) -> (i32, i32, i32) {
    %c0_i32 = arith.constant 0 : i32
    %c0_i32_0 = arith.constant 0 : i32
    return %arg0, %arg1, %c0_i32 : i32, i32, i32
  }
}

module attributes {stable_mosaic.version = 11 : i64} {
  func.func @_conv_in_lrelu_kernel(%arg0: i32, %arg1: i32, %arg2: i32, %arg3: memref<1x512x25xbf16, #tpu.memory_space<vmem>>, %arg4: memref<64x512xbf16, #tpu.memory_space<vmem>>, %arg5: memref<1x64x25xbf16, #tpu.memory_space<vmem>>, %arg6: memref<64x25xf32, #tpu.memory_space<vmem>>) attributes {dimension_semantics = [#tpu.dimension_semantics<parallel>, #tpu.dimension_semantics<parallel>, #tpu.dimension_semantics<arbitrary>], iteration_bounds = array<i64: 2, 1, 2>, scalar_prefetch = 0 : i64, scratch_operands = 1 : i64, tpu.core_type = #tpu.core_type<tc>, window_params = [{transform_indices = @transform_0, window_bounds = array<i64: 1, 512, 25>}, {transform_indices = @transform_1, window_bounds = array<i64: 64, 512>}, {transform_indices = @transform_2, window_bounds = array<i64: 1, 64, 25>}]} {
    %c0_i32 = arith.constant 0 : i32
    %0 = arith.cmpi eq, %arg2, %c0_i32 : i32
    %1 = arith.extui %0 : i1 to i32
    %c0_i32_0 = arith.constant 0 : i32
    %2 = arith.cmpi ne, %1, %c0_i32_0 : i32
    scf.if %2 {
      %cst_10 = arith.constant 0.000000e+00 : f32
      %13 = vector.broadcast %cst_10 : f32 to vector<64x25xf32>
      %c0_11 = arith.constant 0 : index
      %c0_12 = arith.constant 0 : index
      %14 = vector.load %arg6[%c0_11, %c0_12] : memref<64x25xf32, #tpu.memory_space<vmem>>, vector<64x25xf32>
      tpu.vector_store %arg6[%c0_11, %c0_12], %13 {strides = array<i32>} : memref<64x25xf32, #tpu.memory_space<vmem>>, vector<64x25xf32>,
    } else {
    }
    %c0 = arith.constant 0 : index
    %c0_1 = arith.constant 0 : index
    %3 = vector.load %arg6[%c0, %c0_1] : memref<64x25xf32, #tpu.memory_space<vmem>>, vector<64x25xf32>
    %c0_2 = arith.constant 0 : index
    %c0_3 = arith.constant 0 : index
    %4 = vector.load %arg4[%c0_2, %c0_3] : memref<64x512xbf16, #tpu.memory_space<vmem>>, vector<64x512xbf16>
    %c0_4 = arith.constant 0 : index
    %c0_5 = arith.constant 0 : index
    %c0_6 = arith.constant 0 : index
    %5 = vector.load %arg3[%c0_4, %c0_5, %c0_6] : memref<1x512x25xbf16, #tpu.memory_space<vmem>>, vector<1x512x25xbf16>
    %6 = vector.shape_cast %5 : vector<1x512x25xbf16> to vector<512x25xbf16>
    %cst = arith.constant dense<0.000000e+00> : vector<64x25xf32>
    %7 = tpu.matmul %4, %6, %cst {dimension_numbers = #tpu.dot_dimension_numbers<[1], [0], [0], [1], [0, 0, 1, 1], [], []>} : vector<64x512xbf16>, vector<512x25xbf16>, vector<64x25xf32> -> vector<64x25xf32>
    %8 = arith.addf %3, %7 : vector<64x25xf32>
    %c0_7 = arith.constant 0 : index
    %c0_8 = arith.constant 0 : index
    %9 = vector.load %arg6[%c0_7, %c0_8] : memref<64x25xf32, #tpu.memory_space<vmem>>, vector<64x25xf32>
    tpu.vector_store %arg6[%c0_7, %c0_8], %8 {strides = array<i32>} : memref<64x25xf32, #tpu.memory_space<vmem>>, vector<64x25xf32>,
    %c1_i32 = arith.constant 1 : i32
    %10 = arith.cmpi eq, %arg2, %c1_i32 : i32
    %11 = arith.extui %10 : i1 to i32
    %c0_i32_9 = arith.constant 0 : i32
    %12 = arith.cmpi ne, %11, %c0_i32_9 : i32
    scf.if %12 {
      %c0_10 = arith.constant 0 : index
      %c0_11 = arith.constant 0 : index
      %13 = vector.load %arg6[%c0_10, %c0_11] : memref<64x25xf32, #tpu.memory_space<vmem>>, vector<64x25xf32>
      %cst_12 = arith.constant dense<0.000000e+00> : vector<64xf32>
      %14 = vector.multi_reduction <add>, %13, %cst_12 [1] : vector<64x25xf32> to vector<64xf32>
      %15 = vector.shape_cast %14 : vector<64xf32> to vector<64x1xf32>
      %cst_13 = arith.constant 2.500000e+01 : f32
      %16 = vector.broadcast %cst_13 : f32 to vector<64x1xf32>
      %17 = arith.divf %15, %16 : vector<64x1xf32>
      %18 = vector.broadcast %17 : vector<64x1xf32> to vector<64x25xf32>
      %19 = arith.subf %13, %18 : vector<64x25xf32>
      %20 = arith.mulf %19, %19 : vector<64x25xf32>
      %cst_14 = arith.constant dense<0.000000e+00> : vector<64xf32>
      %21 = vector.multi_reduction <add>, %20, %cst_14 [1] : vector<64x25xf32> to vector<64xf32>
      %22 = vector.shape_cast %21 : vector<64xf32> to vector<64x1xf32>
      %cst_15 = arith.constant 2.500000e+01 : f32
      %23 = vector.broadcast %cst_15 : f32 to vector<64x1xf32>
      %24 = arith.divf %22, %23 : vector<64x1xf32>
      %25 = vector.broadcast %17 : vector<64x1xf32> to vector<64x25xf32>
      %26 = arith.subf %13, %25 : vector<64x25xf32>
      %cst_16 = arith.constant 9.99999974E-6 : f32
      %27 = vector.broadcast %cst_16 : f32 to vector<64x1xf32>
      %28 = arith.addf %24, %27 : vector<64x1xf32>
      %29 = math.rsqrt %28 : vector<64x1xf32>
      %30 = vector.broadcast %29 : vector<64x1xf32> to vector<64x25xf32>
      %31 = arith.mulf %26, %30 : vector<64x25xf32>
      %cst_17 = arith.constant 0.000000e+00 : f32
      %32 = vector.broadcast %cst_17 : f32 to vector<64x25xf32>
      %33 = arith.cmpf oge, %31, %32 : vector<64x25xf32>
      %cst_18 = arith.constant 2.000000e-01 : f32
      %34 = vector.broadcast %cst_18 : f32 to vector<64x25xf32>
      %35 = arith.mulf %34, %31 : vector<64x25xf32>
      %36 = arith.select %33, %31, %35 : vector<64x25xi1>, vector<64x25xf32>
      %37 = arith.truncf %36 : vector<64x25xf32> to vector<64x25xbf16>
      %c0_19 = arith.constant 0 : index
      %c0_20 = arith.constant 0 : index
      %c0_21 = arith.constant 0 : index
      %38 = vector.load %arg5[%c0_19, %c0_20, %c0_21] : memref<1x64x25xbf16, #tpu.memory_space<vmem>>, vector<1x64x25xbf16>
      %39 = vector.shape_cast %38 : vector<1x64x25xbf16> to vector<64x25xbf16>
      %40 = vector.shape_cast %37 : vector<64x25xbf16> to vector<1x64x25xbf16>
      tpu.vector_store %arg5[%c0_19, %c0_20, %c0_21], %40 {strides = array<i32>} : memref<1x64x25xbf16, #tpu.memory_space<vmem>>, vector<1x64x25xbf16>,
    } else {
    }
    return
  }
  func.func @transform_0(%arg0: i32, %arg1: i32, %arg2: i32) -> (i32, i32, i32) {
    %c0_i32 = arith.constant 0 : i32
    %c0_i32_0 = arith.constant 0 : i32
    return %arg0, %arg2, %c0_i32 : i32, i32, i32
  }
  func.func @transform_1(%arg0: i32, %arg1: i32, %arg2: i32) -> (i32, i32) {
    %c0_i32 = arith.constant 0 : i32
    return %arg1, %arg2 : i32, i32
  }
  func.func @transform_2(%arg0: i32, %arg1: i32, %arg2: i32) -> (i32, i32, i32) {
    %c0_i32 = arith.constant 0 : i32
    %c0_i32_0 = arith.constant 0 : i32
    return %arg0, %arg1, %c0_i32 : i32, i32, i32
  }
}

module attributes {stable_mosaic.version = 11 : i64} {
  func.func @_conv_in_lrelu_kernel(%arg0: i32, %arg1: i32, %arg2: i32, %arg3: memref<1x512x9xbf16, #tpu.memory_space<vmem>>, %arg4: memref<128x512xbf16, #tpu.memory_space<vmem>>, %arg5: memref<1x128x9xbf16, #tpu.memory_space<vmem>>, %arg6: memref<128x9xf32, #tpu.memory_space<vmem>>) attributes {dimension_semantics = [#tpu.dimension_semantics<parallel>, #tpu.dimension_semantics<parallel>, #tpu.dimension_semantics<arbitrary>], iteration_bounds = array<i64: 2, 1, 4>, scalar_prefetch = 0 : i64, scratch_operands = 1 : i64, tpu.core_type = #tpu.core_type<tc>, window_params = [{transform_indices = @transform_0, window_bounds = array<i64: 1, 512, 9>}, {transform_indices = @transform_1, window_bounds = array<i64: 128, 512>}, {transform_indices = @transform_2, window_bounds = array<i64: 1, 128, 9>}]} {
    %c0_i32 = arith.constant 0 : i32
    %0 = arith.cmpi eq, %arg2, %c0_i32 : i32
    %1 = arith.extui %0 : i1 to i32
    %c0_i32_0 = arith.constant 0 : i32
    %2 = arith.cmpi ne, %1, %c0_i32_0 : i32
    scf.if %2 {
      %cst_10 = arith.constant 0.000000e+00 : f32
      %13 = vector.broadcast %cst_10 : f32 to vector<128x9xf32>
      %c0_11 = arith.constant 0 : index
      %c0_12 = arith.constant 0 : index
      %14 = vector.load %arg6[%c0_11, %c0_12] : memref<128x9xf32, #tpu.memory_space<vmem>>, vector<128x9xf32>
      tpu.vector_store %arg6[%c0_11, %c0_12], %13 {strides = array<i32>} : memref<128x9xf32, #tpu.memory_space<vmem>>, vector<128x9xf32>,
    } else {
    }
    %c0 = arith.constant 0 : index
    %c0_1 = arith.constant 0 : index
    %3 = vector.load %arg6[%c0, %c0_1] : memref<128x9xf32, #tpu.memory_space<vmem>>, vector<128x9xf32>
    %c0_2 = arith.constant 0 : index
    %c0_3 = arith.constant 0 : index
    %4 = vector.load %arg4[%c0_2, %c0_3] : memref<128x512xbf16, #tpu.memory_space<vmem>>, vector<128x512xbf16>
    %c0_4 = arith.constant 0 : index
    %c0_5 = arith.constant 0 : index
    %c0_6 = arith.constant 0 : index
    %5 = vector.load %arg3[%c0_4, %c0_5, %c0_6] : memref<1x512x9xbf16, #tpu.memory_space<vmem>>, vector<1x512x9xbf16>
    %6 = vector.shape_cast %5 : vector<1x512x9xbf16> to vector<512x9xbf16>
    %cst = arith.constant dense<0.000000e+00> : vector<128x9xf32>
    %7 = tpu.matmul %4, %6, %cst {dimension_numbers = #tpu.dot_dimension_numbers<[1], [0], [0], [1], [0, 0, 1, 1], [], []>} : vector<128x512xbf16>, vector<512x9xbf16>, vector<128x9xf32> -> vector<128x9xf32>
    %8 = arith.addf %3, %7 : vector<128x9xf32>
    %c0_7 = arith.constant 0 : index
    %c0_8 = arith.constant 0 : index
    %9 = vector.load %arg6[%c0_7, %c0_8] : memref<128x9xf32, #tpu.memory_space<vmem>>, vector<128x9xf32>
    tpu.vector_store %arg6[%c0_7, %c0_8], %8 {strides = array<i32>} : memref<128x9xf32, #tpu.memory_space<vmem>>, vector<128x9xf32>,
    %c3_i32 = arith.constant 3 : i32
    %10 = arith.cmpi eq, %arg2, %c3_i32 : i32
    %11 = arith.extui %10 : i1 to i32
    %c0_i32_9 = arith.constant 0 : i32
    %12 = arith.cmpi ne, %11, %c0_i32_9 : i32
    scf.if %12 {
      %c0_10 = arith.constant 0 : index
      %c0_11 = arith.constant 0 : index
      %13 = vector.load %arg6[%c0_10, %c0_11] : memref<128x9xf32, #tpu.memory_space<vmem>>, vector<128x9xf32>
      %cst_12 = arith.constant dense<0.000000e+00> : vector<128xf32>
      %14 = vector.multi_reduction <add>, %13, %cst_12 [1] : vector<128x9xf32> to vector<128xf32>
      %15 = vector.shape_cast %14 : vector<128xf32> to vector<128x1xf32>
      %cst_13 = arith.constant 9.000000e+00 : f32
      %16 = vector.broadcast %cst_13 : f32 to vector<128x1xf32>
      %17 = arith.divf %15, %16 : vector<128x1xf32>
      %18 = vector.broadcast %17 : vector<128x1xf32> to vector<128x9xf32>
      %19 = arith.subf %13, %18 : vector<128x9xf32>
      %20 = arith.mulf %19, %19 : vector<128x9xf32>
      %cst_14 = arith.constant dense<0.000000e+00> : vector<128xf32>
      %21 = vector.multi_reduction <add>, %20, %cst_14 [1] : vector<128x9xf32> to vector<128xf32>
      %22 = vector.shape_cast %21 : vector<128xf32> to vector<128x1xf32>
      %cst_15 = arith.constant 9.000000e+00 : f32
      %23 = vector.broadcast %cst_15 : f32 to vector<128x1xf32>
      %24 = arith.divf %22, %23 : vector<128x1xf32>
      %25 = vector.broadcast %17 : vector<128x1xf32> to vector<128x9xf32>
      %26 = arith.subf %13, %25 : vector<128x9xf32>
      %cst_16 = arith.constant 9.99999974E-6 : f32
      %27 = vector.broadcast %cst_16 : f32 to vector<128x1xf32>
      %28 = arith.addf %24, %27 : vector<128x1xf32>
      %29 = math.rsqrt %28 : vector<128x1xf32>
      %30 = vector.broadcast %29 : vector<128x1xf32> to vector<128x9xf32>
      %31 = arith.mulf %26, %30 : vector<128x9xf32>
      %cst_17 = arith.constant 0.000000e+00 : f32
      %32 = vector.broadcast %cst_17 : f32 to vector<128x9xf32>
      %33 = arith.cmpf oge, %31, %32 : vector<128x9xf32>
      %cst_18 = arith.constant 2.000000e-01 : f32
      %34 = vector.broadcast %cst_18 : f32 to vector<128x9xf32>
      %35 = arith.mulf %34, %31 : vector<128x9xf32>
      %36 = arith.select %33, %31, %35 : vector<128x9xi1>, vector<128x9xf32>
      %37 = arith.truncf %36 : vector<128x9xf32> to vector<128x9xbf16>
      %c0_19 = arith.constant 0 : index
      %c0_20 = arith.constant 0 : index
      %c0_21 = arith.constant 0 : index
      %38 = vector.load %arg5[%c0_19, %c0_20, %c0_21] : memref<1x128x9xbf16, #tpu.memory_space<vmem>>, vector<1x128x9xbf16>
      %39 = vector.shape_cast %38 : vector<1x128x9xbf16> to vector<128x9xbf16>
      %40 = vector.shape_cast %37 : vector<128x9xbf16> to vector<1x128x9xbf16>
      tpu.vector_store %arg5[%c0_19, %c0_20, %c0_21], %40 {strides = array<i32>} : memref<1x128x9xbf16, #tpu.memory_space<vmem>>, vector<1x128x9xbf16>,
    } else {
    }
    return
  }
  func.func @transform_0(%arg0: i32, %arg1: i32, %arg2: i32) -> (i32, i32, i32) {
    %c0_i32 = arith.constant 0 : i32
    %c0_i32_0 = arith.constant 0 : i32
    return %arg0, %arg2, %c0_i32 : i32, i32, i32
  }
  func.func @transform_1(%arg0: i32, %arg1: i32, %arg2: i32) -> (i32, i32) {
    %c0_i32 = arith.constant 0 : i32
    return %arg1, %arg2 : i32, i32
  }
  func.func @transform_2(%arg0: i32, %arg1: i32, %arg2: i32) -> (i32, i32, i32) {
    %c0_i32 = arith.constant 0 : i32
    %c0_i32_0 = arith.constant 0 : i32
    return %arg0, %arg1, %c0_i32 : i32, i32, i32
  }
}

</mosaic_0001>

<bundles_post_ra>
// kernel: _lambda_.5
= control target key start
LH: loop header
LB: loop body
LE: loop exit
PB: predicated region body
PF: predicated region fallthrough
CT: control target
= control target key end

     0   :  { %s1337_s9 = smov 0   ;;  %s1339_s10 = smov 0   ;;  %s1522_s0 = inlined_call_operand.vmem [shape: bf16[2,50,1600], index: 0, kind: input, shape index: {}]   ;;  %s1523_s1 = inlined_call_operand.vmem [shape: bf16[8,50], index: 1, kind: input, shape index: {}]   ;;  %s1524_s2 = inlined_call_operand.vmem [shape: bf16[2,8,1600], index: 2, kind: output, shape index: {}]  }
   0x1   :  { %s1341_s11 = smov 0  }
   0x2 LB: > { %s31_s12 = sadd.s32 1, %s1314_s10  ;;  %p1051_p0 = scmp.ge.s32.totalorder %s1318_s11, 1  ;;  %s1318_s11 = sphi %s1341_s11, %s12_s11   ;;  %s1314_s10 = sphi %s1339_s10, %s1526_s10   ;;  %s1310_s9 = sphi %s1337_s9, %s1525_s9  }
   0x3   : > { %p33_p1 = scmp.ge.s32.totalorder %s31_s12, 2  ;;  %p155_p2 = scmp.lt.s32.totalorder %s1318_s11, 3 }
   0x5   : > { %s1528_s12 = smov (%p33_p1, %s31_s12), 0  ;;  %p156_p3 = pnand %p1051_p0, %p155_p2 }
   0x6   : > { %p194_p4 = scmp.lt.s32.totalorder (!%p156_p3), %s1310_s9, 1 }
   0x7   : > { %159 = sbr.rel (%p156_p3) target bundleno = 530 (0x212), region = 28 }
   0xc   : > { %s1530_s9 = smov (!%p194_p4, %s1310_s9), 1  ;;  %vm537_vm0 = vcmask 1040384   ;;  %v1398_v58 = vld [vmem:[%s1523_s1] sm:$0xf]  ;;  %vm533_vm1 = vcmask 408576   ;;  %vm237_vm2 = vcmask 523264  }
   0xd   : > { %s1264_s13 = smul.u32 364, %s1530_s9 }
   0xe   : > { %s1265_s19 = smul.u32 52, %s1530_s9 }
   0xf   : > { %s1361_s16 = scalar_lea.vmem %s1522_s0, %s1264_s13 }
  0x10   : > { %v295_v0 = vld [vmem:[%s1361_s16 + $0x138] sm:$0x11]  ;;  %v296_v1 = vld [vmem:[%s1361_s16 + $0x140] sm:$0x11]  ;;  %v1160_v6 = vld [vmem:[%s1361_s16 + $0xd0] sm:$0xf]  ;;  %s219_s22 = scalar_lea.vmem %s1524_s2, %s1265_s19 }
  0x11   : > { %v429_v2 = vunpack.c.l.b16 %v295_v0  ;;  %v430_v3 = vunpack.c.h.b16 %v295_v0  ;;  %v431_v4 = vunpack.c.l.b16 %v296_v1  ;;  %v432_v5 = vunpack.c.h.b16 %v296_v1  ;;  %v1257_v7 = vld [vmem:[%s1361_s16 + $0x100] sm:$0xf0]  ;;  %v1251_v12 = vld [vmem:[%s1361_s16 + $0xd4] sm:$0xf]  ;;  %v1162_v13 = vld [vmem:[%s1361_s16 + $0x104] sm:$0xf0] }
  0x12   : > { %v1168_v14 = vld [vmem:[%s1361_s16 + $0xd8] sm:$0xf]  ;;  %v1258_v15 = vld [vmem:[%s1361_s16 + $0x108] sm:$0xf0]  ;;  %v1252_v16 = vld [vmem:[%s1361_s16 + $0xdc] sm:$0xf]  ;;  %v1161_v22 = vor.u32 %v1257_v7, %v1160_v6  ;;  %v1165_v23 = vor.u32 %v1251_v12, %v1162_v13 }
  0x13   : > { %v481_v8 = vpack.c.b16 %v429_v2, %v429_v2  ;;  %v482_v9 = vpack.c.b16 %v430_v3, %v430_v3  ;;  %v483_v10 = vpack.c.b16 %v431_v4, %v431_v4  ;;  %v484_v11 = vpack.c.b16 %v432_v5, %v432_v5  ;;  %v1170_v17 = vld [vmem:[%s1361_s16 + $0x10c] sm:$0xf0]  ;;  %v1108_v24 = vld [vmem:[%s1361_s16 + $0x68] sm:$0xf]  ;;  %v1244_v25 = vld [vmem:[%s1361_s16 + $0x98] sm:$0xf0] }
  0x14   : > { %v1169_v26 = vor.u32 %v1258_v15, %v1168_v14  ;;  %v1173_v27 = vor.u32 %v1252_v16, %v1170_v17  ;;  %v1238_v28 = vld [vmem:[%s1361_s16 + $0x6c] sm:$0xf]  ;;  %v1110_v29 = vld [vmem:[%s1361_s16 + $0x9c] sm:$0xf0]  ;;  %v1116_v30 = vld [vmem:[%s1361_s16 + $0x70] sm:$0xf]  ;;  %v1109_v36 = vor.u32 %v1244_v25, %v1108_v24 }
  0x15   : > { %v539_v18 = vsel %vm537_vm0, %v481_v8, 0  ;;  %v542_v19 = vsel %vm537_vm0, %v482_v9, 0  ;;  %v545_v20 = vsel %vm537_vm0, %v483_v10, 0  ;;  %v548_v21 = vsel %vm537_vm0, %v484_v11, 0  ;;  %v1245_v31 = vld [vmem:[%s1361_s16 + $0xa0] sm:$0xf0] }
  0x16   : > { %581 = vmatpush.bf16.msra.mxu0 %v539_v18  ;;  %594 = vmatpush.bf16.msra.mxu1 %v542_v19  ;;  %v1239_v32 = vld [vmem:[%s1361_s16 + $0x74] sm:$0xf]  ;;  %v1118_v33 = vld [vmem:[%s1361_s16 + $0xa4] sm:$0xf0]  ;;  %v1113_v37 = vor.u32 %v1238_v28, %v1110_v29  ;;  %v1056_v38 = vld [vmem:[%s1361_s16] sm:$0xf]  ;;  %v1117_v42 = vor.u32 %v1245_v31, %v1116_v30 }
  0x17   : > { %607 = vmatpush.bf16.msra.mxu2 %v545_v20  ;;  %620 = vmatpush.bf16.msra.mxu3 %v548_v21  ;;  %v297_v34 = vld [vmem:[%s1361_s16 + $0x148] sm:$0x11]  ;;  %v298_v35 = vld [vmem:[%s1361_s16 + $0x150] sm:$0x11]  ;;  %v1121_v43 = vor.u32 %v1239_v32, %v1118_v33  ;;  %v1225_v44 = vld [vmem:[%s1361_s16 + $0x4] sm:$0xf] }
  0x18   : > { %v1231_v39 = vld [vmem:[%s1361_s16 + $0x30] sm:$0xf0]  ;;  %v433_v40 = vunpack.c.l.b16 %v297_v34  ;;  %v435_v41 = vunpack.c.l.b16 %v298_v35  ;;  %v1058_v45 = vld [vmem:[%s1361_s16 + $0x34] sm:$0xf0]  ;;  %v1064_v46 = vld [vmem:[%s1361_s16 + $0x8] sm:$0xf]  ;;  %v436_v50 = vunpack.c.h.b16 %v298_v35  ;;  %v434_v51 = vunpack.c.h.b16 %v297_v34 }
  0x19   : > { %v1232_v47 = vld [vmem:[%s1361_s16 + $0x38] sm:$0xf0]  ;;  %v1226_v48 = vld [vmem:[%s1361_s16 + $0xc] sm:$0xf]  ;;  %v1066_v49 = vld [vmem:[%s1361_s16 + $0x3c] sm:$0xf0]  ;;  %v1057_v54 = vor.u32 %v1231_v39, %v1056_v38  ;;  %v1061_v55 = vor.u32 %v1225_v44, %v1058_v45 }
  0x1a   : > { %582 = vmatpush.bf16.msra.mxu0 %v1161_v22  ;;  %595 = vmatpush.bf16.msra.mxu1 %v1165_v23  ;;  %v485_v52 = vpack.c.b16 %v433_v40, %v433_v40  ;;  %v487_v53 = vpack.c.b16 %v435_v41, %v435_v41  ;;  %v1065_v56 = vor.u32 %v1232_v47, %v1064_v46  ;;  %v1176_v61 = vld [vmem:[%s1361_s16 + $0xe0] sm:$0xf]  ;;  %v1259_v62 = vld [vmem:[%s1361_s16 + $0x110] sm:$0xf0]  ;;  %v1184_v1 = vld [vmem:[%s1361_s16 + $0xe8] sm:$0xf] }
  0x1b   : > { %608 = vmatpush.bf16.msra.mxu2 %v1169_v26  ;;  %621 = vmatpush.bf16.msra.mxu3 %v1173_v27  ;;  %v1069_v57 = vor.u32 %v1226_v48, %v1066_v49  ;;  %v488_v59 = vpack.c.b16 %v436_v50, %v436_v50  ;;  %v486_v60 = vpack.c.b16 %v434_v51, %v434_v51  ;;  %v1260_v2 = vld [vmem:[%s1361_s16 + $0x118] sm:$0xf0]  ;;  %v1254_v3 = vld [vmem:[%s1361_s16 + $0xec] sm:$0xf]  ;;  %v1186_v4 = vld [vmem:[%s1361_s16 + $0x11c] sm:$0xf0] }
  0x1c   : > { %v551_v63 = vsel %vm537_vm0, %v485_v52, 0  ;;  %v557_v0 = vsel %vm537_vm0, %v487_v53, 0  ;;  %v1253_v5 = vld [vmem:[%s1361_s16 + $0xe4] sm:$0xf]  ;;  %v299_v6 = vld [vmem:[%s1361_s16 + $0x158] sm:$0x11]  ;;  %v1177_v10 = vor.u32 %v1259_v62, %v1176_v61  ;;  %v1185_v11 = vor.u32 %v1260_v2, %v1184_v1 }
  0x1d   : > { %v300_v7 = vld [vmem:[%s1361_s16 + $0x160] sm:$0x11]  ;;  %v560_v8 = vsel %vm537_vm0, %v488_v59, 0  ;;  %v554_v9 = vsel %vm537_vm0, %v486_v60, 0  ;;  %v1178_v12 = vld [vmem:[%s1361_s16 + $0x114] sm:$0xf0]  ;;  %v437_v17 = vunpack.c.l.b16 %v299_v6  ;;  %v1189_v19 = vor.u32 %v1254_v3, %v1186_v4 }
  0x1e   : > { %583 = vmatpush.bf16.msra.mxu0 %v1109_v36  ;;  %596 = vmatpush.bf16.msra.mxu1 %v1113_v37  ;;  %v1124_v13 = vld [vmem:[%s1361_s16 + $0x78] sm:$0xf]  ;;  %v1246_v14 = vld [vmem:[%s1361_s16 + $0xa8] sm:$0xf0]  ;;  %v1132_v15 = vld [vmem:[%s1361_s16 + $0x80] sm:$0xf]  ;;  %v439_v18 = vunpack.c.l.b16 %v300_v7  ;;  %v1181_v20 = vor.u32 %v1253_v5, %v1178_v12  ;;  %v440_v31 = vunpack.c.h.b16 %v300_v7  ;;  %v438_v32 = vunpack.c.h.b16 %v299_v6 }
  0x1f   : > { %609 = vmatpush.bf16.msra.mxu2 %v1117_v42  ;;  %622 = vmatpush.bf16.msra.mxu3 %v1121_v43  ;;  %v1247_v16 = vld [vmem:[%s1361_s16 + $0xb0] sm:$0xf0]  ;;  %v1241_v21 = vld [vmem:[%s1361_s16 + $0x84] sm:$0xf]  ;;  %v1134_v22 = vld [vmem:[%s1361_s16 + $0xb4] sm:$0xf0]  ;;  %v1125_v23 = vor.u32 %v1246_v14, %v1124_v13  ;;  %v489_v33 = vpack.c.b16 %v437_v17, %v437_v17 }
  0x20   : > { %v1133_v24 = vor.u32 %v1247_v16, %v1132_v15  ;;  %v1240_v25 = vld [vmem:[%s1361_s16 + $0x7c] sm:$0xf]  ;;  %v1126_v26 = vld [vmem:[%s1361_s16 + $0xac] sm:$0xf0]  ;;  %v1233_v28 = vld [vmem:[%s1361_s16 + $0x40] sm:$0xf0]  ;;  %v491_v34 = vpack.c.b16 %v439_v18, %v439_v18  ;;  %v1137_v35 = vor.u32 %v1241_v21, %v1134_v22  ;;  %v492_v43 = vpack.c.b16 %v440_v31, %v440_v31 }
  0x21   : > { %v1072_v27 = vld [vmem:[%s1361_s16 + $0x10] sm:$0xf]  ;;  %v1080_v29 = vld [vmem:[%s1361_s16 + $0x18] sm:$0xf]  ;;  %v1234_v30 = vld [vmem:[%s1361_s16 + $0x48] sm:$0xf0]  ;;  %v1129_v36 = vor.u32 %v1240_v25, %v1126_v26  ;;  %v490_v44 = vpack.c.b16 %v438_v32, %v438_v32 }
  0x22   : > { %584 = vmatpush.bf16.msra.mxu0 %v1057_v54  ;;  %597 = vmatpush.bf16.msra.mxu1 %v1061_v55  ;;  %v1228_v37 = vld [vmem:[%s1361_s16 + $0x1c] sm:$0xf]  ;;  %v1073_v38 = vor.u32 %v1233_v28, %v1072_v27  ;;  %v1081_v39 = vor.u32 %v1234_v30, %v1080_v29  ;;  %v1082_v40 = vld [vmem:[%s1361_s16 + $0x4c] sm:$0xf0]  ;;  %v1227_v41 = vld [vmem:[%s1361_s16 + $0x14] sm:$0xf] }
  0x23   : > { %610 = vmatpush.bf16.msra.mxu2 %v1065_v56  ;;  %623 = vmatpush.bf16.msra.mxu3 %v1069_v57  ;;  %v1074_v42 = vld [vmem:[%s1361_s16 + $0x44] sm:$0xf0]  ;;  %v563_v45 = vsel %vm537_vm0, %v489_v33, 0  ;;  %v569_v46 = vsel %vm537_vm0, %v491_v34, 0  ;;  %v1200_v47 = vld [vmem:[%s1361_s16 + $0xf8] sm:$0xf]  ;;  %v1085_v49 = vor.u32 %v1228_v37, %v1082_v40 }
  0x24   : > { %v1262_v48 = vld [vmem:[%s1361_s16 + $0x128] sm:$0xf0]  ;;  %v1077_v50 = vor.u32 %v1227_v41, %v1074_v42  ;;  %v1192_v51 = vld [vmem:[%s1361_s16 + $0xf0] sm:$0xf]  ;;  %v1261_v52 = vld [vmem:[%s1361_s16 + $0x120] sm:$0xf0] }
  0x25   : > { %1210 = vmatmul.msk.bf16.vlgmr.msra.gmra.mxu0 %vm533_vm1, %v1398_v58  ;;  %1211 = vmatmul.msk.bf16.vlgmr.msra.gmra.mxu1 %vm533_vm1, %v1398_v58  ;;  %v1256_v53 = vld [vmem:[%s1361_s16 + $0xfc] sm:$0xf]  ;;  %v1202_v54 = vld [vmem:[%s1361_s16 + $0x12c] sm:$0xf0]  ;;  %v572_v55 = vsel %vm537_vm0, %v492_v43, 0  ;;  %v566_v56 = vsel %vm537_vm0, %v490_v44, 0  ;;  %v1201_v57 = vor.u32 %v1262_v48, %v1200_v47 }
  0x26   : > { %633 = vmatpush.bf16.msrb.mxu0 %v551_v63  ;;  %1212 = vmatmul.msk.bf16.vlgmr.msra.gmra.mxu2 %vm533_vm1, %v1398_v58  ;;  %v1255_v59 = vld [vmem:[%s1361_s16 + $0xf4] sm:$0xf]  ;;  %v1194_v60 = vld [vmem:[%s1361_s16 + $0x124] sm:$0xf0]  ;;  %v1148_v61 = vld [vmem:[%s1361_s16 + $0x90] sm:$0xf]  ;;  %v1193_v63 = vor.u32 %v1261_v52, %v1192_v51  ;;  %v1205_v1 = vor.u32 %v1256_v53, %v1202_v54 }
  0x27   : > { %659 = vmatpush.bf16.msrb.mxu2 %v557_v0  ;;  %1213 = vmatmul.msk.bf16.vlgmr.msra.gmra.mxu3 %vm533_vm1, %v1398_v58  ;;  %v1249_v62 = vld [vmem:[%s1361_s16 + $0xc0] sm:$0xf0]  ;;  %v301_v0 = vld [vmem:[%s1361_s16 + $0x168] sm:$0x1]  ;;  %v1197_v2 = vor.u32 %v1255_v59, %v1194_v60  ;;  %v1248_v4 = vld [vmem:[%s1361_s16 + $0xb8] sm:$0xf0] }
  0x28   : > { %672 = vmatpush.bf16.msrb.mxu3 %v560_v8  ;;  %646 = vmatpush.bf16.msrb.mxu1 %v554_v9  ;;  %v1140_v3 = vld [vmem:[%s1361_s16 + $0x88] sm:$0xf]  ;;  %v1243_v5 = vld [vmem:[%s1361_s16 + $0x94] sm:$0xf]  ;;  %v1149_v6 = vor.u32 %v1249_v62, %v1148_v61  ;;  %v1242_v8 = vld [vmem:[%s1361_s16 + $0x8c] sm:$0xf]  ;;  %v441_v12 = vunpack.c.l.b16 %v301_v0 }
  0x29   : > { %v1150_v7 = vld [vmem:[%s1361_s16 + $0xc4] sm:$0xf0]  ;;  %v1142_v9 = vld [vmem:[%s1361_s16 + $0xbc] sm:$0xf0]  ;;  %v1141_v13 = vor.u32 %v1248_v4, %v1140_v3  ;;  %v1235_v17 = vld [vmem:[%s1361_s16 + $0x50] sm:$0xf0] }
  0x2a   : > { %634 = vmatpush.bf16.msrb.mxu0 %v1177_v10  ;;  %v1096_v10 = vld [vmem:[%s1361_s16 + $0x28] sm:$0xf]  ;;  %v1153_v14 = vor.u32 %v1243_v5, %v1150_v7  ;;  %v1145_v15 = vor.u32 %v1242_v8, %v1142_v9  ;;  %v1088_v16 = vld [vmem:[%s1361_s16 + $0x20] sm:$0xf]  ;;  %v1230_v18 = vld [vmem:[%s1361_s16 + $0x2c] sm:$0xf] }
  0x2b   : > { %660 = vmatpush.bf16.msrb.mxu2 %v1185_v11  ;;  %v1236_v11 = vld [vmem:[%s1361_s16 + $0x58] sm:$0xf0]  ;;  %v1229_v21 = vld [vmem:[%s1361_s16 + $0x24] sm:$0xf]  ;;  %v1090_v22 = vld [vmem:[%s1361_s16 + $0x54] sm:$0xf0] }
  0x2c   : > { %673 = vmatpush.bf16.msrb.mxu3 %v1189_v19  ;;  %647 = vmatpush.bf16.msrb.mxu1 %v1181_v20  ;;  %v1097_v19 = vor.u32 %v1236_v11, %v1096_v10  ;;  %v1098_v20 = vld [vmem:[%s1361_s16 + $0x5c] sm:$0xf0]  ;;  %v1093_v26 = vor.u32 %v1229_v21, %v1090_v22  ;;  %v1263_v29 = vld [vmem:[%s1361_s16 + $0x130] sm:$0xf0]  ;;  %v1156_v31 = vld [vmem:[%s1361_s16 + $0x98] sm:$0xf] }
  0x2d   : > { %v1101_v25 = vor.u32 %v1230_v18, %v1098_v20  ;;  %v1208_v28 = vld [vmem:[%s1361_s16 + $0x100] sm:$0xf]  ;;  %v1250_v32 = vld [vmem:[%s1361_s16 + $0xc8] sm:$0xf0]  ;;  %v1104_v34 = vld [vmem:[%s1361_s16 + $0x30] sm:$0xf] }
  0x2e   : > { %635 = vmatpush.bf16.msrb.mxu0 %v1125_v23  ;;  %v493_v23 = vpack.c.b16 %v441_v12, %v441_v12  ;;  %v1209_v30 = vor.u32 %v1263_v29, %v1208_v28  ;;  %v1157_v33 = vor.u32 %v1250_v32, %v1156_v31  ;;  %v1320_v43 = vmov 0.0  }
  0x2f   : > { %661 = vmatpush.bf16.msrb.mxu2 %v1133_v24  ;;  %v1089_v24 = vor.u32 %v1235_v17, %v1088_v16  ;;  %238 = vst.msk [vmem:[#allocation2 + $0x60] sm:$0xff] %vm237_vm2, %v1320_v43  ;;  %v1321_v16 = vmov 1600.0  }
  0x30   : > { %674 = vmatpush.bf16.msrb.mxu3 %v1137_v35  ;;  %648 = vmatpush.bf16.msrb.mxu1 %v1129_v36  ;;  %v575_v27 = vsel %vm537_vm0, %v493_v23, 0  ;;  %v1237_v35 = vld [vmem:[%s1361_s16 + $0x60] sm:$0xf0]  ;;  %1292 = vrcp.f32 %v1321_v16 }
  0x31   : > { %v1105_v36 = vor.u32 %v1237_v35, %v1104_v34 }
  0x32   : > { %636 = vmatpush.bf16.msrb.mxu0 %v1073_v38 }
  0x33   : > { %662 = vmatpush.bf16.msrb.mxu2 %v1081_v39 }
  0x34   : > { %675 = vmatpush.bf16.msrb.mxu3 %v1085_v49  ;;  %649 = vmatpush.bf16.msrb.mxu1 %v1077_v50 }
  0x35   : > { %1214 = vmatmul.msk.bf16.vlgmr.msrb.gmra.mxu0 %vm533_vm1, %v1398_v58 }
  0x36   : > { %685 = vmatpush.bf16.msra.mxu0 %v563_v45  ;;  %1216 = vmatmul.msk.bf16.vlgmr.msrb.gmra.mxu2 %vm533_vm1, %v1398_v58  ;;  %v1293_v17 = vpop.eup %1292 }
  0x37   : > { %711 = vmatpush.bf16.msra.mxu2 %v569_v46  ;;  %1217 = vmatmul.msk.bf16.vlgmr.msrb.gmra.mxu3 %vm533_vm1, %v1398_v58  ;;  %v805_v18 = vmul.f32 1600.0, %v1293_v17  ;;  %vm809_vm3 = vweird.f32 %v1293_v17 }
  0x38   : > { %724 = vmatpush.bf16.msra.mxu3 %v572_v55  ;;  %698 = vmatpush.bf16.msra.mxu1 %v566_v56 }
  0x39   : > { %1215 = vmatmul.msk.bf16.vlgmr.msrb.gmra.mxu1 %vm533_vm1, %v1398_v58 }
  0x3a   : > { %686 = vmatpush.bf16.msra.mxu0 %v1193_v63 }
  0x3b   : > { %712 = vmatpush.bf16.msra.mxu2 %v1201_v57 }
  0x3c   : > { %725 = vmatpush.bf16.msra.mxu3 %v1205_v1  ;;  %699 = vmatpush.bf16.msra.mxu1 %v1197_v2  ;;  %v251_v2 = vld [vmem:[#allocation2 + $0x60] sm:$0xff] }
  0x3e   : > { %687 = vmatpush.bf16.msra.mxu0 %v1141_v13 }
  0x3f   : > { %713 = vmatpush.bf16.msra.mxu2 %v1149_v6 }
  0x40   : > { %726 = vmatpush.bf16.msra.mxu3 %v1153_v14  ;;  %700 = vmatpush.bf16.msra.mxu1 %v1145_v15 }
  0x42   : > { %688 = vmatpush.bf16.msra.mxu0 %v1089_v24 }
  0x43   : > { %714 = vmatpush.bf16.msra.mxu2 %v1097_v19  ;;  %v806_v19 = vsub.f32 1.0, %v805_v18 }
  0x44   : > { %727 = vmatpush.bf16.msra.mxu3 %v1101_v25  ;;  %701 = vmatpush.bf16.msra.mxu1 %v1093_v26 }
  0x45   : > { %1218 = vmatmul.msk.bf16.vlgmr.msra.gmra.mxu0 %vm533_vm1, %v1398_v58  ;;  %v807_v20 = vmul.f32 %v1293_v17, %v806_v19 }
  0x46   : > { %737 = vmatpush.bf16.msrb.mxu0 %v575_v27  ;;  %1220 = vmatmul.msk.bf16.vlgmr.msra.gmra.mxu2 %vm533_vm1, %v1398_v58 }
  0x47   : > { %1221 = vmatmul.msk.bf16.vlgmr.msra.gmra.mxu3 %vm533_vm1, %v1398_v58  ;;  %v808_v21 = vadd.f32 %v1293_v17, %v807_v20 }
  0x49   : > { %1219 = vmatmul.msk.bf16.vlgmr.msra.gmra.mxu1 %vm533_vm1, %v1398_v58  ;;  %v810_v22 = vsel %vm809_vm3, %v1293_v17, %v808_v21 }
  0x4a   : > { %738 = vmatpush.bf16.msrb.mxu0 %v1209_v30 }
  0x4e   : > { %739 = vmatpush.bf16.msrb.mxu0 %v1157_v33 }
  0x52   : > { %740 = vmatpush.bf16.msrb.mxu0 %v1105_v36 }
  0x55   : > { %1222 = vmatmul.msk.bf16.vlgmr.msrb.gmra.mxu0 %vm533_vm1, %v1398_v58 }
  0xa2   : > { %v586_v37 = vpop.f32.mrf.mxu0  ;;  %v599_v38 = vpop.f32.mrf.mxu1 }
  0xa3   : > { %v789_v52 = vadd.f32 %v599_v38, %v586_v37 }
  0xa9   : > { %v612_v39 = vpop.f32.mrf.mxu2 }
  0xaa   : > { %v625_v40 = vpop.f32.mrf.mxu3  ;;  %v588_v41 = vpop.f32.mrf.mxu0  ;;  %v790_v58 = vadd.f32 %v789_v52, %v612_v39 }
  0xab   : > { %v601_v42 = vpop.f32.mrf.mxu1 }
  0xac   : > { %v791_v57 = vadd.f32 %v790_v58, %v625_v40 }
  0xb1   : > { %v614_v44 = vpop.f32.mrf.mxu2 }
  0xb2   : > { %v627_v45 = vpop.f32.mrf.mxu3  ;;  %v638_v46 = vpop.f32.mrf.mxu0 }
  0xb3   : > { %v792_v59 = vadd.f32 %v791_v57, %v638_v46 }
  0xb6   : > { %v651_v47 = vpop.f32.mrf.mxu1 }
  0xb7   : > { %v793_v63 = vadd.f32 %v792_v59, %v651_v47 }
  0xb9   : > { %v664_v48 = vpop.f32.mrf.mxu2 }
  0xba   : > { %v677_v49 = vpop.f32.mrf.mxu3  ;;  %v640_v50 = vpop.f32.mrf.mxu0  ;;  %v794_v1 = vadd.f32 %v793_v63, %v664_v48 }
  0xbc   : > { %v795_v3 = vadd.f32 %v794_v1, %v677_v49 }
  0xbe   : > { %v653_v51 = vpop.f32.mrf.mxu1 }
  0xc1   : > { %v666_v53 = vpop.f32.mrf.mxu2 }
  0xc2   : > { %v679_v54 = vpop.f32.mrf.mxu3  ;;  %v690_v55 = vpop.f32.mrf.mxu0 }
  0xc3   : > { %v796_v7 = vadd.f32 %v795_v3, %v690_v55 }
  0xc6   : > { %v703_v56 = vpop.f32.mrf.mxu1 }
  0xc7   : > { %v797_v9 = vadd.f32 %v796_v7, %v703_v56 }
  0xc9   : > { %v716_v60 = vpop.f32.mrf.mxu2 }
  0xca   : > { %v729_v61 = vpop.f32.mrf.mxu3  ;;  %v692_v62 = vpop.f32.mrf.mxu0  ;;  %v798_v10 = vadd.f32 %v797_v9, %v716_v60 }
  0xcc   : > { %v799_v13 = vadd.f32 %v798_v10, %v729_v61 }
  0xce   : > { %v705_v0 = vpop.f32.mrf.mxu1 }
  0xd1   : > { %v718_v4 = vpop.f32.mrf.mxu2 }
  0xd2   : > { %v731_v5 = vpop.f32.mrf.mxu3  ;;  %v742_v6 = vpop.f32.mrf.mxu0 }
  0xd3   : > { %v758_v8 = vadd.f32 %v742_v6, %v251_v2 }
  0xd5   : > { %772 = vst.msk [vmem:[#allocation2 + $0x60] sm:$0xff] %vm237_vm2, %v758_v8 }
  0xda   : > { %v744_v11 = vpop.f32.mrf.mxu0 }
  0xdc   : > { %v788_v12 = vld [vmem:[#allocation2 + $0x60] sm:$0xff] }
  0xdd   : > { %v800_v14 = vsel %vm237_vm2, %v788_v12, 0.0 }
  0xde   : > { %v801_v15 = vadd.f32 %v800_v14, %v799_v13 }
  0xe0   : > { %802 = vadd.xlane.f32.xlu0 %v801_v15 }
 0x153   : > { %v803_v23 = vpop.xlane.xlu0 %802 }
 0x154   : > { %v811_v24 = vmul.f32 %v810_v22, %v803_v23 }
 0x156   : > { %v812_v25 = vsub.f32 %v586_v37, %v811_v24  ;;  %v813_v26 = vsub.f32 %v599_v38, %v811_v24  ;;  %v814_v27 = vsub.f32 %v612_v39, %v811_v24  ;;  %v815_v30 = vsub.f32 %v625_v40, %v811_v24 }
 0x157   : > { %v816_v31 = vsub.f32 %v638_v46, %v811_v24  ;;  %v817_v34 = vsub.f32 %v651_v47, %v811_v24  ;;  %v818_v41 = vsub.f32 %v664_v48, %v811_v24  ;;  %v819_v44 = vsub.f32 %v677_v49, %v811_v24 }
 0x158   : > { %v825_v28 = vmul.f32 %v812_v25, %v812_v25  ;;  %v826_v29 = vmul.f32 %v813_v26, %v813_v26  ;;  %v827_v32 = vmul.f32 %v814_v27, %v814_v27  ;;  %v828_v35 = vmul.f32 %v815_v30, %v815_v30 }
 0x159   : > { %v829_v42 = vmul.f32 %v816_v31, %v816_v31  ;;  %v830_v45 = vmul.f32 %v817_v34, %v817_v34  ;;  %v820_v51 = vsub.f32 %v690_v55, %v811_v24  ;;  %v831_v52 = vmul.f32 %v818_v41, %v818_v41 }
 0x15a   : > { %v838_v33 = vadd.f32 %v826_v29, %v825_v28  ;;  %v821_v38 = vsub.f32 %v703_v56, %v811_v24  ;;  %v832_v39 = vmul.f32 %v819_v44, %v819_v44  ;;  %v822_v53 = vsub.f32 %v716_v60, %v811_v24 }
 0x15b   : > { %v833_v40 = vmul.f32 %v820_v51, %v820_v51  ;;  %v824_v54 = vsub.f32 %v788_v12, %v811_v24  ;;  %v823_v57 = vsub.f32 %v729_v61, %v811_v24 }
 0x15c   : > { %v839_v36 = vadd.f32 %v838_v33, %v827_v32  ;;  %v834_v47 = vmul.f32 %v821_v38, %v821_v38  ;;  %v835_v62 = vmul.f32 %v822_v53, %v822_v53 }
 0x15d   : > { %v837_v63 = vmul.f32 %v824_v54, %v824_v54  ;;  %v836_v0 = vmul.f32 %v823_v57, %v823_v57 }
 0x15e   : > { %v840_v43 = vadd.f32 %v839_v36, %v828_v35 }
 0x15f   : > { %v849_v55 = vsel %vm237_vm2, %v837_v63, 0.0 }
 0x160   : > { %v841_v50 = vadd.f32 %v840_v43, %v829_v42 }
 0x162   : > { %v842_v37 = vadd.f32 %v841_v50, %v830_v45 }
 0x164   : > { %v843_v58 = vadd.f32 %v842_v37, %v831_v52 }
 0x166   : > { %v844_v46 = vadd.f32 %v843_v58, %v832_v39 }
 0x168   : > { %v845_v59 = vadd.f32 %v844_v46, %v833_v40 }
 0x16a   : > { %v846_v48 = vadd.f32 %v845_v59, %v834_v47 }
 0x16c   : > { %v847_v49 = vadd.f32 %v846_v48, %v835_v62 }
 0x16e   : > { %v848_v1 = vadd.f32 %v847_v49, %v836_v0 }
 0x170   : > { %v850_v2 = vadd.f32 %v849_v55, %v848_v1 }
 0x172   : > { %851 = vadd.xlane.f32.xlu0 %v850_v2 }
 0x1e5   : > { %v852_v56 = vpop.xlane.xlu0 %851 }
 0x1e6   : > { %v853_v3 = vmul.f32 %v852_v56, %v810_v22 }
 0x1e8   : > { %v854_v4 = vadd.f32 1e-05, %v853_v3 }
 0x1ea   : > { %1294 = vrsqrt.f32 %v854_v4  ;;  %vm861_vm5 = vweird.f32 %v854_v4 }
 0x1f0   : > { %v1295_v60 = vpop.eup %1294 }
 0x1f1   : > { %v856_v5 = vmul.f32 %v1295_v60, %v854_v4  ;;  %vm862_vm4 = vweird.f32 %v1295_v60 }
 0x1f2   : > { %vm863_vm6 = vmor %vm861_vm5, %vm862_vm4  ;;  %vm930_vm4 = vcmask 519168  }
 0x1f3   : > { %v857_v6 = vmul.f32 %v1295_v60, %v856_v5 }
 0x1f5   : > { %v858_v61 = vmul.f32 0.5, %v857_v6 }
 0x1f7   : > { %v859_v7 = vsub.f32 1.5, %v858_v61 }
 0x1f9   : > { %v860_v8 = vmul.f32 %v1295_v60, %v859_v7 }
 0x1fb   : > { %v864_v9 = vsel %vm863_vm6, %v1295_v60, %v860_v8 }
 0x1fc   : > { %v865_v10 = vmul.f32 %v864_v9, %v812_v25  ;;  %v866_v11 = vmul.f32 %v864_v9, %v813_v26  ;;  %v867_v12 = vmul.f32 %v864_v9, %v814_v27  ;;  %v868_v13 = vmul.f32 %v864_v9, %v815_v30 }
 0x1fd   : > { %v869_v14 = vmul.f32 %v864_v9, %v816_v31  ;;  %v870_v15 = vmul.f32 %v864_v9, %v817_v34  ;;  %v871_v16 = vmul.f32 %v864_v9, %v818_v41  ;;  %v872_v17 = vmul.f32 %v864_v9, %v819_v44 }
 0x1fe   : > { %v873_v18 = vmul.f32 %v864_v9, %v820_v51  ;;  %v874_v19 = vmul.f32 %v864_v9, %v821_v38  ;;  %v875_v20 = vmul.f32 %v864_v9, %v822_v53  ;;  %v876_v21 = vmul.f32 %v864_v9, %v823_v57 }
 0x1ff   : > { %v877_v22 = vmul.f32 %v864_v9, %v824_v54  ;;  %vm878_vm7 = vcmp.ge.f32.partialorder %v865_v10, 0.0  ;;  %vm879_vm8 = vcmp.ge.f32.partialorder %v866_v11, 0.0  ;;  %vm880_vm9 = vcmp.ge.f32.partialorder %v867_v12, 0.0 }
 0x200   : > { %vm881_vm10 = vcmp.ge.f32.partialorder %v868_v13, 0.0  ;;  %vm882_vm11 = vcmp.ge.f32.partialorder %v869_v14, 0.0  ;;  %vm883_vm12 = vcmp.ge.f32.partialorder %v870_v15, 0.0  ;;  %vm884_vm13 = vcmp.ge.f32.partialorder %v871_v16, 0.0 }
 0x201   : > { %vm885_vm14 = vcmp.ge.f32.partialorder %v872_v17, 0.0  ;;  %vm886_vm15 = vcmp.ge.f32.partialorder %v873_v18, 0.0  ;;  %vm887_vm0 = vcmp.ge.f32.partialorder %v874_v19, 0.0  ;;  %vm888_vm1 = vcmp.ge.f32.partialorder %v875_v20, 0.0 }
 0x202   : > { %vm889_vm2 = vcmp.ge.f32.partialorder %v876_v21, 0.0  ;;  %vm890_vm3 = vcmp.ge.f32.partialorder %v877_v22, 0.0  ;;  %v891_v23 = vmul.f32 0.2, %v865_v10  ;;  %v892_v24 = vmul.f32 0.2, %v866_v11 }
 0x203   : > { %v893_v25 = vmul.f32 0.2, %v867_v12  ;;  %v894_v26 = vmul.f32 0.2, %v868_v13  ;;  %v895_v27 = vmul.f32 0.2, %v869_v14 }
 0x204   : > { %v896_v28 = vmul.f32 0.2, %v870_v15  ;;  %v897_v29 = vmul.f32 0.2, %v871_v16  ;;  %v898_v30 = vmul.f32 0.2, %v872_v17  ;;  %v904_v31 = vsel %vm878_vm7, %v865_v10, %v891_v23 }
 0x205   : > { %v899_v32 = vmul.f32 0.2, %v873_v18  ;;  %v900_v33 = vmul.f32 0.2, %v874_v19  ;;  %v901_v34 = vmul.f32 0.2, %v875_v20  ;;  %v905_v35 = vsel %vm879_vm8, %v866_v11, %v892_v24 }
 0x206   : > { %v902_v36 = vmul.f32 0.2, %v876_v21  ;;  %v903_v41 = vmul.f32 0.2, %v877_v22  ;;  %v906_v42 = vsel %vm880_vm9, %v867_v12, %v893_v25  ;;  %v907_v43 = vsel %vm881_vm10, %v868_v13, %v894_v26 }
 0x207   : > { %v908_v44 = vsel %vm882_vm11, %v869_v14, %v895_v27  ;;  %v909_v45 = vsel %vm883_vm12, %v870_v15, %v896_v28  ;;  %v910_v50 = vsel %vm884_vm13, %v871_v16, %v897_v29  ;;  %v911_v51 = vsel %vm885_vm14, %v872_v17, %v898_v30 }
 0x208   : > { %v912_v52 = vsel %vm886_vm15, %v873_v18, %v899_v32  ;;  %v913_v37 = vsel %vm887_vm0, %v874_v19, %v900_v33  ;;  %v914_v38 = vsel %vm888_vm1, %v875_v20, %v901_v34  ;;  %v915_v39 = vsel %vm889_vm2, %v876_v21, %v902_v36 }
 0x209   : > { %v917_v58 = vpack.c.bf16 %v905_v35, %v904_v31  ;;  %v918_v53 = vpack.c.bf16 %v907_v43, %v906_v42  ;;  %v919_v40 = vpack.c.bf16 %v909_v45, %v908_v44  ;;  %v916_v46 = vsel %vm890_vm3, %v877_v22, %v903_v41 }
 0x20a   : > { %v920_v54 = vpack.c.bf16 %v911_v51, %v910_v50  ;;  %v921_v57 = vpack.c.bf16 %v913_v37, %v912_v52  ;;  %v922_v47 = vpack.c.bf16 %v915_v39, %v914_v38  ;;  %v923_v59 = vpack.c.bf16 %v916_v46, %v916_v46 }
 0x20b   : > { %924 = vst [vmem:[%s219_s22] sm:$0xff] %v917_v58 }
 0x20c   : > { %925 = vst [vmem:[%s219_s22 + $0x8] sm:$0xff] %v918_v53 }
 0x20d   : > { %926 = vst [vmem:[%s219_s22 + $0x10] sm:$0xff] %v919_v40 }
 0x20e   : > { %927 = vst [vmem:[%s219_s22 + $0x18] sm:$0xff] %v920_v54 }
 0x20f   : > { %928 = vst [vmem:[%s219_s22 + $0x20] sm:$0xff] %v921_v57 }
 0x210   : > { %929 = vst [vmem:[%s219_s22 + $0x28] sm:$0xff] %v922_v47 }
 0x211   : > { %931 = vst.msk [vmem:[%s219_s22 + $0x30] sm:$0xf] %vm930_vm4, %v923_v59 }
 0x212 PF: > { %s12_s11 = sadd.s32 1, %s1318_s11   ;;  %s1525_s9 = smov %s1314_s10 }
 0x213   : > { %p9_p5 = scmp.ge.s32.totalorder %s12_s11, 4   ;;  %s1526_s10 = smov %s1528_s12 }
 0x215   :  { %11 = sbr.rel (!%p9_p5) target bundleno = 2 (0x2), region = 69 }

// kernel: _lambda_.6
= control target key start
LH: loop header
LB: loop body
LE: loop exit
PB: predicated region body
PF: predicated region fallthrough
CT: control target
= control target key end

     0   :  { %s1301_s9 = smov 0   ;;  %s1303_s10 = smov 0   ;;  %s1514_s0 = inlined_call_operand.vmem [shape: bf16[2,200,400], index: 0, kind: input, shape index: {}]   ;;  %s1515_s1 = inlined_call_operand.vmem [shape: bf16[16,200], index: 1, kind: input, shape index: {}]   ;;  %s1516_s2 = inlined_call_operand.vmem [shape: bf16[2,16,400], index: 2, kind: output, shape index: {}]  }
   0x1   :  { %s1305_s11 = smov 0  }
   0x2 LB: > { %s31_s12 = sadd.s32 1, %s1278_s10  ;;  %p966_p0 = scmp.ge.s32.totalorder %s1282_s11, 1  ;;  %s1282_s11 = sphi %s1305_s11, %s12_s11   ;;  %s1278_s10 = sphi %s1303_s10, %s1520_s10   ;;  %s1274_s9 = sphi %s1301_s9, %s1519_s9  }
   0x3   : > { %p33_p1 = scmp.ge.s32.totalorder %s31_s12, 2  ;;  %p160_p2 = scmp.lt.s32.totalorder %s1282_s11, 3 }
   0x5   : > { %s1522_s12 = smov (%p33_p1, %s31_s12), 0  ;;  %p161_p3 = pnand %p966_p0, %p160_p2 }
   0x6   : > { %p203_p4 = scmp.lt.s32.totalorder (!%p161_p3), %s1274_s9, 1 }
   0x7   : > { %164 = sbr.rel (%p161_p3) target bundleno = 509 (0x1fd), region = 28 }
   0xc   : > { %s1524_s9 = smov (!%p203_p4, %s1274_s9), 1  ;;  %vm573_vm0 = vcmask 1043456   ;;  %vm569_vm1 = vcmask 588800   ;;  %vm244_vm2 = vcmask 130048   ;;  %vm836_vm7 = vcmask 130052  }
   0xd   : > { %s1227_s13 = smul.u32 400, %s1524_s9  ;;  %s1176_s25 = sshll.u32 %s1524_s9, 5  ;;  %vm1489_vm13 = vmor %vm836_vm7, %vm573_vm0 }
   0xe   : > { %s1485_s28 = scalar_lea.vmem %s1516_s2, %s1176_s25 }
   0xf   : > { %s1325_s16 = scalar_lea.vmem %s1514_s0, %s1227_s13 }
  0x10   : > { %v1092_v0 = vld [vmem:[%s1325_s16 + $0xe0] sm:$0xf]  ;;  %v1209_v1 = vld [vmem:[%s1325_s16 + $0xec] sm:$0xf0]  ;;  %v1207_v2 = vld [vmem:[%s1325_s16 + $0xe4] sm:$0xf] }
  0x11   : > { %v1093_v3 = vor.u32 %v1209_v1, %v1092_v0  ;;  %v1094_v4 = vld [vmem:[%s1325_s16 + $0xf0] sm:$0xf0]  ;;  %v308_v5 = vld [vmem:[%s1325_s16 + $0x180] sm:$0xff]  ;;  %v1205_v9 = vld [vmem:[%s1325_s16 + $0xcc] sm:$0xf0] }
  0x12   : > { %v1076_v6 = vld [vmem:[%s1325_s16 + $0xc0] sm:$0xf]  ;;  %v1097_v7 = vor.u32 %v1207_v2, %v1094_v4  ;;  %v465_v8 = vunpack.c.l.b16 %v308_v5  ;;  %v1203_v10 = vld [vmem:[%s1325_s16 + $0xc4] sm:$0xf]  ;;  %v1078_v11 = vld [vmem:[%s1325_s16 + $0xd0] sm:$0xf0]  ;;  %v466_v12 = vunpack.c.h.b16 %v308_v5 }
  0x13   : > { %586 = vmatpush.bf16.msra.mxu0 %v1093_v3  ;;  %v1077_v13 = vor.u32 %v1205_v9, %v1076_v6  ;;  %v1156_v14 = vld [vmem:[%s1325_s16 + $0x160] sm:$0xf]  ;;  %v1081_v16 = vor.u32 %v1203_v10, %v1078_v11  ;;  %v1225_v17 = vld [vmem:[%s1325_s16 + $0x16c] sm:$0xf0]  ;;  %v1199_v21 = vld [vmem:[%s1325_s16 + $0xa4] sm:$0xf] }
  0x14   : > { %614 = vmatpush.bf16.msra.mxu2 %v1097_v7  ;;  %v517_v15 = vpack.c.b16 %v465_v8, %v465_v8  ;;  %v1060_v18 = vld [vmem:[%s1325_s16 + $0xa0] sm:$0xf]  ;;  %v1201_v19 = vld [vmem:[%s1325_s16 + $0xac] sm:$0xf0]  ;;  %v518_v20 = vpack.c.b16 %v466_v12, %v466_v12  ;;  %v1062_v22 = vld [vmem:[%s1325_s16 + $0xb0] sm:$0xf0]  ;;  %v1157_v25 = vor.u32 %v1225_v17, %v1156_v14 }
  0x15   : > { %v1061_v26 = vor.u32 %v1201_v19, %v1060_v18  ;;  %v1140_v27 = vld [vmem:[%s1325_s16 + $0x140] sm:$0xf]  ;;  %v1223_v28 = vld [vmem:[%s1325_s16 + $0x164] sm:$0xf]  ;;  %v1158_v29 = vld [vmem:[%s1325_s16 + $0x170] sm:$0xf0]  ;;  %v1065_v30 = vor.u32 %v1199_v21, %v1062_v22 }
  0x16   : > { %v575_v23 = vsel %vm573_vm0, %v517_v15, 0  ;;  %v578_v24 = vsel %vm573_vm0, %v518_v20, 0  ;;  %v1221_v31 = vld [vmem:[%s1325_s16 + $0x14c] sm:$0xf0]  ;;  %v1044_v32 = vld [vmem:[%s1325_s16 + $0x80] sm:$0xf]  ;;  %v1161_v34 = vor.u32 %v1223_v28, %v1158_v29 }
  0x17   : > { %603 = vmatpush.bf16.msra.mxu1 %v575_v23  ;;  %587 = vmatpush.bf16.msra.mxu0 %v1077_v13  ;;  %v1197_v33 = vld [vmem:[%s1325_s16 + $0x8c] sm:$0xf0]  ;;  %v1195_v35 = vld [vmem:[%s1325_s16 + $0x84] sm:$0xf]  ;;  %v1046_v36 = vld [vmem:[%s1325_s16 + $0x90] sm:$0xf0]  ;;  %v1141_v39 = vor.u32 %v1221_v31, %v1140_v27 }
  0x18   : > { %615 = vmatpush.bf16.msra.mxu2 %v1081_v16  ;;  %631 = vmatpush.bf16.msra.mxu3 %v578_v24  ;;  %v1219_v37 = vld [vmem:[%s1325_s16 + $0x144] sm:$0xf]  ;;  %v1142_v38 = vld [vmem:[%s1325_s16 + $0x150] sm:$0xf0]  ;;  %v1045_v40 = vor.u32 %v1197_v33, %v1044_v32  ;;  %v1124_v41 = vld [vmem:[%s1325_s16 + $0x120] sm:$0xf]  ;;  %v1049_v43 = vor.u32 %v1195_v35, %v1046_v36 }
  0x19   : > { %v1217_v42 = vld [vmem:[%s1325_s16 + $0x12c] sm:$0xf0]  ;;  %v1028_v44 = vld [vmem:[%s1325_s16 + $0x60] sm:$0xf]  ;;  %v1191_v46 = vld [vmem:[%s1325_s16 + $0x64] sm:$0xf]  ;;  %v1145_v47 = vor.u32 %v1219_v37, %v1142_v38 }
  0x1a   : > { %v1193_v45 = vld [vmem:[%s1325_s16 + $0x6c] sm:$0xf0]  ;;  %v1030_v48 = vld [vmem:[%s1325_s16 + $0x70] sm:$0xf0]  ;;  %v1215_v49 = vld [vmem:[%s1325_s16 + $0x124] sm:$0xf]  ;;  %v1125_v51 = vor.u32 %v1217_v42, %v1124_v41 }
  0x1b   : > { %604 = vmatpush.bf16.msra.mxu1 %v1157_v25  ;;  %588 = vmatpush.bf16.msra.mxu0 %v1061_v26  ;;  %v1126_v50 = vld [vmem:[%s1325_s16 + $0x130] sm:$0xf0]  ;;  %v1029_v52 = vor.u32 %v1193_v45, %v1028_v44  ;;  %v1108_v53 = vld [vmem:[%s1325_s16 + $0x100] sm:$0xf]  ;;  %v1213_v54 = vld [vmem:[%s1325_s16 + $0x10c] sm:$0xf0]  ;;  %v1033_v56 = vor.u32 %v1191_v46, %v1030_v48 }
  0x1c   : > { %616 = vmatpush.bf16.msra.mxu2 %v1065_v30  ;;  %632 = vmatpush.bf16.msra.mxu3 %v1161_v34  ;;  %v1012_v55 = vld [vmem:[%s1325_s16 + $0x40] sm:$0xf]  ;;  %v1189_v57 = vld [vmem:[%s1325_s16 + $0x4c] sm:$0xf0]  ;;  %v1187_v58 = vld [vmem:[%s1325_s16 + $0x44] sm:$0xf]  ;;  %v1129_v59 = vor.u32 %v1215_v49, %v1126_v50  ;;  %v1109_v3 = vor.u32 %v1213_v54, %v1108_v53 }
  0x1d   : > { %v309_v60 = vld [vmem:[%s1325_s16 + $0x188] sm:$0xff]  ;;  %v1014_v61 = vld [vmem:[%s1325_s16 + $0x50] sm:$0xf0]  ;;  %v1210_v63 = vld [vmem:[%s1325_s16 + $0xf4] sm:$0xf0]  ;;  %v1013_v4 = vor.u32 %v1189_v57, %v1012_v55 }
  0x1e   : > { %v1100_v62 = vld [vmem:[%s1325_s16 + $0xe8] sm:$0xf]  ;;  %v467_v0 = vunpack.c.l.b16 %v309_v60  ;;  %v1211_v1 = vld [vmem:[%s1325_s16 + $0x104] sm:$0xf]  ;;  %v1110_v2 = vld [vmem:[%s1325_s16 + $0x110] sm:$0xf0]  ;;  %v1017_v8 = vor.u32 %v1187_v58, %v1014_v61  ;;  %v468_v17 = vunpack.c.h.b16 %v309_v60 }
  0x1f   : > { %605 = vmatpush.bf16.msra.mxu1 %v1141_v39  ;;  %589 = vmatpush.bf16.msra.mxu0 %v1045_v40  ;;  %v1177_v6 = vld [vmem:[%s1515_s1 + $0x4] sm:$0xf]  ;;  %v974_v7 = vld [vmem:[%s1515_s1 + $0x8] sm:$0xf0]  ;;  %v1101_v9 = vor.u32 %v1210_v63, %v1100_v62  ;;  %v996_v10 = vld [vmem:[%s1325_s16 + $0x20] sm:$0xf]  ;;  %v1113_v16 = vor.u32 %v1211_v1, %v1110_v2 }
  0x20   : > { %617 = vmatpush.bf16.msra.mxu2 %v1049_v43  ;;  %633 = vmatpush.bf16.msra.mxu3 %v1145_v47  ;;  %v519_v5 = vpack.c.b16 %v467_v0, %v467_v0  ;;  %v1185_v11 = vld [vmem:[%s1325_s16 + $0x2c] sm:$0xf0]  ;;  %v1183_v12 = vld [vmem:[%s1325_s16 + $0x24] sm:$0xf]  ;;  %v998_v13 = vld [vmem:[%s1325_s16 + $0x30] sm:$0xf0]  ;;  %v1391_v27 = vor.u32 %v1177_v6, %v974_v7  ;;  %v520_v31 = vpack.c.b16 %v468_v17, %v468_v17 }
  0x21   : > { %v1084_v14 = vld [vmem:[%s1325_s16 + $0xc8] sm:$0xf]  ;;  %v1206_v15 = vld [vmem:[%s1325_s16 + $0xd4] sm:$0xf0]  ;;  %v997_v18 = vor.u32 %v1185_v11, %v996_v10  ;;  %v1001_v22 = vor.u32 %v1183_v12, %v998_v13  ;;  %v980_v24 = vld [vmem:[%s1325_s16] sm:$0xf] }
  0x22   : > { %v581_v19 = vsel %vm573_vm0, %v519_v5, 0  ;;  %v1164_v20 = vld [vmem:[%s1325_s16 + $0x168] sm:$0xf]  ;;  %v1226_v21 = vld [vmem:[%s1325_s16 + $0x174] sm:$0xf0]  ;;  %v1085_v23 = vor.u32 %v1206_v15, %v1084_v14  ;;  %v584_v44 = vsel %vm573_vm0, %v520_v31, 0 }
  0x23   : > { %606 = vmatpush.bf16.msra.mxu1 %v1125_v51  ;;  %590 = vmatpush.bf16.msra.mxu0 %v1029_v52  ;;  %v1181_v25 = vld [vmem:[%s1325_s16 + $0xc] sm:$0xf0]  ;;  %v1179_v26 = vld [vmem:[%s1325_s16 + $0x4] sm:$0xf]  ;;  %v982_v28 = vld [vmem:[%s1325_s16 + $0x10] sm:$0xf0]  ;;  %v1165_v34 = vor.u32 %v1226_v21, %v1164_v20 }
  0x24   : > { %618 = vmatpush.bf16.msra.mxu2 %v1033_v56  ;;  %634 = vmatpush.bf16.msra.mxu3 %v1129_v59  ;;  %v1068_v29 = vld [vmem:[%s1325_s16 + $0xa8] sm:$0xf]  ;;  %v1202_v30 = vld [vmem:[%s1325_s16 + $0xb4] sm:$0xf0]  ;;  %v1208_v32 = vld [vmem:[%s1325_s16 + $0xec] sm:$0xf]  ;;  %v981_v35 = vor.u32 %v1181_v25, %v980_v24  ;;  %v985_v38 = vor.u32 %v1179_v26, %v982_v28 }
  0x25   : > { %v1102_v33 = vld [vmem:[%s1325_s16 + $0xf8] sm:$0xf0]  ;;  %v1148_v36 = vld [vmem:[%s1325_s16 + $0x148] sm:$0xf]  ;;  %v1222_v37 = vld [vmem:[%s1325_s16 + $0x154] sm:$0xf0]  ;;  %v1069_v39 = vor.u32 %v1202_v30, %v1068_v29 }
  0x26   : > { %v972_v40 = vld [vmem:[%s1515_s1] sm:$0xf]  ;;  %v1178_v41 = vld [vmem:[%s1515_s1 + $0x4] sm:$0xf0]  ;;  %v1105_v43 = vor.u32 %v1208_v32, %v1102_v33  ;;  %v1198_v45 = vld [vmem:[%s1325_s16 + $0x94] sm:$0xf0]  ;;  %v1149_v50 = vor.u32 %v1222_v37, %v1148_v36 }
  0x27   : > { %607 = vmatpush.bf16.msra.mxu1 %v1109_v3  ;;  %591 = vmatpush.bf16.msra.mxu0 %v1013_v4  ;;  %v1052_v42 = vld [vmem:[%s1325_s16 + $0x88] sm:$0xf]  ;;  %v1204_v46 = vld [vmem:[%s1325_s16 + $0xcc] sm:$0xf]  ;;  %v1086_v47 = vld [vmem:[%s1325_s16 + $0xd8] sm:$0xf0]  ;;  %v1417_v51 = vor.u32 %v1178_v41, %v972_v40 }
  0x28   : > { %619 = vmatpush.bf16.msra.mxu2 %v1017_v8  ;;  %635 = vmatpush.bf16.msra.mxu3 %v1113_v16  ;;  %v1224_v48 = vld [vmem:[%s1325_s16 + $0x16c] sm:$0xf]  ;;  %v1166_v49 = vld [vmem:[%s1325_s16 + $0x178] sm:$0xf0]  ;;  %v1132_v52 = vld [vmem:[%s1325_s16 + $0x128] sm:$0xf]  ;;  %v1053_v54 = vor.u32 %v1198_v45, %v1052_v42  ;;  %v1089_v55 = vor.u32 %v1204_v46, %v1086_v47 }
  0x29   : > { %v1218_v53 = vld [vmem:[%s1325_s16 + $0x134] sm:$0xf0]  ;;  %v1169_v56 = vor.u32 %v1224_v48, %v1166_v49  ;;  %v1036_v57 = vld [vmem:[%s1325_s16 + $0x68] sm:$0xf]  ;;  %v1200_v59 = vld [vmem:[%s1325_s16 + $0xac] sm:$0xf] }
  0x2a   : > { %1170 = vmatmul.msk.bf16.vlgmr.msra.gmra.mxu1 %vm569_vm1, %v1391_v27  ;;  %v1194_v58 = vld [vmem:[%s1325_s16 + $0x74] sm:$0xf0]  ;;  %v1070_v60 = vld [vmem:[%s1325_s16 + $0xb8] sm:$0xf0]  ;;  %v1220_v61 = vld [vmem:[%s1325_s16 + $0x14c] sm:$0xf]  ;;  %v1133_v63 = vor.u32 %v1218_v53, %v1132_v52 }
  0x2b   : > { %642 = vmatpush.bf16.msrb.mxu1 %v1101_v9  ;;  %592 = vmatpush.bf16.msra.mxu0 %v997_v18  ;;  %v1150_v62 = vld [vmem:[%s1325_s16 + $0x158] sm:$0xf0]  ;;  %v1116_v0 = vld [vmem:[%s1325_s16 + $0x108] sm:$0xf]  ;;  %v1214_v1 = vld [vmem:[%s1325_s16 + $0x114] sm:$0xf0]  ;;  %v1037_v2 = vor.u32 %v1194_v58, %v1036_v57  ;;  %v1073_v3 = vor.u32 %v1200_v59, %v1070_v60 }
  0x2c   : > { %659 = vmatpush.bf16.msrb.mxu3 %v581_v19  ;;  %620 = vmatpush.bf16.msra.mxu2 %v1001_v22  ;;  %v1153_v4 = vor.u32 %v1220_v61, %v1150_v62  ;;  %v1020_v5 = vld [vmem:[%s1325_s16 + $0x48] sm:$0xf]  ;;  %v1190_v6 = vld [vmem:[%s1325_s16 + $0x54] sm:$0xf0]  ;;  %v1196_v7 = vld [vmem:[%s1325_s16 + $0x8c] sm:$0xf]  ;;  %v1117_v11 = vor.u32 %v1214_v1, %v1116_v0 }
  0x2d   : > { %1171 = vmatmul.msk.bf16.vlgmr.msra.gmra.mxu3 %vm569_vm1, %v1391_v27  ;;  %v1054_v8 = vld [vmem:[%s1325_s16 + $0x98] sm:$0xf0]  ;;  %v1216_v9 = vld [vmem:[%s1325_s16 + $0x12c] sm:$0xf]  ;;  %v1021_v12 = vor.u32 %v1190_v6, %v1020_v5  ;;  %v1004_v15 = vld [vmem:[%s1325_s16 + $0x28] sm:$0xf] }
  0x2e   : > { %v1134_v10 = vld [vmem:[%s1325_s16 + $0x138] sm:$0xf0]  ;;  %v1057_v13 = vor.u32 %v1196_v7, %v1054_v8  ;;  %v1186_v16 = vld [vmem:[%s1325_s16 + $0x34] sm:$0xf0]  ;;  %v1192_v17 = vld [vmem:[%s1325_s16 + $0x6c] sm:$0xf] }
  0x2f   : > { %643 = vmatpush.bf16.msrb.mxu1 %v1085_v23  ;;  %593 = vmatpush.bf16.msra.mxu0 %v981_v35  ;;  %v1137_v14 = vor.u32 %v1216_v9, %v1134_v10  ;;  %v1038_v18 = vld [vmem:[%s1325_s16 + $0x78] sm:$0xf0]  ;;  %v1212_v19 = vld [vmem:[%s1325_s16 + $0x10c] sm:$0xf]  ;;  %v1005_v21 = vor.u32 %v1186_v16, %v1004_v15  ;;  %v988_v24 = vld [vmem:[%s1325_s16 + $0x8] sm:$0xf] }
  0x30   : > { %660 = vmatpush.bf16.msrb.mxu3 %v1165_v34  ;;  %621 = vmatpush.bf16.msra.mxu2 %v985_v38  ;;  %v1118_v20 = vld [vmem:[%s1325_s16 + $0x118] sm:$0xf0]  ;;  %v1041_v22 = vor.u32 %v1192_v17, %v1038_v18  ;;  %v1182_v25 = vld [vmem:[%s1325_s16 + $0x14] sm:$0xf0]  ;;  %v1188_v26 = vld [vmem:[%s1325_s16 + $0x4c] sm:$0xf] }
  0x31   : > { %v1121_v23 = vor.u32 %v1212_v19, %v1118_v20  ;;  %v1022_v28 = vld [vmem:[%s1325_s16 + $0x58] sm:$0xf0]  ;;  %v989_v29 = vor.u32 %v1182_v25, %v988_v24  ;;  %v1184_v31 = vld [vmem:[%s1325_s16 + $0x2c] sm:$0xf]  ;;  %v1284_v37 = vmov 0.0  }
  0x32   : > { %594 = vmatmul.bf16.vlgmr.msra.gmra.mxu0 %v1417_v51  ;;  %v1025_v30 = vor.u32 %v1188_v26, %v1022_v28  ;;  %v1006_v32 = vld [vmem:[%s1325_s16 + $0x38] sm:$0xf0]  ;;  %v1180_v34 = vld [vmem:[%s1325_s16 + $0xc] sm:$0xf]  ;;  %245 = vst.msk [vmem:[#allocation2 + $0x18] sm:$0xff] %vm244_vm2, %v1284_v37 }
  0x33   : > { %644 = vmatpush.bf16.msrb.mxu1 %v1069_v39  ;;  %670 = vmatpush.bf16.msrb.mxu0 %v1105_v43  ;;  %v1009_v33 = vor.u32 %v1184_v31, %v1006_v32  ;;  %v990_v35 = vld [vmem:[%s1325_s16 + $0x18] sm:$0xf0]  ;;  %249 = vst.msk [vmem:[#allocation2 + $0x38] sm:$0xff] %vm244_vm2, %v1284_v37 }
  0x34   : > { %687 = vmatpush.bf16.msrb.mxu2 %v584_v44  ;;  %661 = vmatpush.bf16.msrb.mxu3 %v1149_v50  ;;  %v993_v36 = vor.u32 %v1180_v34, %v990_v35 }
  0x35   : > { %622 = vmatmul.bf16.vlgmr.msra.gmra.mxu2 %v1417_v51 }
  0x37   : > { %645 = vmatpush.bf16.msrb.mxu1 %v1053_v54  ;;  %671 = vmatpush.bf16.msrb.mxu0 %v1089_v55 }
  0x38   : > { %688 = vmatpush.bf16.msrb.mxu2 %v1169_v56  ;;  %662 = vmatpush.bf16.msrb.mxu3 %v1133_v63 }
  0x39   : > { %v253_v56 = vld [vmem:[#allocation2 + $0x18] sm:$0xff] }
  0x3a   : > { %v257_v61 = vld [vmem:[#allocation2 + $0x38] sm:$0xff] }
  0x3b   : > { %646 = vmatpush.bf16.msrb.mxu1 %v1037_v2  ;;  %672 = vmatpush.bf16.msrb.mxu0 %v1073_v3 }
  0x3c   : > { %689 = vmatpush.bf16.msrb.mxu2 %v1153_v4  ;;  %663 = vmatpush.bf16.msrb.mxu3 %v1117_v11  ;;  %v1285_v11 = vmov 400.0  }
  0x3d   : > { %1254 = vrcp.f32 %v1285_v11 }
  0x3f   : > { %647 = vmatpush.bf16.msrb.mxu1 %v1021_v12  ;;  %673 = vmatpush.bf16.msrb.mxu0 %v1057_v13 }
  0x40   : > { %690 = vmatpush.bf16.msrb.mxu2 %v1137_v14  ;;  %1172 = vmatmul.msk.bf16.vlgmr.msrb.gmra.mxu3 %vm569_vm1, %v1391_v27 }
  0x43   : > { %648 = vmatpush.bf16.msrb.mxu1 %v1005_v21  ;;  %674 = vmatpush.bf16.msrb.mxu0 %v1041_v22  ;;  %v1255_v12 = vpop.eup %1254 }
  0x44   : > { %691 = vmatpush.bf16.msrb.mxu2 %v1121_v23  ;;  %v739_v13 = vmul.f32 400.0, %v1255_v12  ;;  %vm743_vm3 = vweird.f32 %v1255_v12 }
  0x46   : > { %v740_v14 = vsub.f32 1.0, %v739_v13 }
  0x47   : > { %649 = vmatpush.bf16.msrb.mxu1 %v989_v29  ;;  %1173 = vmatmul.msk.bf16.vlgmr.msrb.gmra.mxu2 %vm569_vm1, %v1391_v27 }
  0x48   : > { %675 = vmatpush.bf16.msrb.mxu0 %v1025_v30  ;;  %v741_v15 = vmul.f32 %v1255_v12, %v740_v14 }
  0x4a   : > { %650 = vmatmul.bf16.vlgmr.msrb.gmra.mxu1 %v1417_v51  ;;  %v742_v16 = vadd.f32 %v1255_v12, %v741_v15 }
  0x4c   : > { %676 = vmatpush.bf16.msrb.mxu0 %v1009_v33  ;;  %v744_v17 = vsel %vm743_vm3, %v1255_v12, %v742_v16 }
  0x50   : > { %677 = vmatpush.bf16.msrb.mxu0 %v993_v36 }
  0x53   : > { %678 = vmatmul.bf16.vlgmr.msrb.gmra.mxu0 %v1417_v51 }
  0xa7   : > { %v609_v38 = vpop.f32.mrf.mxu1 }
  0xaf   : > { %v595_v39 = vpop.f32.mrf.mxu0  ;;  %v611_v41 = vpop.f32.mrf.mxu1 }
  0xb0   : > { %v610_v27 = vadd.f32 %v609_v38, %v595_v39  ;;  %v637_v40 = vpop.f32.mrf.mxu3 }
  0xb7   : > { %v597_v44 = vpop.f32.mrf.mxu0 }
  0xb8   : > { %v623_v42 = vpop.f32.mrf.mxu2  ;;  %v612_v45 = vadd.f32 %v611_v41, %v597_v44  ;;  %v639_v46 = vpop.f32.mrf.mxu3 }
  0xb9   : > { %v638_v43 = vadd.f32 %v637_v40, %v623_v42 }
  0xbb   : > { %v726_v0 = vadd.f32 %v638_v43, %v610_v27 }
  0xc0   : > { %v625_v47 = vpop.f32.mrf.mxu2 }
  0xc1   : > { %v640_v48 = vadd.f32 %v639_v46, %v625_v47 }
  0xc3   : > { %v665_v49 = vpop.f32.mrf.mxu3  ;;  %v732_v6 = vadd.f32 %v640_v48, %v612_v45 }
  0xc7   : > { %v651_v50 = vpop.f32.mrf.mxu1 }
  0xc8   : > { %v666_v51 = vadd.f32 %v665_v49, %v651_v50 }
  0xca   : > { %v693_v53 = vpop.f32.mrf.mxu2  ;;  %v727_v3 = vadd.f32 %v726_v0, %v666_v51 }
  0xcb   : > { %v667_v52 = vpop.f32.mrf.mxu3 }
  0xcf   : > { %v653_v54 = vpop.f32.mrf.mxu1 }
  0xd0   : > { %v668_v55 = vadd.f32 %v667_v52, %v653_v54  ;;  %v679_v57 = vpop.f32.mrf.mxu0 }
  0xd1   : > { %v694_v58 = vadd.f32 %v693_v53, %v679_v57 }
  0xd2   : > { %v695_v60 = vpop.f32.mrf.mxu2  ;;  %v733_v8 = vadd.f32 %v732_v6, %v668_v55 }
  0xd3   : > { %v701_v59 = vadd.f32 %v694_v58, %v253_v56 }
  0xd5   : > { %710 = vst.msk [vmem:[#allocation2 + $0x18] sm:$0xff] %vm244_vm2, %v701_v59 }
  0xd8   : > { %v681_v62 = vpop.f32.mrf.mxu0 }
  0xd9   : > { %v696_v63 = vadd.f32 %v695_v60, %v681_v62 }
  0xdb   : > { %v705_v1 = vadd.f32 %v696_v63, %v257_v61 }
  0xdc   : > { %v721_v2 = vld [vmem:[#allocation2 + $0x18] sm:$0xff] }
  0xdd   : > { %714 = vst.msk [vmem:[#allocation2 + $0x38] sm:$0xff] %vm244_vm2, %v705_v1  ;;  %v728_v4 = vsel %vm244_vm2, %v721_v2, 0.0 }
  0xde   : > { %v729_v5 = vadd.f32 %v728_v4, %v727_v3 }
  0xe0   : > { %730 = vadd.xlane.f32.xlu0 %v729_v5 }
  0xe4   : > { %v725_v7 = vld [vmem:[#allocation2 + $0x38] sm:$0xff] }
  0xe5   : > { %v734_v9 = vsel %vm244_vm2, %v725_v7, 0.0 }
  0xe6   : > { %v735_v10 = vadd.f32 %v734_v9, %v733_v8 }
  0xe8   : > { %736 = vadd.xlane.f32.xlu0 %v735_v10 }
 0x153   : > { %v731_v18 = vpop.xlane.xlu0 %730 }
 0x154   : > { %v745_v19 = vmul.f32 %v744_v17, %v731_v18 }
 0x156   : > { %v747_v20 = vsub.f32 %v610_v27, %v745_v19  ;;  %v748_v21 = vsub.f32 %v638_v43, %v745_v19  ;;  %v749_v22 = vsub.f32 %v666_v51, %v745_v19  ;;  %v750_v23 = vsub.f32 %v721_v2, %v745_v19 }
 0x158   : > { %v755_v24 = vmul.f32 %v747_v20, %v747_v20  ;;  %v756_v25 = vmul.f32 %v748_v21, %v748_v21  ;;  %v758_v26 = vmul.f32 %v750_v23, %v750_v23  ;;  %v757_v28 = vmul.f32 %v749_v22, %v749_v22 }
 0x15a   : > { %v763_v29 = vadd.f32 %v756_v25, %v755_v24  ;;  %v765_v33 = vsel %vm244_vm2, %v758_v26, 0.0 }
 0x15b   : > { %v737_v30 = vpop.xlane.xlu0 %736 }
 0x15c   : > { %v746_v31 = vmul.f32 %v744_v17, %v737_v30  ;;  %v764_v32 = vadd.f32 %v763_v29, %v757_v28 }
 0x15e   : > { %v1464_v34 = vsub.f32 %v612_v45, %v746_v31  ;;  %v1466_v35 = vsub.f32 %v640_v48, %v746_v31  ;;  %v766_v36 = vadd.f32 %v765_v33, %v764_v32  ;;  %v1468_v37 = vsub.f32 %v668_v55, %v746_v31 }
 0x15f   : > { %v1470_v38 = vsub.f32 %v725_v7, %v746_v31 }
 0x160   : > { %767 = vadd.xlane.f32.xlu1 %v766_v36  ;;  %v759_v39 = vmul.f32 %v1464_v34, %v1464_v34  ;;  %v760_v27 = vmul.f32 %v1466_v35, %v1466_v35  ;;  %v761_v41 = vmul.f32 %v1468_v37, %v1468_v37 }
 0x161   : > { %v762_v40 = vmul.f32 %v1470_v38, %v1470_v38 }
 0x162   : > { %v769_v42 = vadd.f32 %v760_v27, %v759_v39 }
 0x163   : > { %v771_v44 = vsel %vm244_vm2, %v762_v40, 0.0 }
 0x164   : > { %v770_v43 = vadd.f32 %v769_v42, %v761_v41 }
 0x166   : > { %v772_v45 = vadd.f32 %v771_v44, %v770_v43 }
 0x168   : > { %773 = vadd.xlane.f32.xlu1 %v772_v45 }
 0x1d3   : > { %v768_v46 = vpop.xlane.xlu1 %767 }
 0x1d4   : > { %v775_v47 = vmul.f32 %v768_v46, %v744_v17 }
 0x1d6   : > { %v777_v48 = vadd.f32 1e-05, %v775_v47 }
 0x1d8   : > { %1256 = vrsqrt.f32 %v777_v48  ;;  %vm785_vm5 = vweird.f32 %v777_v48 }
 0x1db   : > { %v774_v49 = vpop.xlane.xlu1 %773 }
 0x1dc   : > { %v776_v50 = vmul.f32 %v774_v49, %v744_v17 }
 0x1de   : > { %v1257_v51 = vpop.eup %1256  ;;  %v778_v52 = vadd.f32 1e-05, %v776_v50 }
 0x1df   : > { %v780_v53 = vmul.f32 %v1257_v51, %v777_v48  ;;  %vm786_vm4 = vweird.f32 %v1257_v51 }
 0x1e0   : > { %1258 = vrsqrt.f32 %v778_v52  ;;  %vm787_vm6 = vmor %vm785_vm5, %vm786_vm4  ;;  %vm795_vm14 = vweird.f32 %v778_v52 }
 0x1e1   : > { %v781_v54 = vmul.f32 %v1257_v51, %v780_v53 }
 0x1e3   : > { %v782_v55 = vmul.f32 0.5, %v781_v54 }
 0x1e5   : > { %v783_v56 = vsub.f32 1.5, %v782_v55 }
 0x1e6   : > { %v1259_v57 = vpop.eup %1258 }
 0x1e7   : > { %v784_v58 = vmul.f32 %v1257_v51, %v783_v56  ;;  %v790_v59 = vmul.f32 %v1259_v57, %v778_v52  ;;  %vm796_vm12 = vweird.f32 %v1259_v57 }
 0x1e8   : > { %vm797_vm15 = vmor %vm795_vm14, %vm796_vm12 }
 0x1e9   : > { %v788_v60 = vsel %vm787_vm6, %v1257_v51, %v784_v58  ;;  %v791_v61 = vmul.f32 %v1259_v57, %v790_v59 }
 0x1ea   : > { %v799_v62 = vmul.f32 %v788_v60, %v747_v20  ;;  %v800_v63 = vmul.f32 %v788_v60, %v748_v21  ;;  %v801_v0 = vmul.f32 %v788_v60, %v749_v22  ;;  %v802_v1 = vmul.f32 %v788_v60, %v750_v23 }
 0x1eb   : > { %v792_v2 = vmul.f32 0.5, %v791_v61 }
 0x1ec   : > { %vm807_vm8 = vcmp.ge.f32.partialorder %v799_v62, 0.0  ;;  %vm808_vm9 = vcmp.ge.f32.partialorder %v800_v63, 0.0  ;;  %vm809_vm10 = vcmp.ge.f32.partialorder %v801_v0, 0.0  ;;  %vm810_vm11 = vcmp.ge.f32.partialorder %v802_v1, 0.0 }
 0x1ed   : > { %v815_v3 = vmul.f32 0.2, %v799_v62  ;;  %v816_v4 = vmul.f32 0.2, %v800_v63  ;;  %v817_v5 = vmul.f32 0.2, %v801_v0 }
 0x1ee   : > { %v818_v6 = vmul.f32 0.2, %v802_v1  ;;  %v793_v7 = vsub.f32 1.5, %v792_v2 }
 0x1ef   : > { %v823_v8 = vsel %vm807_vm8, %v799_v62, %v815_v3  ;;  %v824_v9 = vsel %vm808_vm9, %v800_v63, %v816_v4  ;;  %v825_v10 = vsel %vm809_vm10, %v801_v0, %v817_v5 }
 0x1f0   : > { %v826_v12 = vsel %vm810_vm11, %v802_v1, %v818_v6  ;;  %v831_v13 = vpack.c.bf16 %v824_v9, %v823_v8  ;;  %v794_v14 = vmul.f32 %v1259_v57, %v793_v7 }
 0x1f1   : > { %v832_v15 = vpack.c.bf16 %v826_v12, %v825_v10 }
 0x1f2   : > { %835 = vst [vmem:[%s1485_s28] sm:$0xff] %v831_v13  ;;  %v798_v16 = vsel %vm797_vm15, %v1259_v57, %v794_v14 }
 0x1f3   : > { %838 = vst.msk [vmem:[%s1485_s28 + $0x8] sm:$0xff] %vm1489_vm13, %v832_v15  ;;  %v803_v17 = vmul.f32 %v798_v16, %v1464_v34  ;;  %v804_v18 = vmul.f32 %v798_v16, %v1466_v35  ;;  %v805_v19 = vmul.f32 %v798_v16, %v1468_v37  ;;  %v806_v20 = vmul.f32 %v798_v16, %v1470_v38 }
 0x1f5   : > { %vm811_vm0 = vcmp.ge.f32.partialorder %v803_v17, 0.0  ;;  %vm812_vm1 = vcmp.ge.f32.partialorder %v804_v18, 0.0  ;;  %vm813_vm2 = vcmp.ge.f32.partialorder %v805_v19, 0.0  ;;  %vm814_vm3 = vcmp.ge.f32.partialorder %v806_v20, 0.0 }
 0x1f6   : > { %v819_v21 = vmul.f32 0.2, %v803_v17  ;;  %v820_v22 = vmul.f32 0.2, %v804_v18  ;;  %v821_v23 = vmul.f32 0.2, %v805_v19 }
 0x1f7   : > { %v822_v24 = vmul.f32 0.2, %v806_v20 }
 0x1f8   : > { %v827_v25 = vsel %vm811_vm0, %v803_v17, %v819_v21  ;;  %v828_v26 = vsel %vm812_vm1, %v804_v18, %v820_v22  ;;  %v829_v28 = vsel %vm813_vm2, %v805_v19, %v821_v23 }
 0x1f9   : > { %v830_v29 = vsel %vm814_vm3, %v806_v20, %v822_v24  ;;  %v833_v30 = vpack.c.bf16 %v828_v26, %v827_v25 }
 0x1fa   : > { %v834_v31 = vpack.c.bf16 %v830_v29, %v829_v28 }
 0x1fb   : > { %839 = vst [vmem:[%s1485_s28 + $0x10] sm:$0xff] %v833_v30 }
 0x1fc   : > { %840 = vst.msk [vmem:[%s1485_s28 + $0x18] sm:$0xff] %vm1489_vm13, %v834_v31 }
 0x1fd PF: > { %s12_s11 = sadd.s32 1, %s1282_s11   ;;  %s1519_s9 = smov %s1278_s10 }
 0x1fe   : > { %p9_p5 = scmp.ge.s32.totalorder %s12_s11, 4   ;;  %s1520_s10 = smov %s1522_s12 }
 0x200   :  { %11 = sbr.rel (!%p9_p5) target bundleno = 2 (0x2), region = 69 }

// kernel: _lambda_.7
= control target key start
LH: loop header
LB: loop body
LE: loop exit
PB: predicated region body
PF: predicated region fallthrough
CT: control target
= control target key end

     0   :  { %s1074_s9 = smov 0   ;;  %s1076_s10 = smov 0   ;;  %s1229_s0 = inlined_call_operand.vmem [shape: bf16[2,400,100], index: 0, kind: input, shape index: {}]   ;;  %s1230_s1 = inlined_call_operand.vmem [shape: bf16[32,400], index: 1, kind: input, shape index: {}]   ;;  %s1231_s2 = inlined_call_operand.vmem [shape: bf16[2,32,100], index: 2, kind: output, shape index: {}]  }
   0x1   :  { %s1078_s11 = smov 0  }
   0x2 LB: > { %s31_s12 = sadd.s32 1, %s1051_s10  ;;  %p822_p0 = scmp.ge.s32.totalorder %s1055_s11, 1  ;;  %s1055_s11 = sphi %s1078_s11, %s12_s11   ;;  %s1051_s10 = sphi %s1076_s10, %s1233_s10   ;;  %s1047_s9 = sphi %s1074_s9, %s1232_s9  }
   0x3   : > { %p33_p1 = scmp.ge.s32.totalorder %s31_s12, 2  ;;  %p159_p2 = scmp.lt.s32.totalorder %s1055_s11, 3 }
   0x5   : > { %s1235_s12 = smov (%p33_p1, %s31_s12), 0  ;;  %p160_p3 = pnand %p822_p0, %p159_p2 }
   0x6   : > { %p200_p4 = scmp.lt.s32.totalorder (!%p160_p3), %s1047_s9, 1 }
   0x7   : > { %163 = sbr.rel (%p160_p3) target bundleno = 490 (0x1ea), region = 28 }
   0xc   : > { %s1237_s9 = smov (!%p200_p4, %s1047_s9), 1  ;;  %v964_v6 = vld [vmem:[%s1230_s1 + $0xc] sm:$0xf]  ;;  %v838_v7 = vld [vmem:[%s1230_s1 + $0x18] sm:$0xf0]  ;;  %vm491_vm0 = vcmask 130048  }
   0xd   : > { %s996_s13 = smul.u32 200, %s1237_s9  ;;  %v841_v12 = vor.u32 %v964_v6, %v838_v7  ;;  %v968_v22 = vld [vmem:[%s1230_s1 + $0x2c] sm:$0xf]  ;;  %v854_v23 = vld [vmem:[%s1230_s1 + $0x38] sm:$0xf0]  ;;  %vm236_vm1 = vcmask 818176  }
   0xe   : > { %v857_v27 = vor.u32 %v968_v22, %v854_v23  ;;  %v828_v28 = vld [vmem:[%s1230_s1] sm:$0xf]  ;;  %v965_v29 = vld [vmem:[%s1230_s1 + $0xc] sm:$0xf0]  ;;  %v963_v30 = vld [vmem:[%s1230_s1 + $0x4] sm:$0xf] }
   0xf   : > { %s1098_s16 = scalar_lea.vmem %s1229_s0, %s996_s13  ;;  %v830_v33 = vld [vmem:[%s1230_s1 + $0x10] sm:$0xf0]  ;;  %v836_v35 = vld [vmem:[%s1230_s1 + $0x8] sm:$0xf]  ;;  %v966_v36 = vld [vmem:[%s1230_s1 + $0x14] sm:$0xf0]  ;;  %v829_v37 = vor.u32 %v965_v29, %v828_v28 }
  0x10   : > { %v978_v0 = vld [vmem:[%s1098_s16 + $0x38] sm:$0xff]  ;;  %v977_v3 = vld [vmem:[%s1098_s16 + $0x30] sm:$0xff]  ;;  %v976_v8 = vld [vmem:[%s1098_s16 + $0x28] sm:$0xff]  ;;  %v833_v38 = vor.u32 %v963_v30, %v830_v33  ;;  %v837_v39 = vor.u32 %v966_v36, %v836_v35  ;;  %v1057_v49 = vmov 0.0   ;;  %v1058_v30 = vmov 100.0   ;;  %s962_s25 = sshll.u32 %s1237_s9, 4 }
  0x11   : > { %v986_v1 = vld [vmem:[%s1098_s16 + $0x78] sm:$0xff]  ;;  %498 = vmatpush.bf16.msra.mxu0 %v978_v0  ;;  %v985_v4 = vld [vmem:[%s1098_s16 + $0x70] sm:$0xff]  ;;  %v984_v9 = vld [vmem:[%s1098_s16 + $0x68] sm:$0xff]  ;;  %237 = vst.msk [vmem:[#allocation2] sm:$0xff] %vm236_vm1, %v1057_v49  ;;  %1023 = vrcp.f32 %v1058_v30  ;;  %s1207_s28 = scalar_lea.vmem %s1231_s2, %s962_s25  ;;  %vm701_vm8 = vcmask 814080  }
  0x12   : > { %v994_v2 = vld [vmem:[%s1098_s16 + $0xb8] sm:$0xff]  ;;  %517 = vmatpush.bf16.msra.mxu1 %v986_v1  ;;  %v993_v5 = vld [vmem:[%s1098_s16 + $0xb0] sm:$0xff]  ;;  %v995_v10 = vld [vmem:[%s1098_s16 + $0xc0] sm:$0xff]  ;;  %238 = vst.msk [vmem:[#allocation2 + $0x8] sm:$0xff] %vm236_vm1, %v1057_v49 }
  0x13   : > { %536 = vmatpush.bf16.msra.mxu2 %v994_v2  ;;  %v992_v11 = vld [vmem:[%s1098_s16 + $0xa8] sm:$0xff]  ;;  %562 = vmatpush.bf16.msra.mxu3 %v995_v10  ;;  %v975_v13 = vld [vmem:[%s1098_s16 + $0x20] sm:$0xff]  ;;  %v974_v16 = vld [vmem:[%s1098_s16 + $0x18] sm:$0xff]  ;;  %239 = vst.msk [vmem:[#allocation2 + $0x10] sm:$0xff] %vm236_vm1, %v1057_v49 }
  0x14   : > { %v983_v14 = vld [vmem:[%s1098_s16 + $0x60] sm:$0xff]  ;;  %v982_v17 = vld [vmem:[%s1098_s16 + $0x58] sm:$0xff]  ;;  %v973_v19 = vld [vmem:[%s1098_s16 + $0x10] sm:$0xff]  ;;  %240 = vst.msk [vmem:[#allocation2 + $0x18] sm:$0xff] %vm236_vm1, %v1057_v49 }
  0x15   : > { %499 = vmatpush.bf16.msra.mxu0 %v977_v3  ;;  %v991_v15 = vld [vmem:[%s1098_s16 + $0xa0] sm:$0xff]  ;;  %v990_v18 = vld [vmem:[%s1098_s16 + $0x98] sm:$0xff]  ;;  %v981_v20 = vld [vmem:[%s1098_s16 + $0x50] sm:$0xff] }
  0x16   : > { %518 = vmatpush.bf16.msra.mxu1 %v985_v4  ;;  %958 = vmatmul.msk.bf16.vlgmr.msra.gmra.mxu3 %vm491_vm0, %v841_v12  ;;  %v989_v21 = vld [vmem:[%s1098_s16 + $0x90] sm:$0xff]  ;;  %v972_v24 = vld [vmem:[%s1098_s16 + $0x8] sm:$0xff]  ;;  %v971_v31 = vld [vmem:[%s1098_s16] sm:$0xff] }
  0x17   : > { %537 = vmatpush.bf16.msra.mxu2 %v993_v5  ;;  %v980_v25 = vld [vmem:[%s1098_s16 + $0x48] sm:$0xff]  ;;  %v979_v32 = vld [vmem:[%s1098_s16 + $0x40] sm:$0xff]  ;;  %v969_v41 = vld [vmem:[%s1230_s1 + $0x2c] sm:$0xf0] }
  0x18   : > { %v988_v26 = vld [vmem:[%s1098_s16 + $0x88] sm:$0xff]  ;;  %v987_v34 = vld [vmem:[%s1098_s16 + $0x80] sm:$0xff]  ;;  %v846_v43 = vld [vmem:[%s1230_s1 + $0x30] sm:$0xf0] }
  0x19   : > { %500 = vmatpush.bf16.msra.mxu0 %v976_v8  ;;  %v844_v40 = vld [vmem:[%s1230_s1 + $0x20] sm:$0xf]  ;;  %v967_v42 = vld [vmem:[%s1230_s1 + $0x24] sm:$0xf]  ;;  %v852_v44 = vld [vmem:[%s1230_s1 + $0x28] sm:$0xf] }
  0x1a   : > { %519 = vmatpush.bf16.msra.mxu1 %v984_v9  ;;  %v970_v45 = vld [vmem:[%s1230_s1 + $0x34] sm:$0xf0]  ;;  %v845_v46 = vor.u32 %v969_v41, %v844_v40  ;;  %v849_v47 = vor.u32 %v967_v42, %v846_v43  ;;  %v241_v58 = vld [vmem:[#allocation2] sm:$0xff]  ;;  %v242_v1 = vld [vmem:[#allocation2 + $0x8] sm:$0xff] }
  0x1b   : > { %538 = vmatpush.bf16.msra.mxu2 %v992_v11  ;;  %v853_v48 = vor.u32 %v970_v45, %v852_v44  ;;  %v243_v12 = vld [vmem:[#allocation2 + $0x10] sm:$0xff]  ;;  %v244_v23 = vld [vmem:[#allocation2 + $0x18] sm:$0xff] }
  0x1d   : > { %501 = vmatpush.bf16.msra.mxu0 %v975_v13 }
  0x1e   : > { %520 = vmatpush.bf16.msra.mxu1 %v983_v14 }
  0x1f   : > { %539 = vmatpush.bf16.msra.mxu2 %v991_v15 }
  0x21   : > { %502 = vmatpush.bf16.msra.mxu0 %v974_v16 }
  0x22   : > { %521 = vmatpush.bf16.msra.mxu1 %v982_v17 }
  0x23   : > { %540 = vmatpush.bf16.msra.mxu2 %v990_v18 }
  0x25   : > { %503 = vmatpush.bf16.msra.mxu0 %v973_v19 }
  0x26   : > { %522 = vmatpush.bf16.msra.mxu1 %v981_v20  ;;  %959 = vmatmul.msk.bf16.gmra.mxu3 %vm491_vm0, %v857_v27 }
  0x27   : > { %541 = vmatpush.bf16.msra.mxu2 %v989_v21 }
  0x29   : > { %504 = vmatpush.bf16.msra.mxu0 %v972_v24 }
  0x2a   : > { %523 = vmatpush.bf16.msra.mxu1 %v980_v25 }
  0x2b   : > { %542 = vmatpush.bf16.msra.mxu2 %v988_v26 }
  0x2d   : > { %505 = vmatpush.bf16.msra.mxu0 %v971_v31  ;;  %v1024_v31 = vpop.eup %1023 }
  0x2e   : > { %524 = vmatpush.bf16.msra.mxu1 %v979_v32  ;;  %v603_v32 = vmul.f32 100.0, %v1024_v31  ;;  %vm607_vm2 = vweird.f32 %v1024_v31 }
  0x2f   : > { %543 = vmatpush.bf16.msra.mxu2 %v987_v34 }
  0x30   : > { %506 = vmatmul.bf16.vlgmr.msra.gmra.mxu0 %v829_v37  ;;  %v604_v33 = vsub.f32 1.0, %v603_v32 }
  0x31   : > { %525 = vmatmul.bf16.vlgmr.msra.gmra.mxu1 %v833_v38 }
  0x32   : > { %544 = vmatmul.bf16.vlgmr.msra.gmra.mxu2 %v837_v39  ;;  %v605_v34 = vmul.f32 %v1024_v31, %v604_v33 }
  0x34   : > { %v606_v35 = vadd.f32 %v1024_v31, %v605_v34 }
  0x36   : > { %v608_v36 = vsel %vm607_vm2, %v1024_v31, %v606_v35 }
  0x40   : > { %511 = vmatmul.bf16.gmra.mxu0 %v845_v46 }
  0x41   : > { %530 = vmatmul.bf16.gmra.mxu1 %v849_v47 }
  0x42   : > { %549 = vmatmul.bf16.gmra.mxu2 %v853_v48 }
  0x99   : > { %v564_v52 = vpop.f32.mrf.mxu3 }
  0xa1   : > { %v566_v61 = vpop.f32.mrf.mxu3 }
  0xa9   : > { %v569_v9 = vpop.f32.mrf.mxu3 }
  0xad   : > { %v507_v50 = vpop.f32.mrf.mxu0 }
  0xae   : > { %v526_v51 = vpop.f32.mrf.mxu1 }
  0xaf   : > { %v527_v53 = vadd.f32 %v526_v51, %v507_v50 }
  0xb1   : > { %v571_v22 = vpop.f32.mrf.mxu3 }
  0xb5   : > { %v545_v54 = vpop.f32.mrf.mxu2  ;;  %v509_v56 = vpop.f32.mrf.mxu0 }
  0xb6   : > { %v546_v55 = vadd.f32 %v545_v54, %v527_v53  ;;  %v528_v57 = vpop.f32.mrf.mxu1 }
  0xb7   : > { %v529_v62 = vadd.f32 %v528_v57, %v509_v56 }
  0xb8   : > { %v565_v59 = vadd.f32 %v564_v52, %v546_v55 }
  0xba   : > { %v574_v60 = vadd.f32 %v565_v59, %v241_v58 }
  0xbc   : > { %579 = vst.msk [vmem:[#allocation2] sm:$0xff] %vm236_vm1, %v574_v60 }
  0xbd   : > { %v547_v63 = vpop.f32.mrf.mxu2  ;;  %v512_v2 = vpop.f32.mrf.mxu0 }
  0xbe   : > { %v548_v0 = vadd.f32 %v547_v63, %v529_v62  ;;  %v531_v3 = vpop.f32.mrf.mxu1 }
  0xbf   : > { %v532_v6 = vadd.f32 %v531_v3, %v512_v2 }
  0xc0   : > { %v567_v4 = vadd.f32 %v566_v61, %v548_v0 }
  0xc2   : > { %v575_v5 = vadd.f32 %v567_v4, %v242_v1 }
  0xc3   : > { %v586_v7 = vld [vmem:[#allocation2] sm:$0xff] }
  0xc4   : > { %580 = vst.msk [vmem:[#allocation2 + $0x8] sm:$0xff] %vm236_vm1, %v575_v5  ;;  %v590_v8 = vsel %vm236_vm1, %v586_v7, 0.0 }
  0xc5   : > { %v550_v10 = vpop.f32.mrf.mxu2  ;;  %591 = vadd.xlane.f32.xlu0 %v590_v8  ;;  %v514_v14 = vpop.f32.mrf.mxu0 }
  0xc6   : > { %v551_v11 = vadd.f32 %v550_v10, %v532_v6  ;;  %v533_v15 = vpop.f32.mrf.mxu1 }
  0xc7   : > { %v534_v18 = vadd.f32 %v533_v15, %v514_v14 }
  0xc8   : > { %v570_v13 = vadd.f32 %v569_v9, %v551_v11 }
  0xca   : > { %v576_v16 = vadd.f32 %v570_v13, %v243_v12 }
  0xcb   : > { %v587_v17 = vld [vmem:[#allocation2 + $0x8] sm:$0xff] }
  0xcc   : > { %581 = vst.msk [vmem:[#allocation2 + $0x10] sm:$0xff] %vm236_vm1, %v576_v16  ;;  %v593_v19 = vsel %vm236_vm1, %v587_v17, 0.0 }
  0xcd   : > { %v552_v20 = vpop.f32.mrf.mxu2  ;;  %594 = vadd.xlane.f32.xlu0 %v593_v19 }
  0xce   : > { %v553_v21 = vadd.f32 %v552_v20, %v534_v18 }
  0xd0   : > { %v572_v24 = vadd.f32 %v571_v22, %v553_v21 }
  0xd2   : > { %v577_v25 = vadd.f32 %v572_v24, %v244_v23 }
  0xd3   : > { %v588_v26 = vld [vmem:[#allocation2 + $0x10] sm:$0xff] }
  0xd4   : > { %582 = vst.msk [vmem:[#allocation2 + $0x18] sm:$0xff] %vm236_vm1, %v577_v25  ;;  %v596_v27 = vsel %vm236_vm1, %v588_v26, 0.0 }
  0xd5   : > { %597 = vadd.xlane.f32.xlu1 %v596_v27 }
  0xdb   : > { %v589_v28 = vld [vmem:[#allocation2 + $0x18] sm:$0xff] }
  0xdc   : > { %v599_v29 = vsel %vm236_vm1, %v589_v28, 0.0 }
  0xdd   : > { %600 = vadd.xlane.f32.xlu1 %v599_v29 }
 0x138   : > { %v592_v37 = vpop.xlane.xlu0 %591 }
 0x139   : > { %v609_v38 = vmul.f32 %v608_v36, %v592_v37 }
 0x13b   : > { %v613_v39 = vsub.f32 %v586_v7, %v609_v38 }
 0x13d   : > { %v617_v40 = vmul.f32 %v613_v39, %v613_v39 }
 0x13f   : > { %v621_v41 = vsel %vm236_vm1, %v617_v40, 0.0 }
 0x140   : > { %622 = vadd.xlane.f32.xlu2 %v621_v41  ;;  %v595_v42 = vpop.xlane.xlu0 %594 }
 0x141   : > { %v610_v43 = vmul.f32 %v608_v36, %v595_v42 }
 0x143   : > { %v1188_v44 = vsub.f32 %v587_v17, %v610_v43 }
 0x145   : > { %v618_v45 = vmul.f32 %v1188_v44, %v1188_v44 }
 0x147   : > { %v624_v46 = vsel %vm236_vm1, %v618_v45, 0.0 }
 0x148   : > { %625 = vadd.xlane.f32.xlu2 %v624_v46  ;;  %v598_v47 = vpop.xlane.xlu1 %597 }
 0x149   : > { %v611_v48 = vmul.f32 %v608_v36, %v598_v47 }
 0x14b   : > { %v1193_v49 = vsub.f32 %v588_v26, %v611_v48 }
 0x14d   : > { %v619_v50 = vmul.f32 %v1193_v49, %v1193_v49 }
 0x14f   : > { %v627_v51 = vsel %vm236_vm1, %v619_v50, 0.0 }
 0x150   : > { %628 = vadd.xlane.f32.xlu0 %v627_v51  ;;  %v601_v52 = vpop.xlane.xlu1 %600 }
 0x151   : > { %v612_v53 = vmul.f32 %v608_v36, %v601_v52 }
 0x153   : > { %v1198_v54 = vsub.f32 %v589_v28, %v612_v53 }
 0x155   : > { %v620_v55 = vmul.f32 %v1198_v54, %v1198_v54 }
 0x157   : > { %v630_v56 = vsel %vm236_vm1, %v620_v55, 0.0 }
 0x158   : > { %631 = vadd.xlane.f32.xlu1 %v630_v56 }
 0x1b3   : > { %v623_v57 = vpop.xlane.xlu2 %622 }
 0x1b4   : > { %v633_v58 = vmul.f32 %v623_v57, %v608_v36 }
 0x1b6   : > { %v637_v59 = vadd.f32 1e-05, %v633_v58 }
 0x1b8   : > { %1025 = vrsqrt.f32 %v637_v59  ;;  %vm647_vm4 = vweird.f32 %v637_v59 }
 0x1bb   : > { %v626_v60 = vpop.xlane.xlu2 %625 }
 0x1bc   : > { %v634_v61 = vmul.f32 %v626_v60, %v608_v36 }
 0x1be   : > { %v1026_v62 = vpop.eup %1025  ;;  %v638_v63 = vadd.f32 1e-05, %v634_v61 }
 0x1bf   : > { %v642_v0 = vmul.f32 %v1026_v62, %v637_v59  ;;  %vm648_vm3 = vweird.f32 %v1026_v62 }
 0x1c0   : > { %1027 = vrsqrt.f32 %v638_v63  ;;  %vm649_vm5 = vmor %vm647_vm4, %vm648_vm3  ;;  %vm657_vm9 = vweird.f32 %v638_v63 }
 0x1c1   : > { %v643_v1 = vmul.f32 %v1026_v62, %v642_v0 }
 0x1c3   : > { %v644_v2 = vmul.f32 0.5, %v643_v1  ;;  %v629_v3 = vpop.xlane.xlu0 %628 }
 0x1c4   : > { %v635_v4 = vmul.f32 %v629_v3, %v608_v36 }
 0x1c5   : > { %v645_v5 = vsub.f32 1.5, %v644_v2 }
 0x1c6   : > { %v1028_v6 = vpop.eup %1027  ;;  %v639_v7 = vadd.f32 1e-05, %v635_v4 }
 0x1c7   : > { %v646_v8 = vmul.f32 %v1026_v62, %v645_v5  ;;  %v652_v9 = vmul.f32 %v1028_v6, %v638_v63  ;;  %vm658_vm7 = vweird.f32 %v1028_v6 }
 0x1c8   : > { %1029 = vrsqrt.f32 %v639_v7  ;;  %vm659_vm10 = vmor %vm657_vm9, %vm658_vm7  ;;  %vm667_vm13 = vweird.f32 %v639_v7 }
 0x1c9   : > { %v650_v10 = vsel %vm649_vm5, %v1026_v62, %v646_v8  ;;  %v653_v11 = vmul.f32 %v1028_v6, %v652_v9 }
 0x1ca   : > { %v681_v12 = vmul.f32 %v650_v10, %v613_v39 }
 0x1cb   : > { %v654_v13 = vmul.f32 0.5, %v653_v11  ;;  %v632_v14 = vpop.xlane.xlu1 %631 }
 0x1cc   : > { %vm685_vm6 = vcmp.ge.f32.partialorder %v681_v12, 0.0  ;;  %v689_v15 = vmul.f32 0.2, %v681_v12  ;;  %v636_v16 = vmul.f32 %v632_v14, %v608_v36 }
 0x1cd   : > { %v655_v17 = vsub.f32 1.5, %v654_v13 }
 0x1ce   : > { %v1030_v18 = vpop.eup %1029  ;;  %v693_v19 = vsel %vm685_vm6, %v681_v12, %v689_v15  ;;  %v640_v20 = vadd.f32 1e-05, %v636_v16 }
 0x1cf   : > { %v697_v21 = vpack.c.bf16 %v693_v19, %v693_v19  ;;  %v656_v22 = vmul.f32 %v1028_v6, %v655_v17  ;;  %v662_v23 = vmul.f32 %v1030_v18, %v639_v7  ;;  %vm668_vm12 = vweird.f32 %v1030_v18 }
 0x1d0   : > { %1031 = vrsqrt.f32 %v640_v20  ;;  %vm669_vm14 = vmor %vm667_vm13, %vm668_vm12  ;;  %vm677_vm1 = vweird.f32 %v640_v20 }
 0x1d1   : > { %702 = vst.msk [vmem:[%s1207_s28] sm:$0xf] %vm701_vm8, %v697_v21  ;;  %v660_v24 = vsel %vm659_vm10, %v1028_v6, %v656_v22  ;;  %v663_v25 = vmul.f32 %v1030_v18, %v662_v23 }
 0x1d2   : > { %v682_v26 = vmul.f32 %v660_v24, %v1188_v44 }
 0x1d3   : > { %v664_v27 = vmul.f32 0.5, %v663_v25 }
 0x1d4   : > { %vm686_vm11 = vcmp.ge.f32.partialorder %v682_v26, 0.0  ;;  %v690_v28 = vmul.f32 0.2, %v682_v26 }
 0x1d5   : > { %v665_v29 = vsub.f32 1.5, %v664_v27 }
 0x1d6   : > { %v1032_v30 = vpop.eup %1031  ;;  %v694_v31 = vsel %vm686_vm11, %v682_v26, %v690_v28 }
 0x1d7   : > { %v698_v32 = vpack.c.bf16 %v694_v31, %v694_v31  ;;  %v666_v33 = vmul.f32 %v1030_v18, %v665_v29  ;;  %v672_v34 = vmul.f32 %v1032_v30, %v640_v20  ;;  %vm678_vm0 = vweird.f32 %v1032_v30 }
 0x1d8   : > { %vm679_vm2 = vmor %vm677_vm1, %vm678_vm0 }
 0x1d9   : > { %703 = vst.msk [vmem:[%s1207_s28 + $0x4] sm:$0xf] %vm701_vm8, %v698_v32  ;;  %v670_v35 = vsel %vm669_vm14, %v1030_v18, %v666_v33  ;;  %v673_v36 = vmul.f32 %v1032_v30, %v672_v34 }
 0x1da   : > { %v683_v37 = vmul.f32 %v670_v35, %v1193_v49 }
 0x1db   : > { %v674_v38 = vmul.f32 0.5, %v673_v36 }
 0x1dc   : > { %vm687_vm15 = vcmp.ge.f32.partialorder %v683_v37, 0.0  ;;  %v691_v39 = vmul.f32 0.2, %v683_v37 }
 0x1dd   : > { %v675_v40 = vsub.f32 1.5, %v674_v38 }
 0x1de   : > { %v695_v41 = vsel %vm687_vm15, %v683_v37, %v691_v39 }
 0x1df   : > { %v699_v42 = vpack.c.bf16 %v695_v41, %v695_v41  ;;  %v676_v43 = vmul.f32 %v1032_v30, %v675_v40 }
 0x1e1   : > { %704 = vst.msk [vmem:[%s1207_s28 + $0x8] sm:$0xf] %vm701_vm8, %v699_v42  ;;  %v680_v44 = vsel %vm679_vm2, %v1032_v30, %v676_v43 }
 0x1e2   : > { %v684_v45 = vmul.f32 %v680_v44, %v1198_v54 }
 0x1e4   : > { %vm688_vm3 = vcmp.ge.f32.partialorder %v684_v45, 0.0  ;;  %v692_v46 = vmul.f32 0.2, %v684_v45 }
 0x1e6   : > { %v696_v47 = vsel %vm688_vm3, %v684_v45, %v692_v46 }
 0x1e7   : > { %v700_v48 = vpack.c.bf16 %v696_v47, %v696_v47 }
 0x1e9   : > { %705 = vst.msk [vmem:[%s1207_s28 + $0xc] sm:$0xf] %vm701_vm8, %v700_v48 }
 0x1ea PF: > { %s12_s11 = sadd.s32 1, %s1055_s11   ;;  %s1232_s9 = smov %s1051_s10 }
 0x1eb   : > { %p9_p5 = scmp.ge.s32.totalorder %s12_s11, 4   ;;  %s1233_s10 = smov %s1235_s12 }
 0x1ed   :  { %11 = sbr.rel (!%p9_p5) target bundleno = 2 (0x2), region = 69 }

// kernel: _lambda_.8
= control target key start
LH: loop header
LB: loop body
LE: loop exit
PB: predicated region body
PF: predicated region fallthrough
CT: control target
= control target key end

     0   :  { %s1532_s9 = smov 0   ;;  %s1534_s10 = smov 0   ;;  %s1851_s0 = inlined_call_operand.vmem [shape: bf16[2,1024,25], index: 0, kind: input, shape index: {}]   ;;  %s1852_s1 = inlined_call_operand.vmem [shape: bf16[64,1024], index: 1, kind: input, shape index: {}]   ;;  %s1853_s2 = inlined_call_operand.vmem [shape: bf16[2,64,25], index: 2, kind: output, shape index: {}]  }
   0x1   :  { %s1536_s11 = smov 0   ;;  %s1538_s12 = smov 0  }
   0x2   :  { %s1540_s13 = smov 0   ;;  %s1542_s14 = smov 0  }
   0x3   :  { %s1544_s15 = smov 0  }
   0x4 LB: > { %s24_s16 = sadd.s32 1, %s1505_s13  ;;  %s31_s17 = sadd.s32 1, %s1509_s14  ;;  %s1513_s15 = sphi %s1544_s15, %s12_s15   ;;  %s1509_s14 = sphi %s1542_s14, %s1861_s14   ;;  %s1505_s13 = sphi %s1540_s13, %s1860_s13   ;;  %s1501_s12 = sphi %s1538_s12, %s1859_s12   ;;  %s1497_s11 = sphi %s1536_s11, %s1858_s11   ;;  %s1493_s10 = sphi %s1534_s10, %s1857_s10   ;;  %s1489_s9 = sphi %s1532_s9, %s1856_s9  }
   0x5   : > { %p25_p0 = scmp.ge.s32.totalorder %s24_s16, 2  ;;  %s68_s18 = sadd.s32 1, %s1493_s10 }
   0x6   : > { %p75_p1 = scmp.ne.s32.totalorder %s1493_s10, %s1489_s9  ;;  %p76_p2 = scmp.eq.s32.totalorder %s1513_s15, 0 }
   0x7   : > { %s1863_s16 = smov (%p25_p0, %s24_s16), 0  ;;  %s1865_s17 = smov (!%p25_p0, %s31_s17), %s1509_s14 }
   0x8   : > { %s64_s19 = ssub.s32 %s1505_s13, %s1863_s16  ;;  %p77_p3 = por %p76_p2, %p75_p1 }
   0x9   : > { %p33_p4 = scmp.ge.s32.totalorder %s1865_s17, 2  ;;  %p66_p5 = scmp.eq.s32.totalorder %s64_s19, 0 }
   0xa   : > { %p1126_p6 = scmp.ge.s32.totalorder %s1513_s15, 4 }
   0xb   : > { %s1867_s17 = smov (%p33_p4, %s1865_s17), 0 }
   0xc   : > { %s1581_s20 = scalar_select %p66_p5, %s1493_s10, %s68_s18  }
   0xd   : > { %129 = sbr.rel (%p1126_p6) target bundleno = 38 (0x26), region = 16 }
  0x12   : > { %145 = sbr.rel (!%p77_p3) target bundleno = 38 (0x26), region = 24  ;;  %s147_s21 = sand.u32 (%p77_p3), 1, %s1493_s10  }
  0x13   : > { %s1333_s22 = sshll.u32 (%p77_p3), %s1505_s13, 4  ;;  %s1127_s23 = sshll.u32 (%p77_p3), %s147_s21, 7 }
  0x14   : > { %s1589_s26 = scalar_lea.vmem (%p77_p3), %s1852_s1, %s1333_s22  ;;  %s149_s27 = scalar_lea.vmem (%p77_p3), [#allocation3], %s1127_s23 }
  0x15   : > { %v168_v0 = vld [vmem:[%s1589_s26] sm:$0xff] (%p77_p3)  ;;  %v170_v1 = vld [vmem:[%s1589_s26 + $0x8] sm:$0xff] (%p77_p3) }
  0x16   : > { %v172_v2 = vld [vmem:[%s1589_s26 + $0x20] sm:$0xff] (%p77_p3)  ;;  %169 = vst [vmem:[%s149_s27] sm:$0xff] (%p77_p3), %v168_v0  ;;  %v174_v3 = vld [vmem:[%s1589_s26 + $0x28] sm:$0xff] (%p77_p3) }
  0x17   : > { %171 = vst [vmem:[%s149_s27 + $0x8] sm:$0xff] %v170_v1  ;;  %v176_v4 = vld [vmem:[%s1589_s26 + $0x40] sm:$0xff]  ;;  %v178_v5 = vld [vmem:[%s1589_s26 + $0x48] sm:$0xff] }
  0x18   : > { %173 = vst [vmem:[%s149_s27 + $0x10] sm:$0xff] %v172_v2  ;;  %v180_v6 = vld [vmem:[%s1589_s26 + $0x60] sm:$0xff]  ;;  %v182_v7 = vld [vmem:[%s1589_s26 + $0x68] sm:$0xff] }
  0x19   : > { %175 = vst [vmem:[%s149_s27 + $0x18] sm:$0xff] %v174_v3  ;;  %v184_v8 = vld [vmem:[%s1589_s26 + $0x80] sm:$0xff]  ;;  %v186_v9 = vld [vmem:[%s1589_s26 + $0x88] sm:$0xff] }
  0x1a   : > { %177 = vst [vmem:[%s149_s27 + $0x20] sm:$0xff] %v176_v4  ;;  %v188_v10 = vld [vmem:[%s1589_s26 + $0xa0] sm:$0xff]  ;;  %v190_v11 = vld [vmem:[%s1589_s26 + $0xa8] sm:$0xff] }
  0x1b   : > { %179 = vst [vmem:[%s149_s27 + $0x28] sm:$0xff] %v178_v5  ;;  %v192_v12 = vld [vmem:[%s1589_s26 + $0xc0] sm:$0xff]  ;;  %v194_v13 = vld [vmem:[%s1589_s26 + $0xc8] sm:$0xff] }
  0x1c   : > { %181 = vst [vmem:[%s149_s27 + $0x30] sm:$0xff] %v180_v6  ;;  %v196_v14 = vld [vmem:[%s1589_s26 + $0xe0] sm:$0xff]  ;;  %v198_v15 = vld [vmem:[%s1589_s26 + $0xe8] sm:$0xff] }
  0x1d   : > { %183 = vst [vmem:[%s149_s27 + $0x38] sm:$0xff] %v182_v7 }
  0x1e   : > { %185 = vst [vmem:[%s149_s27 + $0x40] sm:$0xff] %v184_v8 }
  0x1f   : > { %187 = vst [vmem:[%s149_s27 + $0x48] sm:$0xff] %v186_v9 }
  0x20   : > { %189 = vst [vmem:[%s149_s27 + $0x50] sm:$0xff] %v188_v10 }
  0x21   : > { %191 = vst [vmem:[%s149_s27 + $0x58] sm:$0xff] %v190_v11 }
  0x22   : > { %193 = vst [vmem:[%s149_s27 + $0x60] sm:$0xff] %v192_v12 }
  0x23   : > { %195 = vst [vmem:[%s149_s27 + $0x68] sm:$0xff] %v194_v13 }
  0x24   : > { %197 = vst [vmem:[%s149_s27 + $0x70] sm:$0xff] %v196_v14 }
  0x25   : > { %199 = vst [vmem:[%s149_s27 + $0x78] sm:$0xff] %v198_v15 }
  0x26 PF: > { %p1130_p7 = scmp.ge.s32.totalorder %s1513_s15, 1  ;;  %p204_p8 = scmp.lt.s32.totalorder %s1513_s15, 5 }
  0x28   : > { %p205_p9 = pnand %p1130_p7, %p204_p8 }
  0x29   : > { %s211_s28 = sand.u32 (!%p205_p9), 1, %s1489_s9   ;;  %s1132_s29 = sshll.u32 (!%p205_p9), %s1497_s11, 6 }
  0x2a   : > { %208 = sbr.rel (%p205_p9) target bundleno = 590 (0x24e), region = 47  ;;  %s1131_s30 = sshll.u32 (!%p205_p9), %s211_s28, 7 }
  0x2b   : > { %p246_p10 = scmp.lt.s32.totalorder (!%p205_p9), %s1501_s12, 1  ;;  %p248_p11 = scmp.lt.s32.totalorder (!%p205_p9), %s1132_s29, 127 }
  0x2c   : > { %s1623_s9 = scalar_lea.vmem (!%p205_p9), [#allocation3], %s1131_s30  ;;  %p1137_p12 = scmp.ne.s32.totalorder (!%p205_p9), %s1497_s11, 0 }
  0x2f   : > { %s1869_s12 = smov (!%p246_p10, %s1501_s12), 1  ;;  %s1871_s29 = smov (!%p248_p11, %s1132_s29), 127 }
  0x30   : > { %s1133_s3 = sshll.u32 %s1869_s12, 7  ;;  %s1334_s4 = sshll.u32 %s1869_s12, 5 }
  0x31   : > { %s251_s5 = sadd.s32 %s1133_s3, %s1871_s29  ;;  %s1616_s8 = scalar_lea.vmem %s1853_s2, %s1334_s4 }
  0x32   : > { %s1134_s18 = sshll.u32 %s251_s5, 2  ;;  %270 = sbr.rel (%p1137_p12) target bundleno = 64 (0x40), region = 55 }
  0x33   : > { %s1621_s22 = scalar_lea.vmem %s1851_s0, %s1134_s18 }
  0x37   : > { %vm271_vm0 = vcmask 203776   ;;  %v1515_v16 = vmov 0.0  }
  0x38   : > { %272 = vst.msk [vmem:[#allocation2] sm:$0xff] %vm271_vm0, %v1515_v16 }
  0x39   : > { %273 = vst.msk [vmem:[#allocation2 + $0x8] sm:$0xff] %vm271_vm0, %v1515_v16 }
  0x3a   : > { %274 = vst.msk [vmem:[#allocation2 + $0x10] sm:$0xff] %vm271_vm0, %v1515_v16 }
  0x3b   : > { %275 = vst.msk [vmem:[#allocation2 + $0x18] sm:$0xff] %vm271_vm0, %v1515_v16 }
  0x3c   : > { %276 = vst.msk [vmem:[#allocation2 + $0x20] sm:$0xff] %vm271_vm0, %v1515_v16 }
  0x3d   : > { %277 = vst.msk [vmem:[#allocation2 + $0x28] sm:$0xff] %vm271_vm0, %v1515_v16 }
  0x3e   : > { %278 = vst.msk [vmem:[#allocation2 + $0x30] sm:$0xff] %vm271_vm0, %v1515_v16 }
  0x3f   : > { %279 = vst.msk [vmem:[#allocation2 + $0x38] sm:$0xff] %vm271_vm0, %v1515_v16 }
  0x40 PF: > { %v1358_v17 = vld [vmem:[%s1621_s22 + $0x38] sm:$0xff]  ;;  %v1357_v21 = vld [vmem:[%s1621_s22 + $0x30] sm:$0xff]  ;;  %v1356_v25 = vld [vmem:[%s1621_s22 + $0x28] sm:$0xff]  ;;  %vm764_vm1 = vcmask 203776   ;;  %p1330_p13 = scmp.ne.s32.totalorder %s1497_s11, 1 }
  0x41   : > { %v1366_v18 = vld [vmem:[%s1621_s22 + $0x78] sm:$0xff]  ;;  %640 = vmatpush.bf16.msra.mxu0 %v1358_v17  ;;  %v1365_v22 = vld [vmem:[%s1621_s22 + $0x70] sm:$0xff]  ;;  %v1364_v26 = vld [vmem:[%s1621_s22 + $0x68] sm:$0xff] }
  0x42   : > { %v1374_v19 = vld [vmem:[%s1621_s22 + $0xb8] sm:$0xff]  ;;  %669 = vmatpush.bf16.msra.mxu1 %v1366_v18  ;;  %v1373_v23 = vld [vmem:[%s1621_s22 + $0xb0] sm:$0xff]  ;;  %v1372_v27 = vld [vmem:[%s1621_s22 + $0xa8] sm:$0xff] }
  0x43   : > { %v1382_v20 = vld [vmem:[%s1621_s22 + $0xf8] sm:$0xff]  ;;  %698 = vmatpush.bf16.msra.mxu2 %v1374_v19  ;;  %v1381_v24 = vld [vmem:[%s1621_s22 + $0xf0] sm:$0xff]  ;;  %v1380_v28 = vld [vmem:[%s1621_s22 + $0xe8] sm:$0xff] }
  0x44   : > { %727 = vmatpush.bf16.msra.mxu3 %v1382_v20  ;;  %v1355_v29 = vld [vmem:[%s1621_s22 + $0x20] sm:$0xff]  ;;  %v1354_v33 = vld [vmem:[%s1621_s22 + $0x18] sm:$0xff]  ;;  %v1353_v37 = vld [vmem:[%s1621_s22 + $0x10] sm:$0xff] }
  0x45   : > { %641 = vmatpush.bf16.msra.mxu0 %v1357_v21  ;;  %v1363_v30 = vld [vmem:[%s1621_s22 + $0x60] sm:$0xff]  ;;  %v1362_v34 = vld [vmem:[%s1621_s22 + $0x58] sm:$0xff]  ;;  %v1361_v38 = vld [vmem:[%s1621_s22 + $0x50] sm:$0xff] }
  0x46   : > { %670 = vmatpush.bf16.msra.mxu1 %v1365_v22  ;;  %v1371_v31 = vld [vmem:[%s1621_s22 + $0xa0] sm:$0xff]  ;;  %v1370_v35 = vld [vmem:[%s1621_s22 + $0x98] sm:$0xff]  ;;  %v1369_v39 = vld [vmem:[%s1621_s22 + $0x90] sm:$0xff] }
  0x47   : > { %699 = vmatpush.bf16.msra.mxu2 %v1373_v23  ;;  %v1379_v32 = vld [vmem:[%s1621_s22 + $0xe0] sm:$0xff]  ;;  %v1378_v36 = vld [vmem:[%s1621_s22 + $0xd8] sm:$0xff]  ;;  %v1377_v40 = vld [vmem:[%s1621_s22 + $0xd0] sm:$0xff] }
  0x48   : > { %728 = vmatpush.bf16.msra.mxu3 %v1381_v24  ;;  %v1352_v41 = vld [vmem:[%s1621_s22 + $0x8] sm:$0xff]  ;;  %v1351_v45 = vld [vmem:[%s1621_s22] sm:$0xff]  ;;  %v1337_v50 = vld [vmem:[%s1623_s9 + $0xc] sm:$0xf0] }
  0x49   : > { %642 = vmatpush.bf16.msra.mxu0 %v1356_v25  ;;  %v1360_v42 = vld [vmem:[%s1621_s22 + $0x48] sm:$0xff]  ;;  %v1359_v46 = vld [vmem:[%s1621_s22 + $0x40] sm:$0xff]  ;;  %v1142_v52 = vld [vmem:[%s1623_s9 + $0x10] sm:$0xf0] }
  0x4a   : > { %671 = vmatpush.bf16.msra.mxu1 %v1364_v26  ;;  %v1368_v43 = vld [vmem:[%s1621_s22 + $0x88] sm:$0xff]  ;;  %v1367_v47 = vld [vmem:[%s1621_s22 + $0x80] sm:$0xff]  ;;  %v1338_v54 = vld [vmem:[%s1623_s9 + $0x14] sm:$0xf0] }
  0x4b   : > { %700 = vmatpush.bf16.msra.mxu2 %v1372_v27  ;;  %v1376_v44 = vld [vmem:[%s1621_s22 + $0xc8] sm:$0xff]  ;;  %v1375_v48 = vld [vmem:[%s1621_s22 + $0xc0] sm:$0xff]  ;;  %v1150_v56 = vld [vmem:[%s1623_s9 + $0x18] sm:$0xf0] }
  0x4c   : > { %729 = vmatpush.bf16.msra.mxu3 %v1380_v28  ;;  %v1140_v49 = vld [vmem:[%s1623_s9] sm:$0xf]  ;;  %v1335_v51 = vld [vmem:[%s1623_s9 + $0x4] sm:$0xf]  ;;  %v1148_v53 = vld [vmem:[%s1623_s9 + $0x8] sm:$0xf] }
  0x4d   : > { %643 = vmatpush.bf16.msra.mxu0 %v1355_v29  ;;  %v1336_v55 = vld [vmem:[%s1623_s9 + $0xc] sm:$0xf]  ;;  %v1141_v57 = vor.u32 %v1337_v50, %v1140_v49  ;;  %v1145_v58 = vor.u32 %v1335_v51, %v1142_v52  ;;  %v1149_v59 = vor.u32 %v1338_v54, %v1148_v53  ;;  %v1156_v61 = vld [vmem:[%s1623_s9 + $0x20] sm:$0xf]  ;;  %v1341_v62 = vld [vmem:[%s1623_s9 + $0x2c] sm:$0xf0] }
  0x4e   : > { %672 = vmatpush.bf16.msra.mxu1 %v1363_v30  ;;  %v1153_v60 = vor.u32 %v1336_v55, %v1150_v56  ;;  %v1339_v63 = vld [vmem:[%s1623_s9 + $0x24] sm:$0xf]  ;;  %v1158_v0 = vld [vmem:[%s1623_s9 + $0x30] sm:$0xf0]  ;;  %v1164_v1 = vld [vmem:[%s1623_s9 + $0x28] sm:$0xf]  ;;  %v1157_v5 = vor.u32 %v1341_v62, %v1156_v61 }
  0x4f   : > { %701 = vmatpush.bf16.msra.mxu2 %v1371_v31  ;;  %v1342_v2 = vld [vmem:[%s1623_s9 + $0x34] sm:$0xf0]  ;;  %v1340_v3 = vld [vmem:[%s1623_s9 + $0x2c] sm:$0xf]  ;;  %v1166_v4 = vld [vmem:[%s1623_s9 + $0x38] sm:$0xf0]  ;;  %v1161_v6 = vor.u32 %v1339_v63, %v1158_v0 }
  0x50   : > { %730 = vmatpush.bf16.msra.mxu3 %v1379_v32  ;;  %v1165_v7 = vor.u32 %v1342_v2, %v1164_v1  ;;  %v1169_v8 = vor.u32 %v1340_v3, %v1166_v4  ;;  %v1172_v9 = vld [vmem:[%s1623_s9 + $0x40] sm:$0xf]  ;;  %v1345_v10 = vld [vmem:[%s1623_s9 + $0x4c] sm:$0xf0]  ;;  %v1343_v11 = vld [vmem:[%s1623_s9 + $0x44] sm:$0xf] }
  0x51   : > { %644 = vmatpush.bf16.msra.mxu0 %v1354_v33  ;;  %v1174_v12 = vld [vmem:[%s1623_s9 + $0x50] sm:$0xf0]  ;;  %v1180_v13 = vld [vmem:[%s1623_s9 + $0x48] sm:$0xf]  ;;  %v1346_v14 = vld [vmem:[%s1623_s9 + $0x54] sm:$0xf0]  ;;  %v1173_v17 = vor.u32 %v1345_v10, %v1172_v9 }
  0x52   : > { %673 = vmatpush.bf16.msra.mxu1 %v1362_v34  ;;  %v1344_v15 = vld [vmem:[%s1623_s9 + $0x4c] sm:$0xf]  ;;  %v1182_v16 = vld [vmem:[%s1623_s9 + $0x58] sm:$0xf0]  ;;  %v1177_v18 = vor.u32 %v1343_v11, %v1174_v12  ;;  %v1181_v19 = vor.u32 %v1346_v14, %v1180_v13  ;;  %v1188_v21 = vld [vmem:[%s1623_s9 + $0x60] sm:$0xf] }
  0x53   : > { %702 = vmatpush.bf16.msra.mxu2 %v1370_v35  ;;  %v1185_v20 = vor.u32 %v1344_v15, %v1182_v16  ;;  %v1349_v22 = vld [vmem:[%s1623_s9 + $0x6c] sm:$0xf0]  ;;  %v1347_v23 = vld [vmem:[%s1623_s9 + $0x64] sm:$0xf]  ;;  %v1190_v24 = vld [vmem:[%s1623_s9 + $0x70] sm:$0xf0] }
  0x54   : > { %731 = vmatpush.bf16.msra.mxu3 %v1378_v36  ;;  %v1196_v25 = vld [vmem:[%s1623_s9 + $0x68] sm:$0xf]  ;;  %v1350_v26 = vld [vmem:[%s1623_s9 + $0x74] sm:$0xf0]  ;;  %v1348_v27 = vld [vmem:[%s1623_s9 + $0x6c] sm:$0xf]  ;;  %v1189_v29 = vor.u32 %v1349_v22, %v1188_v21  ;;  %v1193_v30 = vor.u32 %v1347_v23, %v1190_v24 }
  0x55   : > { %645 = vmatpush.bf16.msra.mxu0 %v1353_v37  ;;  %v1198_v28 = vld [vmem:[%s1623_s9 + $0x78] sm:$0xf0]  ;;  %v1197_v31 = vor.u32 %v1350_v26, %v1196_v25  ;;  %v281_v50 = vld [vmem:[#allocation2 + $0x8] sm:$0xff]  ;;  %v284_v13 = vld [vmem:[#allocation2 + $0x20] sm:$0xff] }
  0x56   : > { %674 = vmatpush.bf16.msra.mxu1 %v1361_v38  ;;  %v1201_v32 = vor.u32 %v1348_v27, %v1198_v28  ;;  %v283_v4 = vld [vmem:[#allocation2 + $0x18] sm:$0xff] }
  0x57   : > { %703 = vmatpush.bf16.msra.mxu2 %v1369_v39 }
  0x58   : > { %732 = vmatpush.bf16.msra.mxu3 %v1377_v40 }
  0x59   : > { %646 = vmatpush.bf16.msra.mxu0 %v1352_v41  ;;  %v280_v41 = vld [vmem:[#allocation2] sm:$0xff] }
  0x5a   : > { %675 = vmatpush.bf16.msra.mxu1 %v1360_v42 }
  0x5b   : > { %704 = vmatpush.bf16.msra.mxu2 %v1368_v43 }
  0x5c   : > { %733 = vmatpush.bf16.msra.mxu3 %v1376_v44 }
  0x5d   : > { %647 = vmatpush.bf16.msra.mxu0 %v1351_v45 }
  0x5e   : > { %676 = vmatpush.bf16.msra.mxu1 %v1359_v46 }
  0x5f   : > { %705 = vmatpush.bf16.msra.mxu2 %v1367_v47 }
  0x60   : > { %734 = vmatpush.bf16.msra.mxu3 %v1375_v48  ;;  %648 = vmatmul.bf16.vlgmr.msra.gmra.mxu0 %v1141_v57 }
  0x61   : > { %677 = vmatmul.bf16.vlgmr.msra.gmra.mxu1 %v1145_v58 }
  0x62   : > { %706 = vmatmul.bf16.vlgmr.msra.gmra.mxu2 %v1149_v59  ;;  %v282_v59 = vld [vmem:[#allocation2 + $0x10] sm:$0xff] }
  0x63   : > { %735 = vmatmul.bf16.vlgmr.msra.gmra.mxu3 %v1153_v60 }
  0x70   : > { %653 = vmatmul.bf16.gmra.mxu0 %v1157_v5 }
  0x71   : > { %682 = vmatmul.bf16.gmra.mxu1 %v1161_v6 }
  0x72   : > { %711 = vmatmul.bf16.gmra.mxu2 %v1165_v7 }
  0x73   : > { %740 = vmatmul.bf16.gmra.mxu3 %v1169_v8 }
  0x80   : > { %658 = vmatmul.bf16.gmra.mxu0 %v1173_v17 }
  0x81   : > { %687 = vmatmul.bf16.gmra.mxu1 %v1177_v18 }
  0x82   : > { %716 = vmatmul.bf16.gmra.mxu2 %v1181_v19 }
  0x83   : > { %745 = vmatmul.bf16.gmra.mxu3 %v1185_v20  ;;  %v285_v20 = vld [vmem:[#allocation2 + $0x28] sm:$0xff] }
  0x90   : > { %663 = vmatmul.bf16.gmra.mxu0 %v1189_v29  ;;  %v286_v29 = vld [vmem:[#allocation2 + $0x30] sm:$0xff] }
  0x91   : > { %692 = vmatmul.bf16.gmra.mxu1 %v1193_v30 }
  0x92   : > { %721 = vmatmul.bf16.gmra.mxu2 %v1197_v31 }
  0x93   : > { %750 = vmatmul.bf16.gmra.mxu3 %v1201_v32 }
  0xdd   : > { %v649_v33 = vpop.f32.mrf.mxu0 }
  0xde   : > { %v678_v34 = vpop.f32.mrf.mxu1 }
  0xdf   : > { %v679_v35 = vadd.f32 %v678_v34, %v649_v33 }
  0xe5   : > { %v707_v36 = vpop.f32.mrf.mxu2  ;;  %v651_v39 = vpop.f32.mrf.mxu0 }
  0xe6   : > { %v736_v37 = vpop.f32.mrf.mxu3  ;;  %v708_v38 = vadd.f32 %v707_v36, %v679_v35  ;;  %v680_v40 = vpop.f32.mrf.mxu1 }
  0xe7   : > { %v681_v44 = vadd.f32 %v680_v40, %v651_v39 }
  0xe8   : > { %v737_v42 = vadd.f32 %v736_v37, %v708_v38  ;;  %v287_v37 = vld [vmem:[#allocation2 + $0x38] sm:$0xff] }
  0xea   : > { %v756_v43 = vadd.f32 %v737_v42, %v280_v41 }
  0xec   : > { %765 = vst.msk [vmem:[#allocation2] sm:$0xff] %vm764_vm1, %v756_v43 }
  0xed   : > { %v709_v45 = vpop.f32.mrf.mxu2  ;;  %v654_v48 = vpop.f32.mrf.mxu0 }
  0xee   : > { %v738_v46 = vpop.f32.mrf.mxu3  ;;  %v710_v47 = vadd.f32 %v709_v45, %v681_v44  ;;  %v683_v49 = vpop.f32.mrf.mxu1 }
  0xef   : > { %v684_v53 = vadd.f32 %v683_v49, %v654_v48 }
  0xf0   : > { %v739_v51 = vadd.f32 %v738_v46, %v710_v47 }
  0xf2   : > { %v757_v52 = vadd.f32 %v739_v51, %v281_v50 }
  0xf4   : > { %766 = vst.msk [vmem:[#allocation2 + $0x8] sm:$0xff] %vm764_vm1, %v757_v52 }
  0xf5   : > { %v712_v54 = vpop.f32.mrf.mxu2  ;;  %v656_v57 = vpop.f32.mrf.mxu0 }
  0xf6   : > { %v741_v55 = vpop.f32.mrf.mxu3  ;;  %v713_v56 = vadd.f32 %v712_v54, %v684_v53  ;;  %v685_v58 = vpop.f32.mrf.mxu1 }
  0xf7   : > { %v686_v62 = vadd.f32 %v685_v58, %v656_v57 }
  0xf8   : > { %v742_v60 = vadd.f32 %v741_v55, %v713_v56 }
  0xfa   : > { %v758_v61 = vadd.f32 %v742_v60, %v282_v59 }
  0xfc   : > { %767 = vst.msk [vmem:[#allocation2 + $0x10] sm:$0xff] %vm764_vm1, %v758_v61 }
  0xfd   : > { %v714_v63 = vpop.f32.mrf.mxu2  ;;  %v659_v2 = vpop.f32.mrf.mxu0 }
  0xfe   : > { %v743_v0 = vpop.f32.mrf.mxu3  ;;  %v715_v1 = vadd.f32 %v714_v63, %v686_v62  ;;  %v688_v3 = vpop.f32.mrf.mxu1 }
  0xff   : > { %v689_v7 = vadd.f32 %v688_v3, %v659_v2 }
 0x100   : > { %v744_v5 = vadd.f32 %v743_v0, %v715_v1 }
 0x102   : > { %v759_v6 = vadd.f32 %v744_v5, %v283_v4 }
 0x104   : > { %768 = vst.msk [vmem:[#allocation2 + $0x18] sm:$0xff] %vm764_vm1, %v759_v6 }
 0x105   : > { %v717_v8 = vpop.f32.mrf.mxu2  ;;  %v661_v11 = vpop.f32.mrf.mxu0 }
 0x106   : > { %v746_v9 = vpop.f32.mrf.mxu3  ;;  %v718_v10 = vadd.f32 %v717_v8, %v689_v7  ;;  %v690_v12 = vpop.f32.mrf.mxu1 }
 0x107   : > { %v691_v16 = vadd.f32 %v690_v12, %v661_v11 }
 0x108   : > { %v747_v14 = vadd.f32 %v746_v9, %v718_v10 }
 0x10a   : > { %v760_v15 = vadd.f32 %v747_v14, %v284_v13 }
 0x10c   : > { %769 = vst.msk [vmem:[#allocation2 + $0x20] sm:$0xff] %vm764_vm1, %v760_v15 }
 0x10d   : > { %v719_v17 = vpop.f32.mrf.mxu2  ;;  %v664_v21 = vpop.f32.mrf.mxu0 }
 0x10e   : > { %v748_v18 = vpop.f32.mrf.mxu3  ;;  %v720_v19 = vadd.f32 %v719_v17, %v691_v16  ;;  %v693_v22 = vpop.f32.mrf.mxu1 }
 0x10f   : > { %v694_v25 = vadd.f32 %v693_v22, %v664_v21 }
 0x110   : > { %v749_v23 = vadd.f32 %v748_v18, %v720_v19 }
 0x112   : > { %v761_v24 = vadd.f32 %v749_v23, %v285_v20 }
 0x114   : > { %770 = vst.msk [vmem:[#allocation2 + $0x28] sm:$0xff] %vm764_vm1, %v761_v24 }
 0x115   : > { %v722_v26 = vpop.f32.mrf.mxu2  ;;  %v666_v31 = vpop.f32.mrf.mxu0 }
 0x116   : > { %v751_v27 = vpop.f32.mrf.mxu3  ;;  %v723_v28 = vadd.f32 %v722_v26, %v694_v25  ;;  %v695_v32 = vpop.f32.mrf.mxu1 }
 0x117   : > { %v696_v34 = vadd.f32 %v695_v32, %v666_v31 }
 0x118   : > { %v752_v30 = vadd.f32 %v751_v27, %v723_v28 }
 0x11a   : > { %v762_v33 = vadd.f32 %v752_v30, %v286_v29 }
 0x11c   : > { %771 = vst.msk [vmem:[#allocation2 + $0x30] sm:$0xff] %vm764_vm1, %v762_v33 }
 0x11d   : > { %v724_v35 = vpop.f32.mrf.mxu2 }
 0x11e   : > { %v725_v36 = vadd.f32 %v724_v35, %v696_v34  ;;  %v753_v38 = vpop.f32.mrf.mxu3 }
 0x120   : > { %v754_v39 = vadd.f32 %v753_v38, %v725_v36  ;;  %776 = sbr.rel (%p1330_p13) target bundleno = 590 (0x24e), region = 59 }
 0x122   : > { %v763_v40 = vadd.f32 %v754_v39, %v287_v37 }
 0x124   : > { %772 = vst.msk [vmem:[#allocation2 + $0x38] sm:$0xff] %vm764_vm1, %v763_v40 }
 0x125   : > { %v781_v41 = vld [vmem:[#allocation2 + $0x20] sm:$0xff]  ;;  %v779_v42 = vld [vmem:[#allocation2 + $0x10] sm:$0xff]  ;;  %v782_v47 = vld [vmem:[#allocation2 + $0x28] sm:$0xff]  ;;  %v1516_v57 = vmov 25.0   ;;  %vm1000_vm5 = vcmask 199680  }
 0x126   : > { %v777_v43 = vld [vmem:[#allocation2] sm:$0xff]  ;;  %v797_v44 = vsel %vm764_vm1, %v781_v41, 0.0  ;;  %v791_v45 = vsel %vm764_vm1, %v779_v42, 0.0  ;;  %v780_v48 = vld [vmem:[#allocation2 + $0x18] sm:$0xff]  ;;  %v778_v49 = vld [vmem:[#allocation2 + $0x8] sm:$0xff]  ;;  %v800_v50 = vsel %vm764_vm1, %v782_v47, 0.0  ;;  %1441 = vrcp.f32 %v1516_v57 }
 0x127   : > { %v785_v46 = vsel %vm764_vm1, %v777_v43, 0.0  ;;  %798 = vadd.xlane.f32.xlu2 %v797_v44  ;;  %792 = vadd.xlane.f32.xlu1 %v791_v45  ;;  %v794_v51 = vsel %vm764_vm1, %v780_v48, 0.0  ;;  %v788_v52 = vsel %vm764_vm1, %v778_v49, 0.0  ;;  %v783_v54 = vld [vmem:[#allocation2 + $0x30] sm:$0xff] }
 0x128   : > { %786 = vadd.xlane.f32.xlu0 %v785_v46  ;;  %v803_v56 = vsel %vm764_vm1, %v783_v54, 0.0 }
 0x12b   : > { %v784_v53 = vld [vmem:[#allocation2 + $0x38] sm:$0xff] }
 0x12c   : > { %v806_v55 = vsel %vm764_vm1, %v784_v53, 0.0  ;;  %v1442_v58 = vpop.eup %1441 }
 0x12d   : > { %v810_v59 = vmul.f32 25.0, %v1442_v58  ;;  %vm814_vm2 = vweird.f32 %v1442_v58 }
 0x12f   : > { %801 = vadd.xlane.f32.xlu2 %v800_v50  ;;  %795 = vadd.xlane.f32.xlu1 %v794_v51  ;;  %v811_v60 = vsub.f32 1.0, %v810_v59 }
 0x130   : > { %789 = vadd.xlane.f32.xlu0 %v788_v52 }
 0x131   : > { %v812_v61 = vmul.f32 %v1442_v58, %v811_v60 }
 0x133   : > { %v813_v62 = vadd.f32 %v1442_v58, %v812_v61 }
 0x135   : > { %v1707_v63 = vsel %vm814_vm2, %v1442_v58, %v813_v62 }
 0x137   : > { %807 = vadd.xlane.f32.xlu1 %v806_v55 }
 0x138   : > { %804 = vadd.xlane.f32.xlu0 %v803_v56 }
 0x19a   : > { %v799_v0 = vpop.xlane.xlu2 %798  ;;  %v793_v1 = vpop.xlane.xlu1 %792 }
 0x19b   : > { %v818_v2 = vmul.f32 %v1707_v63, %v793_v1  ;;  %v787_v3 = vpop.xlane.xlu0 %786  ;;  %v820_v16 = vmul.f32 %v1707_v63, %v799_v0 }
 0x19c   : > { %v816_v4 = vmul.f32 %v1707_v63, %v787_v3 }
 0x19d   : > { %v1711_v5 = vsub.f32 %v779_v42, %v818_v2  ;;  %v1735_v23 = vsub.f32 %v781_v41, %v820_v16 }
 0x19e   : > { %v1713_v6 = vsub.f32 %v777_v43, %v816_v4 }
 0x19f   : > { %v834_v7 = vmul.f32 %v1711_v5, %v1711_v5  ;;  %v836_v32 = vmul.f32 %v1735_v23, %v1735_v23 }
 0x1a0   : > { %v832_v8 = vmul.f32 %v1713_v6, %v1713_v6 }
 0x1a1   : > { %v846_v9 = vsel %vm764_vm1, %v834_v7, 0.0  ;;  %v852_v35 = vsel %vm764_vm1, %v836_v32, 0.0 }
 0x1a2   : > { %v802_v10 = vpop.xlane.xlu2 %801  ;;  %847 = vadd.xlane.f32.xlu1 %v846_v9  ;;  %v796_v11 = vpop.xlane.xlu1 %795  ;;  %v840_v12 = vsel %vm764_vm1, %v832_v8, 0.0 }
 0x1a3   : > { %v821_v13 = vmul.f32 %v1707_v63, %v802_v10  ;;  %v819_v14 = vmul.f32 %v1707_v63, %v796_v11  ;;  %841 = vadd.xlane.f32.xlu2 %v840_v12  ;;  %v790_v15 = vpop.xlane.xlu0 %789 }
 0x1a4   : > { %v817_v17 = vmul.f32 %v1707_v63, %v790_v15 }
 0x1a5   : > { %v1725_v18 = vsub.f32 %v782_v47, %v821_v13  ;;  %v1727_v19 = vsub.f32 %v780_v48, %v819_v14 }
 0x1a6   : > { %v1729_v20 = vsub.f32 %v778_v49, %v817_v17 }
 0x1a7   : > { %v837_v21 = vmul.f32 %v1725_v18, %v1725_v18  ;;  %v835_v22 = vmul.f32 %v1727_v19, %v1727_v19 }
 0x1a8   : > { %v833_v24 = vmul.f32 %v1729_v20, %v1729_v20 }
 0x1a9   : > { %v855_v25 = vsel %vm764_vm1, %v837_v21, 0.0  ;;  %v849_v26 = vsel %vm764_vm1, %v835_v22, 0.0 }
 0x1aa   : > { %856 = vadd.xlane.f32.xlu1 %v855_v25  ;;  %v843_v27 = vsel %vm764_vm1, %v833_v24, 0.0  ;;  %v808_v28 = vpop.xlane.xlu1 %807 }
 0x1ab   : > { %850 = vadd.xlane.f32.xlu2 %v849_v26  ;;  %844 = vadd.xlane.f32.xlu0 %v843_v27  ;;  %v805_v29 = vpop.xlane.xlu0 %804  ;;  %v823_v31 = vmul.f32 %v1707_v63, %v808_v28 }
 0x1ac   : > { %v822_v30 = vmul.f32 %v1707_v63, %v805_v29 }
 0x1ad   : > { %v1748_v34 = vsub.f32 %v784_v53, %v823_v31 }
 0x1ae   : > { %v1746_v33 = vsub.f32 %v783_v54, %v822_v30 }
 0x1af   : > { %v839_v38 = vmul.f32 %v1748_v34, %v1748_v34 }
 0x1b0   : > { %v838_v36 = vmul.f32 %v1746_v33, %v1746_v33 }
 0x1b1   : > { %v861_v39 = vsel %vm764_vm1, %v839_v38, 0.0 }
 0x1b2   : > { %v858_v37 = vsel %vm764_vm1, %v838_v36, 0.0 }
 0x1b3   : > { %853 = vadd.xlane.f32.xlu0 %v852_v35  ;;  %859 = vadd.xlane.f32.xlu2 %v858_v37 }
 0x1bb   : > { %862 = vadd.xlane.f32.xlu0 %v861_v39 }
 0x215   : > { %v848_v40 = vpop.xlane.xlu1 %847 }
 0x216   : > { %v866_v41 = vmul.f32 %v848_v40, %v1707_v63  ;;  %v842_v42 = vpop.xlane.xlu2 %841 }
 0x217   : > { %v864_v43 = vmul.f32 %v842_v42, %v1707_v63 }
 0x218   : > { %v874_v44 = vadd.f32 1e-05, %v866_v41 }
 0x219   : > { %v872_v45 = vadd.f32 1e-05, %v864_v43 }
 0x21a   : > { %1443 = vrsqrt.f32 %v874_v44  ;;  %vm906_vm3 = vweird.f32 %v874_v44 }
 0x21b   : > { %1445 = vrsqrt.f32 %v872_v45  ;;  %vm886_vm6 = vweird.f32 %v872_v45 }
 0x21d   : > { %v857_v46 = vpop.xlane.xlu1 %856 }
 0x21e   : > { %v869_v47 = vmul.f32 %v857_v46, %v1707_v63  ;;  %v851_v48 = vpop.xlane.xlu2 %850  ;;  %v845_v49 = vpop.xlane.xlu0 %844 }
 0x21f   : > { %v867_v50 = vmul.f32 %v851_v48, %v1707_v63  ;;  %v865_v51 = vmul.f32 %v845_v49, %v1707_v63 }
 0x220   : > { %v1444_v52 = vpop.eup %1443  ;;  %v877_v53 = vadd.f32 1e-05, %v869_v47 }
 0x221   : > { %v1446_v54 = vpop.eup %1445  ;;  %v901_v55 = vmul.f32 %v1444_v52, %v874_v44  ;;  %v1762_v56 = vadd.f32 1e-05, %v867_v50  ;;  %v1764_v57 = vadd.f32 1e-05, %v865_v51  ;;  %vm907_vm4 = vweird.f32 %v1444_v52 }
 0x222   : > { %v881_v58 = vmul.f32 %v1446_v54, %v872_v45  ;;  %1447 = vrsqrt.f32 %v877_v53  ;;  %vm887_vm7 = vweird.f32 %v1446_v54  ;;  %vm936_vm8 = vweird.f32 %v877_v53  ;;  %vm908_vm9 = vmor %vm906_vm3, %vm907_vm4 }
 0x223   : > { %v902_v59 = vmul.f32 %v1444_v52, %v901_v55  ;;  %1449 = vrsqrt.f32 %v1762_v56  ;;  %vm916_vm10 = vweird.f32 %v1762_v56  ;;  %vm888_vm11 = vmor %vm886_vm6, %vm887_vm7  ;;  %vm896_vm3 = vweird.f32 %v1764_v57 }
 0x224   : > { %v882_v60 = vmul.f32 %v1446_v54, %v881_v58  ;;  %1451 = vrsqrt.f32 %v1764_v57 }
 0x225   : > { %v903_v61 = vmul.f32 0.5, %v902_v59 }
 0x226   : > { %v883_v62 = vmul.f32 0.5, %v882_v60  ;;  %v860_v0 = vpop.xlane.xlu2 %859  ;;  %v854_v1 = vpop.xlane.xlu0 %853 }
 0x227   : > { %v904_v2 = vsub.f32 1.5, %v903_v61  ;;  %v870_v3 = vmul.f32 %v860_v0, %v1707_v63  ;;  %v868_v4 = vmul.f32 %v854_v1, %v1707_v63 }
 0x228   : > { %v1448_v7 = vpop.eup %1447  ;;  %v884_v8 = vsub.f32 1.5, %v883_v62 }
 0x229   : > { %v1450_v9 = vpop.eup %1449  ;;  %v905_v10 = vmul.f32 %v1444_v52, %v904_v2  ;;  %v931_v11 = vmul.f32 %v1448_v7, %v877_v53  ;;  %v1770_v12 = vadd.f32 1e-05, %v870_v3  ;;  %v1775_v16 = vadd.f32 1e-05, %v868_v4 }
 0x22a   : > { %v1452_v13 = vpop.eup %1451  ;;  %v885_v14 = vmul.f32 %v1446_v54, %v884_v8  ;;  %v911_v15 = vmul.f32 %v1450_v9, %v1762_v56  ;;  %vm937_vm12 = vweird.f32 %v1448_v7  ;;  %vm917_vm13 = vweird.f32 %v1450_v9 }
 0x22b   : > { %v909_v17 = vsel %vm908_vm9, %v1444_v52, %v905_v10  ;;  %v932_v21 = vmul.f32 %v1448_v7, %v931_v11  ;;  %v891_v22 = vmul.f32 %v1452_v13, %v1764_v57  ;;  %1453 = vrsqrt.f32 %v1770_v12  ;;  %vm1784_vm0 = vmor %vm936_vm8, %vm937_vm12 }
 0x22c   : > { %v962_v24 = vmul.f32 %v909_v17, %v1711_v5  ;;  %v889_v25 = vsel %vm888_vm11, %v1446_v54, %v885_v14  ;;  %v912_v26 = vmul.f32 %v1450_v9, %v911_v15  ;;  %1455 = vrsqrt.f32 %v1775_v16  ;;  %vm918_vm2 = vmor %vm916_vm10, %vm917_vm13 }
 0x22d   : > { %v960_v27 = vmul.f32 %v889_v25, %v1713_v6  ;;  %v933_v28 = vmul.f32 0.5, %v932_v21  ;;  %v892_v29 = vmul.f32 %v1452_v13, %v891_v22  ;;  %vm897_vm1 = vweird.f32 %v1452_v13 }
 0x22e   : > { %vm970_vm14 = vcmp.ge.f32.partialorder %v962_v24, 0.0  ;;  %v978_v30 = vmul.f32 0.2, %v962_v24  ;;  %v913_v31 = vmul.f32 0.5, %v912_v26  ;;  %v863_v32 = vpop.xlane.xlu0 %862  ;;  %vm898_vm4 = vmor %vm896_vm3, %vm897_vm1  ;;  %vm946_vm7 = vweird.f32 %v1770_v12 }
 0x22f   : > { %vm968_vm15 = vcmp.ge.f32.partialorder %v960_v27, 0.0  ;;  %v976_v35 = vmul.f32 0.2, %v960_v27  ;;  %v934_v36 = vsub.f32 1.5, %v933_v28  ;;  %v893_v5 = vmul.f32 0.5, %v892_v29 }
 0x230   : > { %v986_v37 = vsel %vm970_vm14, %v962_v24, %v978_v30  ;;  %v914_v6 = vsub.f32 1.5, %v913_v31  ;;  %v871_v39 = vmul.f32 %v863_v32, %v1707_v63  ;;  %vm926_vm13 = vweird.f32 %v1775_v16 }
 0x231   : > { %v994_v40 = vpack.c.bf16 %v986_v37, %v986_v37  ;;  %v984_v41 = vsel %vm968_vm15, %v960_v27, %v976_v35  ;;  %v935_v42 = vmul.f32 %v1448_v7, %v934_v36  ;;  %v894_v43 = vsub.f32 1.5, %v893_v5  ;;  %v1454_v44 = vpop.eup %1453 }
 0x232   : > { %v992_v45 = vpack.c.bf16 %v984_v41, %v984_v41  ;;  %v915_v46 = vmul.f32 %v1450_v9, %v914_v6  ;;  %v1789_v47 = vadd.f32 1e-05, %v871_v39  ;;  %v941_v49 = vmul.f32 %v1454_v44, %v1770_v12  ;;  %v1456_v50 = vpop.eup %1455 }
 0x233   : > { %1003 = vst.msk [vmem:[%s1616_s8 + $0x8] sm:$0xf] %vm1000_vm5, %v994_v40  ;;  %v939_v48 = vsel %vm1784_vm0, %v1448_v7, %v935_v42  ;;  %v895_v63 = vmul.f32 %v1452_v13, %v894_v43  ;;  %v921_v56 = vmul.f32 %v1456_v50, %v1775_v16  ;;  %vm947_vm10 = vweird.f32 %v1454_v44 }
 0x234   : > { %1001 = vst.msk [vmem:[%s1616_s8] sm:$0xf] %vm1000_vm5, %v992_v45  ;;  %v965_v51 = vmul.f32 %v939_v48, %v1725_v18  ;;  %v919_v52 = vsel %vm918_vm2, %v1450_v9, %v915_v46  ;;  %1457 = vrsqrt.f32 %v1789_v47  ;;  %v942_v55 = vmul.f32 %v1454_v44, %v941_v49  ;;  %vm948_vm12 = vmor %vm946_vm7, %vm947_vm10 }
 0x235   : > { %v963_v53 = vmul.f32 %v919_v52, %v1727_v19  ;;  %v899_v54 = vsel %vm898_vm4, %v1452_v13, %v895_v63  ;;  %v922_v60 = vmul.f32 %v1456_v50, %v921_v56  ;;  %vm927_vm11 = vweird.f32 %v1456_v50 }
 0x236   : > { %vm973_vm6 = vcmp.ge.f32.partialorder %v965_v51, 0.0  ;;  %v981_v57 = vmul.f32 0.2, %v965_v51  ;;  %v961_v58 = vmul.f32 %v899_v54, %v1729_v20  ;;  %v943_v59 = vmul.f32 0.5, %v942_v55  ;;  %vm928_vm14 = vmor %vm926_vm13, %vm927_vm11 }
 0x237   : > { %vm971_vm8 = vcmp.ge.f32.partialorder %v963_v53, 0.0  ;;  %v979_v18 = vmul.f32 0.2, %v963_v53  ;;  %v923_v2 = vmul.f32 0.5, %v922_v60  ;;  %vm956_vm2 = vweird.f32 %v1789_v47 }
 0x238   : > { %v989_v61 = vsel %vm973_vm6, %v965_v51, %v981_v57  ;;  %vm969_vm9 = vcmp.ge.f32.partialorder %v961_v58, 0.0  ;;  %v977_v62 = vmul.f32 0.2, %v961_v58  ;;  %v944_v1 = vsub.f32 1.5, %v943_v59 }
 0x239   : > { %v997_v19 = vpack.c.bf16 %v989_v61, %v989_v61  ;;  %v987_v0 = vsel %vm971_vm8, %v963_v53, %v979_v18  ;;  %v924_v9 = vsub.f32 1.5, %v923_v2 }
 0x23a   : > { %v1458_v3 = vpop.eup %1457  ;;  %v995_v4 = vpack.c.bf16 %v987_v0, %v987_v0  ;;  %v985_v20 = vsel %vm969_vm9, %v961_v58, %v977_v62  ;;  %v945_v8 = vmul.f32 %v1454_v44, %v944_v1 }
 0x23b   : > { %1006 = vst.msk [vmem:[%s1616_s8 + $0x14] sm:$0xf] %vm1000_vm5, %v997_v19  ;;  %v993_v7 = vpack.c.bf16 %v985_v20, %v985_v20  ;;  %v951_v10 = vmul.f32 %v1458_v3, %v1789_v47  ;;  %v925_v13 = vmul.f32 %v1456_v50, %v924_v9  ;;  %vm957_vm0 = vweird.f32 %v1458_v3 }
 0x23c   : > { %1004 = vst.msk [vmem:[%s1616_s8 + $0xc] sm:$0xf] %vm1000_vm5, %v995_v4  ;;  %v949_v11 = vsel %vm948_vm12, %v1454_v44, %v945_v8  ;;  %vm958_vm3 = vmor %vm956_vm2, %vm957_vm0 }
 0x23d   : > { %1002 = vst.msk [vmem:[%s1616_s8 + $0x4] sm:$0xf] %vm1000_vm5, %v993_v7  ;;  %v952_v14 = vmul.f32 %v1458_v3, %v951_v10  ;;  %v966_v15 = vmul.f32 %v949_v11, %v1746_v33  ;;  %v929_v17 = vsel %vm928_vm14, %v1456_v50, %v925_v13 }
 0x23e   : > { %v964_v24 = vmul.f32 %v929_v17, %v1735_v23 }
 0x23f   : > { %v953_v21 = vmul.f32 0.5, %v952_v14  ;;  %vm974_vm15 = vcmp.ge.f32.partialorder %v966_v15, 0.0  ;;  %v982_v22 = vmul.f32 0.2, %v966_v15 }
 0x240   : > { %vm972_vm1 = vcmp.ge.f32.partialorder %v964_v24, 0.0  ;;  %v980_v26 = vmul.f32 0.2, %v964_v24 }
 0x241   : > { %v954_v12 = vsub.f32 1.5, %v953_v21  ;;  %v990_v25 = vsel %vm974_vm15, %v966_v15, %v982_v22 }
 0x242   : > { %v998_v27 = vpack.c.bf16 %v990_v25, %v990_v25  ;;  %v988_v33 = vsel %vm972_vm1, %v964_v24, %v980_v26 }
 0x243   : > { %v955_v16 = vmul.f32 %v1458_v3, %v954_v12  ;;  %v996_v28 = vpack.c.bf16 %v988_v33, %v988_v33 }
 0x244   : > { %1007 = vst.msk [vmem:[%s1616_s8 + $0x18] sm:$0xf] %vm1000_vm5, %v998_v27 }
 0x245   : > { %v959_v29 = vsel %vm958_vm3, %v1458_v3, %v955_v16  ;;  %1005 = vst.msk [vmem:[%s1616_s8 + $0x10] sm:$0xf] %vm1000_vm5, %v996_v28 }
 0x246   : > { %v967_v30 = vmul.f32 %v959_v29, %v1748_v34 }
 0x248   : > { %vm975_vm4 = vcmp.ge.f32.partialorder %v967_v30, 0.0  ;;  %v983_v23 = vmul.f32 0.2, %v967_v30 }
 0x24a   : > { %v991_v31 = vsel %vm975_vm4, %v967_v30, %v983_v23 }
 0x24b   : > { %v999_v32 = vpack.c.bf16 %v991_v31, %v991_v31 }
 0x24d   : > { %1008 = vst.msk [vmem:[%s1616_s8 + $0x1c] sm:$0xf] %vm1000_vm5, %v999_v32 }
 0x24e PF: > { %s12_s15 = sadd.s32 1, %s1513_s15   ;;  %s1856_s9 = smov %s1493_s10 }
 0x24f   : > { %p9_p0 = scmp.ge.s32.totalorder %s12_s15, 6   ;;  %s1857_s10 = smov %s1581_s20 }
 0x250   : > { %s1858_s11 = smov %s1505_s13  ;;  %s1859_s12 = smov %s1509_s14 }
 0x251   : > { %s1860_s13 = smov %s1863_s16  ;;  %s1861_s14 = smov %s1867_s17 }
 0x252   :  { %11 = sbr.rel (!%p9_p0) target bundleno = 4 (0x4), region = 97 }

// kernel: _lambda_.9
= control target key start
LH: loop header
LB: loop body
LE: loop exit
PB: predicated region body
PF: predicated region fallthrough
CT: control target
= control target key end

     0   :  { %s2092_s9 = smov 0   ;;  %s2094_s10 = smov 0   ;;  %s2815_s0 = inlined_call_operand.vmem [shape: bf16[2,2048,9], index: 0, kind: input, shape index: {}]   ;;  %s2816_s1 = inlined_call_operand.vmem [shape: bf16[128,2048], index: 1, kind: input, shape index: {}]   ;;  %s2817_s2 = inlined_call_operand.vmem [shape: bf16[2,128,9], index: 2, kind: output, shape index: {}]  }
   0x1   :  { %s2096_s11 = smov 0   ;;  %s2098_s12 = smov 0  }
   0x2   :  { %s2100_s13 = smov 0   ;;  %s2102_s14 = smov 0  }
   0x3   :  { %s2104_s15 = smov 0  }
   0x4 LB: > { %s24_s16 = sadd.s32 1, %s2065_s13  ;;  %s31_s17 = sadd.s32 1, %s2069_s14  ;;  %s2073_s15 = sphi %s2104_s15, %s12_s15   ;;  %s2069_s14 = sphi %s2102_s14, %s2823_s14   ;;  %s2065_s13 = sphi %s2100_s13, %s2822_s13   ;;  %s2061_s12 = sphi %s2098_s12, %s2821_s12   ;;  %s2057_s11 = sphi %s2096_s11, %s2820_s11   ;;  %s2053_s10 = sphi %s2094_s10, %s2819_s10   ;;  %s2049_s9 = sphi %s2092_s9, %s2818_s9  }
   0x5   : > { %p25_p0 = scmp.ge.s32.totalorder %s24_s16, 4  ;;  %s68_s18 = sadd.s32 1, %s2053_s10 }
   0x6   : > { %p75_p1 = scmp.ne.s32.totalorder %s2053_s10, %s2049_s9  ;;  %p76_p2 = scmp.eq.s32.totalorder %s2073_s15, 0 }
   0x7   : > { %s2825_s16 = smov (%p25_p0, %s24_s16), 0  ;;  %s2827_s17 = smov (!%p25_p0, %s31_s17), %s2069_s14 }
   0x8   : > { %s64_s19 = ssub.s32 %s2065_s13, %s2825_s16  ;;  %p77_p3 = por %p76_p2, %p75_p1 }
   0x9   : > { %p33_p4 = scmp.ge.s32.totalorder %s2827_s17, 2  ;;  %p66_p5 = scmp.eq.s32.totalorder %s64_s19, 0 }
   0xa   : > { %p1590_p6 = scmp.ge.s32.totalorder %s2073_s15, 8 }
   0xb   : > { %s2829_s17 = smov (%p33_p4, %s2827_s17), 0 }
   0xc   : > { %s2141_s20 = scalar_select %p66_p5, %s2053_s10, %s68_s18  }
   0xd   : > { %129 = sbr.rel (%p1590_p6) target bundleno = 54 (0x36), region = 16 }
  0x12   : > { %145 = sbr.rel (!%p77_p3) target bundleno = 54 (0x36), region = 24  ;;  %s147_s21 = sand.u32 (%p77_p3), 1, %s2053_s10  }
  0x13   : > { %s1861_s22 = sshll.u32 (%p77_p3), %s2065_s13, 4  ;;  %s1591_s23 = sshll.u32 (%p77_p3), %s147_s21, 8 }
  0x14   : > { %s2149_s26 = scalar_lea.vmem (%p77_p3), %s2816_s1, %s1861_s22  ;;  %s2154_s27 = scalar_lea.vmem (%p77_p3), [#allocation3], %s1591_s23 }
  0x15   : > { %v168_v0 = vld [vmem:[%s2149_s26] sm:$0xff] (%p77_p3)  ;;  %v170_v1 = vld [vmem:[%s2149_s26 + $0x8] sm:$0xff] (%p77_p3) }
  0x16   : > { %v172_v2 = vld [vmem:[%s2149_s26 + $0x40] sm:$0xff] (%p77_p3)  ;;  %169 = vst [vmem:[%s2154_s27] sm:$0xff] (%p77_p3), %v168_v0  ;;  %v174_v3 = vld [vmem:[%s2149_s26 + $0x48] sm:$0xff] (%p77_p3) }
  0x17   : > { %171 = vst [vmem:[%s2154_s27 + $0x8] sm:$0xff] %v170_v1  ;;  %v176_v4 = vld [vmem:[%s2149_s26 + $0x80] sm:$0xff]  ;;  %v178_v5 = vld [vmem:[%s2149_s26 + $0x88] sm:$0xff] }
  0x18   : > { %173 = vst [vmem:[%s2154_s27 + $0x10] sm:$0xff] %v172_v2  ;;  %v180_v6 = vld [vmem:[%s2149_s26 + $0xc0] sm:$0xff]  ;;  %v182_v7 = vld [vmem:[%s2149_s26 + $0xc8] sm:$0xff] }
  0x19   : > { %175 = vst [vmem:[%s2154_s27 + $0x18] sm:$0xff] %v174_v3  ;;  %v184_v8 = vld [vmem:[%s2149_s26 + $0x100] sm:$0xff]  ;;  %v186_v9 = vld [vmem:[%s2149_s26 + $0x108] sm:$0xff] }
  0x1a   : > { %177 = vst [vmem:[%s2154_s27 + $0x20] sm:$0xff] %v176_v4  ;;  %v188_v10 = vld [vmem:[%s2149_s26 + $0x140] sm:$0xff]  ;;  %v190_v11 = vld [vmem:[%s2149_s26 + $0x148] sm:$0xff] }
  0x1b   : > { %179 = vst [vmem:[%s2154_s27 + $0x28] sm:$0xff] %v178_v5  ;;  %v192_v12 = vld [vmem:[%s2149_s26 + $0x180] sm:$0xff]  ;;  %v194_v13 = vld [vmem:[%s2149_s26 + $0x188] sm:$0xff] }
  0x1c   : > { %181 = vst [vmem:[%s2154_s27 + $0x30] sm:$0xff] %v180_v6  ;;  %v196_v14 = vld [vmem:[%s2149_s26 + $0x1c0] sm:$0xff]  ;;  %v198_v15 = vld [vmem:[%s2149_s26 + $0x1c8] sm:$0xff] }
  0x1d   : > { %183 = vst [vmem:[%s2154_s27 + $0x38] sm:$0xff] %v182_v7  ;;  %v200_v16 = vld [vmem:[%s2149_s26 + $0x200] sm:$0xff]  ;;  %v202_v17 = vld [vmem:[%s2149_s26 + $0x208] sm:$0xff] }
  0x1e   : > { %185 = vst [vmem:[%s2154_s27 + $0x40] sm:$0xff] %v184_v8  ;;  %v204_v18 = vld [vmem:[%s2149_s26 + $0x240] sm:$0xff]  ;;  %v206_v19 = vld [vmem:[%s2149_s26 + $0x248] sm:$0xff] }
  0x1f   : > { %187 = vst [vmem:[%s2154_s27 + $0x48] sm:$0xff] %v186_v9  ;;  %v208_v20 = vld [vmem:[%s2149_s26 + $0x280] sm:$0xff]  ;;  %v210_v21 = vld [vmem:[%s2149_s26 + $0x288] sm:$0xff] }
  0x20   : > { %189 = vst [vmem:[%s2154_s27 + $0x50] sm:$0xff] %v188_v10  ;;  %v212_v22 = vld [vmem:[%s2149_s26 + $0x2c0] sm:$0xff]  ;;  %v214_v23 = vld [vmem:[%s2149_s26 + $0x2c8] sm:$0xff] }
  0x21   : > { %191 = vst [vmem:[%s2154_s27 + $0x58] sm:$0xff] %v190_v11  ;;  %v216_v24 = vld [vmem:[%s2149_s26 + $0x300] sm:$0xff]  ;;  %v218_v25 = vld [vmem:[%s2149_s26 + $0x308] sm:$0xff] }
  0x22   : > { %193 = vst [vmem:[%s2154_s27 + $0x60] sm:$0xff] %v192_v12  ;;  %v220_v26 = vld [vmem:[%s2149_s26 + $0x340] sm:$0xff]  ;;  %v222_v27 = vld [vmem:[%s2149_s26 + $0x348] sm:$0xff] }
  0x23   : > { %195 = vst [vmem:[%s2154_s27 + $0x68] sm:$0xff] %v194_v13  ;;  %v224_v28 = vld [vmem:[%s2149_s26 + $0x380] sm:$0xff]  ;;  %v226_v29 = vld [vmem:[%s2149_s26 + $0x388] sm:$0xff] }
  0x24   : > { %197 = vst [vmem:[%s2154_s27 + $0x70] sm:$0xff] %v196_v14  ;;  %v228_v30 = vld [vmem:[%s2149_s26 + $0x3c0] sm:$0xff]  ;;  %v230_v31 = vld [vmem:[%s2149_s26 + $0x3c8] sm:$0xff] }
  0x25   : > { %199 = vst [vmem:[%s2154_s27 + $0x78] sm:$0xff] %v198_v15 }
  0x26   : > { %201 = vst [vmem:[%s2154_s27 + $0x80] sm:$0xff] %v200_v16 }
  0x27   : > { %203 = vst [vmem:[%s2154_s27 + $0x88] sm:$0xff] %v202_v17 }
  0x28   : > { %205 = vst [vmem:[%s2154_s27 + $0x90] sm:$0xff] %v204_v18 }
  0x29   : > { %207 = vst [vmem:[%s2154_s27 + $0x98] sm:$0xff] %v206_v19 }
  0x2a   : > { %209 = vst [vmem:[%s2154_s27 + $0xa0] sm:$0xff] %v208_v20 }
  0x2b   : > { %211 = vst [vmem:[%s2154_s27 + $0xa8] sm:$0xff] %v210_v21 }
  0x2c   : > { %213 = vst [vmem:[%s2154_s27 + $0xb0] sm:$0xff] %v212_v22 }
  0x2d   : > { %215 = vst [vmem:[%s2154_s27 + $0xb8] sm:$0xff] %v214_v23 }
  0x2e   : > { %217 = vst [vmem:[%s2154_s27 + $0xc0] sm:$0xff] %v216_v24 }
  0x2f   : > { %219 = vst [vmem:[%s2154_s27 + $0xc8] sm:$0xff] %v218_v25 }
  0x30   : > { %221 = vst [vmem:[%s2154_s27 + $0xd0] sm:$0xff] %v220_v26 }
  0x31   : > { %223 = vst [vmem:[%s2154_s27 + $0xd8] sm:$0xff] %v222_v27 }
  0x32   : > { %225 = vst [vmem:[%s2154_s27 + $0xe0] sm:$0xff] %v224_v28 }
  0x33   : > { %227 = vst [vmem:[%s2154_s27 + $0xe8] sm:$0xff] %v226_v29 }
  0x34   : > { %229 = vst [vmem:[%s2154_s27 + $0xf0] sm:$0xff] %v228_v30 }
  0x35   : > { %231 = vst [vmem:[%s2154_s27 + $0xf8] sm:$0xff] %v230_v31 }
  0x36 PF: > { %p1594_p7 = scmp.ge.s32.totalorder %s2073_s15, 1  ;;  %p236_p8 = scmp.lt.s32.totalorder %s2073_s15, 9 }
  0x38   : > { %p237_p9 = pnand %p1594_p7, %p236_p8 }
  0x39   : > { %s243_s28 = sand.u32 (!%p237_p9), 1, %s2049_s9   ;;  %s1596_s29 = sshll.u32 (!%p237_p9), %s2057_s11, 6 }
  0x3a   : > { %240 = sbr.rel (%p237_p9) target bundleno = 705 (0x2c1), region = 47  ;;  %s1595_s30 = sshll.u32 (!%p237_p9), %s243_s28, 8 }
  0x3b   : > { %p278_p10 = scmp.lt.s32.totalorder (!%p237_p9), %s2061_s12, 1  ;;  %p280_p11 = scmp.lt.s32.totalorder (!%p237_p9), %s1596_s29, 255 }
  0x3c   : > { %s2233_s9 = scalar_lea.vmem (!%p237_p9), [#allocation3], %s1595_s30  ;;  %p1601_p12 = scmp.ne.s32.totalorder (!%p237_p9), %s2057_s11, 0 }
  0x3f   : > { %s2831_s12 = smov (!%p278_p10, %s2061_s12), 1  ;;  %s2833_s29 = smov (!%p280_p11, %s1596_s29), 255 }
  0x40   : > { %s1597_s3 = sshll.u32 %s2831_s12, 8  ;;  %s1862_s4 = sshll.u32 %s2831_s12, 6 }
  0x41   : > { %s283_s5 = sadd.s32 %s1597_s3, %s2833_s29  ;;  %s2226_s8 = scalar_lea.vmem %s2817_s2, %s1862_s4 }
  0x42   : > { %s1598_s18 = sshll.u32 %s283_s5, 2  ;;  %302 = sbr.rel (%p1601_p12) target bundleno = 88 (0x58), region = 55 }
  0x43   : > { %s2231_s22 = scalar_lea.vmem %s2815_s0, %s1598_s18 }
  0x47   : > { %vm303_vm0 = vcmask 72704   ;;  %v2075_v32 = vmov 0.0  }
  0x48   : > { %304 = vst.msk [vmem:[#allocation2] sm:$0xff] %vm303_vm0, %v2075_v32 }
  0x49   : > { %305 = vst.msk [vmem:[#allocation2 + $0x8] sm:$0xff] %vm303_vm0, %v2075_v32 }
  0x4a   : > { %306 = vst.msk [vmem:[#allocation2 + $0x10] sm:$0xff] %vm303_vm0, %v2075_v32 }
  0x4b   : > { %307 = vst.msk [vmem:[#allocation2 + $0x18] sm:$0xff] %vm303_vm0, %v2075_v32 }
  0x4c   : > { %308 = vst.msk [vmem:[#allocation2 + $0x20] sm:$0xff] %vm303_vm0, %v2075_v32 }
  0x4d   : > { %309 = vst.msk [vmem:[#allocation2 + $0x28] sm:$0xff] %vm303_vm0, %v2075_v32 }
  0x4e   : > { %310 = vst.msk [vmem:[#allocation2 + $0x30] sm:$0xff] %vm303_vm0, %v2075_v32 }
  0x4f   : > { %311 = vst.msk [vmem:[#allocation2 + $0x38] sm:$0xff] %vm303_vm0, %v2075_v32 }
  0x50   : > { %312 = vst.msk [vmem:[#allocation2 + $0x40] sm:$0xff] %vm303_vm0, %v2075_v32 }
  0x51   : > { %313 = vst.msk [vmem:[#allocation2 + $0x48] sm:$0xff] %vm303_vm0, %v2075_v32 }
  0x52   : > { %314 = vst.msk [vmem:[#allocation2 + $0x50] sm:$0xff] %vm303_vm0, %v2075_v32 }
  0x53   : > { %315 = vst.msk [vmem:[#allocation2 + $0x58] sm:$0xff] %vm303_vm0, %v2075_v32 }
  0x54   : > { %316 = vst.msk [vmem:[#allocation2 + $0x60] sm:$0xff] %vm303_vm0, %v2075_v32 }
  0x55   : > { %317 = vst.msk [vmem:[#allocation2 + $0x68] sm:$0xff] %vm303_vm0, %v2075_v32 }
  0x56   : > { %318 = vst.msk [vmem:[#allocation2 + $0x70] sm:$0xff] %vm303_vm0, %v2075_v32 }
  0x57   : > { %319 = vst.msk [vmem:[#allocation2 + $0x78] sm:$0xff] %vm303_vm0, %v2075_v32 }
  0x58 PF: > { %v1902_v33 = vld [vmem:[%s2231_s22 + $0x38] sm:$0xff]  ;;  %v1901_v37 = vld [vmem:[%s2231_s22 + $0x30] sm:$0xff]  ;;  %v1900_v41 = vld [vmem:[%s2231_s22 + $0x28] sm:$0xff]  ;;  %vm996_vm1 = vcmask 72704   ;;  %p1858_p13 = scmp.ne.s32.totalorder %s2057_s11, 3 }
  0x59   : > { %v1910_v34 = vld [vmem:[%s2231_s22 + $0x78] sm:$0xff]  ;;  %784 = vmatpush.bf16.msra.mxu0 %v1902_v33  ;;  %v1909_v38 = vld [vmem:[%s2231_s22 + $0x70] sm:$0xff]  ;;  %v1908_v42 = vld [vmem:[%s2231_s22 + $0x68] sm:$0xff] }
  0x5a   : > { %v1918_v35 = vld [vmem:[%s2231_s22 + $0xb8] sm:$0xff]  ;;  %833 = vmatpush.bf16.msra.mxu1 %v1910_v34  ;;  %v1917_v39 = vld [vmem:[%s2231_s22 + $0xb0] sm:$0xff]  ;;  %v1916_v43 = vld [vmem:[%s2231_s22 + $0xa8] sm:$0xff] }
  0x5b   : > { %v1926_v36 = vld [vmem:[%s2231_s22 + $0xf8] sm:$0xff]  ;;  %882 = vmatpush.bf16.msra.mxu2 %v1918_v35  ;;  %v1925_v40 = vld [vmem:[%s2231_s22 + $0xf0] sm:$0xff]  ;;  %v1924_v44 = vld [vmem:[%s2231_s22 + $0xe8] sm:$0xff] }
  0x5c   : > { %931 = vmatpush.bf16.msra.mxu3 %v1926_v36  ;;  %v1899_v45 = vld [vmem:[%s2231_s22 + $0x20] sm:$0xff]  ;;  %v1898_v49 = vld [vmem:[%s2231_s22 + $0x18] sm:$0xff]  ;;  %v1897_v53 = vld [vmem:[%s2231_s22 + $0x10] sm:$0xff] }
  0x5d   : > { %785 = vmatpush.bf16.msra.mxu0 %v1901_v37  ;;  %v1907_v46 = vld [vmem:[%s2231_s22 + $0x60] sm:$0xff]  ;;  %v1906_v50 = vld [vmem:[%s2231_s22 + $0x58] sm:$0xff]  ;;  %v1905_v54 = vld [vmem:[%s2231_s22 + $0x50] sm:$0xff] }
  0x5e   : > { %834 = vmatpush.bf16.msra.mxu1 %v1909_v38  ;;  %v1915_v47 = vld [vmem:[%s2231_s22 + $0xa0] sm:$0xff]  ;;  %v1914_v51 = vld [vmem:[%s2231_s22 + $0x98] sm:$0xff]  ;;  %v1913_v55 = vld [vmem:[%s2231_s22 + $0x90] sm:$0xff] }
  0x5f   : > { %883 = vmatpush.bf16.msra.mxu2 %v1917_v39  ;;  %v1923_v48 = vld [vmem:[%s2231_s22 + $0xe0] sm:$0xff]  ;;  %v1922_v52 = vld [vmem:[%s2231_s22 + $0xd8] sm:$0xff]  ;;  %v1921_v56 = vld [vmem:[%s2231_s22 + $0xd0] sm:$0xff] }
  0x60   : > { %932 = vmatpush.bf16.msra.mxu3 %v1925_v40  ;;  %v1896_v57 = vld [vmem:[%s2231_s22 + $0x8] sm:$0xff]  ;;  %v1895_v61 = vld [vmem:[%s2231_s22] sm:$0xff]  ;;  %v1865_v2 = vld [vmem:[%s2233_s9 + $0xc] sm:$0xf0] }
  0x61   : > { %786 = vmatpush.bf16.msra.mxu0 %v1900_v41  ;;  %v1904_v58 = vld [vmem:[%s2231_s22 + $0x48] sm:$0xff]  ;;  %v1903_v62 = vld [vmem:[%s2231_s22 + $0x40] sm:$0xff]  ;;  %v1606_v4 = vld [vmem:[%s2233_s9 + $0x10] sm:$0xf0] }
  0x62   : > { %835 = vmatpush.bf16.msra.mxu1 %v1908_v42  ;;  %v1912_v59 = vld [vmem:[%s2231_s22 + $0x88] sm:$0xff]  ;;  %v1911_v63 = vld [vmem:[%s2231_s22 + $0x80] sm:$0xff]  ;;  %v1866_v6 = vld [vmem:[%s2233_s9 + $0x14] sm:$0xf0] }
  0x63   : > { %884 = vmatpush.bf16.msra.mxu2 %v1916_v43  ;;  %v1920_v60 = vld [vmem:[%s2231_s22 + $0xc8] sm:$0xff]  ;;  %v1919_v0 = vld [vmem:[%s2231_s22 + $0xc0] sm:$0xff]  ;;  %v1614_v8 = vld [vmem:[%s2233_s9 + $0x18] sm:$0xf0] }
  0x64   : > { %933 = vmatpush.bf16.msra.mxu3 %v1924_v44  ;;  %v1604_v1 = vld [vmem:[%s2233_s9] sm:$0xf]  ;;  %v1863_v3 = vld [vmem:[%s2233_s9 + $0x4] sm:$0xf]  ;;  %v1612_v5 = vld [vmem:[%s2233_s9 + $0x8] sm:$0xf] }
  0x65   : > { %787 = vmatpush.bf16.msra.mxu0 %v1899_v45  ;;  %v1864_v7 = vld [vmem:[%s2233_s9 + $0xc] sm:$0xf]  ;;  %v1605_v9 = vor.u32 %v1865_v2, %v1604_v1  ;;  %v1609_v10 = vor.u32 %v1863_v3, %v1606_v4  ;;  %v1613_v11 = vor.u32 %v1866_v6, %v1612_v5  ;;  %v1620_v13 = vld [vmem:[%s2233_s9 + $0x20] sm:$0xf]  ;;  %v1869_v14 = vld [vmem:[%s2233_s9 + $0x2c] sm:$0xf0] }
  0x66   : > { %836 = vmatpush.bf16.msra.mxu1 %v1907_v46  ;;  %v1617_v12 = vor.u32 %v1864_v7, %v1614_v8  ;;  %v1867_v15 = vld [vmem:[%s2233_s9 + $0x24] sm:$0xf]  ;;  %v1622_v16 = vld [vmem:[%s2233_s9 + $0x30] sm:$0xf0]  ;;  %v1628_v17 = vld [vmem:[%s2233_s9 + $0x28] sm:$0xf]  ;;  %v1621_v21 = vor.u32 %v1869_v14, %v1620_v13 }
  0x67   : > { %885 = vmatpush.bf16.msra.mxu2 %v1915_v47  ;;  %v1870_v18 = vld [vmem:[%s2233_s9 + $0x34] sm:$0xf0]  ;;  %v1868_v19 = vld [vmem:[%s2233_s9 + $0x2c] sm:$0xf]  ;;  %v1630_v20 = vld [vmem:[%s2233_s9 + $0x38] sm:$0xf0]  ;;  %v1625_v22 = vor.u32 %v1867_v15, %v1622_v16 }
  0x68   : > { %934 = vmatpush.bf16.msra.mxu3 %v1923_v48  ;;  %v1629_v23 = vor.u32 %v1870_v18, %v1628_v17  ;;  %v1633_v24 = vor.u32 %v1868_v19, %v1630_v20  ;;  %v1636_v25 = vld [vmem:[%s2233_s9 + $0x40] sm:$0xf]  ;;  %v1873_v26 = vld [vmem:[%s2233_s9 + $0x4c] sm:$0xf0]  ;;  %v1871_v27 = vld [vmem:[%s2233_s9 + $0x44] sm:$0xf] }
  0x69   : > { %788 = vmatpush.bf16.msra.mxu0 %v1898_v49  ;;  %v1638_v28 = vld [vmem:[%s2233_s9 + $0x50] sm:$0xf0]  ;;  %v1644_v29 = vld [vmem:[%s2233_s9 + $0x48] sm:$0xf]  ;;  %v1874_v30 = vld [vmem:[%s2233_s9 + $0x54] sm:$0xf0]  ;;  %v1637_v33 = vor.u32 %v1873_v26, %v1636_v25 }
  0x6a   : > { %837 = vmatpush.bf16.msra.mxu1 %v1906_v50  ;;  %v1872_v31 = vld [vmem:[%s2233_s9 + $0x4c] sm:$0xf]  ;;  %v1646_v32 = vld [vmem:[%s2233_s9 + $0x58] sm:$0xf0]  ;;  %v1641_v34 = vor.u32 %v1871_v27, %v1638_v28  ;;  %v1645_v35 = vor.u32 %v1874_v30, %v1644_v29  ;;  %v1652_v37 = vld [vmem:[%s2233_s9 + $0x60] sm:$0xf] }
  0x6b   : > { %886 = vmatpush.bf16.msra.mxu2 %v1914_v51  ;;  %v1649_v36 = vor.u32 %v1872_v31, %v1646_v32  ;;  %v1877_v38 = vld [vmem:[%s2233_s9 + $0x6c] sm:$0xf0]  ;;  %v1875_v39 = vld [vmem:[%s2233_s9 + $0x64] sm:$0xf]  ;;  %v1654_v40 = vld [vmem:[%s2233_s9 + $0x70] sm:$0xf0] }
  0x6c   : > { %935 = vmatpush.bf16.msra.mxu3 %v1922_v52  ;;  %v1660_v41 = vld [vmem:[%s2233_s9 + $0x68] sm:$0xf]  ;;  %v1878_v42 = vld [vmem:[%s2233_s9 + $0x74] sm:$0xf0]  ;;  %v1876_v43 = vld [vmem:[%s2233_s9 + $0x6c] sm:$0xf]  ;;  %v1653_v45 = vor.u32 %v1877_v38, %v1652_v37  ;;  %v1657_v46 = vor.u32 %v1875_v39, %v1654_v40 }
  0x6d   : > { %789 = vmatpush.bf16.msra.mxu0 %v1897_v53  ;;  %v1662_v44 = vld [vmem:[%s2233_s9 + $0x78] sm:$0xf0]  ;;  %v1661_v47 = vor.u32 %v1878_v42, %v1660_v41  ;;  %v1668_v49 = vld [vmem:[%s2233_s9 + $0x80] sm:$0xf]  ;;  %v1881_v50 = vld [vmem:[%s2233_s9 + $0x8c] sm:$0xf0] }
  0x6e   : > { %838 = vmatpush.bf16.msra.mxu1 %v1905_v54  ;;  %v1665_v48 = vor.u32 %v1876_v43, %v1662_v44  ;;  %v1879_v51 = vld [vmem:[%s2233_s9 + $0x84] sm:$0xf]  ;;  %v1670_v52 = vld [vmem:[%s2233_s9 + $0x90] sm:$0xf0]  ;;  %v1676_v53 = vld [vmem:[%s2233_s9 + $0x88] sm:$0xf] }
  0x6f   : > { %887 = vmatpush.bf16.msra.mxu2 %v1913_v55  ;;  %v1882_v54 = vld [vmem:[%s2233_s9 + $0x94] sm:$0xf0]  ;;  %v1880_v55 = vld [vmem:[%s2233_s9 + $0x8c] sm:$0xf]  ;;  %v1692_v1 = vld [vmem:[%s2233_s9 + $0xa8] sm:$0xf] }
  0x70   : > { %936 = vmatpush.bf16.msra.mxu3 %v1921_v56  ;;  %v1678_v56 = vld [vmem:[%s2233_s9 + $0x98] sm:$0xf0]  ;;  %v1886_v2 = vld [vmem:[%s2233_s9 + $0xb4] sm:$0xf0]  ;;  %v1884_v3 = vld [vmem:[%s2233_s9 + $0xac] sm:$0xf] }
  0x71   : > { %790 = vmatpush.bf16.msra.mxu0 %v1896_v57  ;;  %v1669_v57 = vor.u32 %v1881_v50, %v1668_v49  ;;  %v1694_v4 = vld [vmem:[%s2233_s9 + $0xb8] sm:$0xf0]  ;;  %v1693_v7 = vor.u32 %v1886_v2, %v1692_v1  ;;  %v1708_v13 = vld [vmem:[%s2233_s9 + $0xc8] sm:$0xf]  ;;  %v1890_v14 = vld [vmem:[%s2233_s9 + $0xd4] sm:$0xf0] }
  0x72   : > { %839 = vmatpush.bf16.msra.mxu1 %v1904_v58  ;;  %v1673_v58 = vor.u32 %v1879_v51, %v1670_v52  ;;  %v1697_v8 = vor.u32 %v1884_v3, %v1694_v4  ;;  %v1888_v15 = vld [vmem:[%s2233_s9 + $0xcc] sm:$0xf]  ;;  %v1710_v16 = vld [vmem:[%s2233_s9 + $0xd8] sm:$0xf0]  ;;  %v1709_v19 = vor.u32 %v1890_v14, %v1708_v13  ;;  %v1724_v25 = vld [vmem:[%s2233_s9 + $0xe8] sm:$0xf] }
  0x73   : > { %888 = vmatpush.bf16.msra.mxu2 %v1912_v59  ;;  %v1677_v59 = vor.u32 %v1882_v54, %v1676_v53  ;;  %v1713_v20 = vor.u32 %v1888_v15, %v1710_v16  ;;  %v1894_v26 = vld [vmem:[%s2233_s9 + $0xf4] sm:$0xf0]  ;;  %v1892_v27 = vld [vmem:[%s2233_s9 + $0xec] sm:$0xf]  ;;  %v1726_v28 = vld [vmem:[%s2233_s9 + $0xf8] sm:$0xf0] }
  0x74   : > { %937 = vmatpush.bf16.msra.mxu3 %v1920_v60  ;;  %v1681_v60 = vor.u32 %v1880_v55, %v1678_v56  ;;  %v1725_v31 = vor.u32 %v1894_v26, %v1724_v25  ;;  %v1729_v32 = vor.u32 %v1892_v27, %v1726_v28  ;;  %v320_v41 = vld [vmem:[#allocation2] sm:$0xff]  ;;  %v321_v50 = vld [vmem:[#allocation2 + $0x8] sm:$0xff]  ;;  %v323_v4 = vld [vmem:[#allocation2 + $0x18] sm:$0xff] }
  0x75   : > { %791 = vmatpush.bf16.msra.mxu0 %v1895_v61  ;;  %v1684_v61 = vld [vmem:[%s2233_s9 + $0xa0] sm:$0xf] }
  0x76   : > { %840 = vmatpush.bf16.msra.mxu1 %v1903_v62  ;;  %v1885_v62 = vld [vmem:[%s2233_s9 + $0xac] sm:$0xf0]  ;;  %v324_v13 = vld [vmem:[#allocation2 + $0x20] sm:$0xff] }
  0x77   : > { %889 = vmatpush.bf16.msra.mxu2 %v1911_v63  ;;  %v1883_v63 = vld [vmem:[%s2233_s9 + $0xa4] sm:$0xf]  ;;  %v1685_v5 = vor.u32 %v1885_v62, %v1684_v61 }
  0x78   : > { %938 = vmatpush.bf16.msra.mxu3 %v1919_v0  ;;  %792 = vmatmul.bf16.vlgmr.msra.gmra.mxu0 %v1605_v9  ;;  %v1686_v0 = vld [vmem:[%s2233_s9 + $0xb0] sm:$0xf0]  ;;  %v1700_v9 = vld [vmem:[%s2233_s9 + $0xc0] sm:$0xf] }
  0x79   : > { %841 = vmatmul.bf16.vlgmr.msra.gmra.mxu1 %v1609_v10  ;;  %v1689_v6 = vor.u32 %v1883_v63, %v1686_v0  ;;  %v1889_v10 = vld [vmem:[%s2233_s9 + $0xcc] sm:$0xf0] }
  0x7a   : > { %890 = vmatmul.bf16.vlgmr.msra.gmra.mxu2 %v1613_v11  ;;  %v1887_v11 = vld [vmem:[%s2233_s9 + $0xc4] sm:$0xf]  ;;  %v1701_v17 = vor.u32 %v1889_v10, %v1700_v9 }
  0x7b   : > { %939 = vmatmul.bf16.vlgmr.msra.gmra.mxu3 %v1617_v12  ;;  %v1702_v12 = vld [vmem:[%s2233_s9 + $0xd0] sm:$0xf0] }
  0x7c   : > { %v1705_v18 = vor.u32 %v1887_v11, %v1702_v12 }
  0x88   : > { %797 = vmatmul.bf16.gmra.mxu0 %v1621_v21  ;;  %v1716_v21 = vld [vmem:[%s2233_s9 + $0xe0] sm:$0xf] }
  0x89   : > { %846 = vmatmul.bf16.gmra.mxu1 %v1625_v22  ;;  %v1893_v22 = vld [vmem:[%s2233_s9 + $0xec] sm:$0xf0] }
  0x8a   : > { %895 = vmatmul.bf16.gmra.mxu2 %v1629_v23  ;;  %v1891_v23 = vld [vmem:[%s2233_s9 + $0xe4] sm:$0xf]  ;;  %v1717_v29 = vor.u32 %v1893_v22, %v1716_v21  ;;  %v325_v22 = vld [vmem:[#allocation2 + $0x28] sm:$0xff] }
  0x8b   : > { %944 = vmatmul.bf16.gmra.mxu3 %v1633_v24  ;;  %v1718_v24 = vld [vmem:[%s2233_s9 + $0xf0] sm:$0xf0] }
  0x8c   : > { %v1721_v30 = vor.u32 %v1891_v23, %v1718_v24 }
  0x98   : > { %802 = vmatmul.bf16.gmra.mxu0 %v1637_v33 }
  0x99   : > { %851 = vmatmul.bf16.gmra.mxu1 %v1641_v34 }
  0x9a   : > { %900 = vmatmul.bf16.gmra.mxu2 %v1645_v35 }
  0x9b   : > { %949 = vmatmul.bf16.gmra.mxu3 %v1649_v36 }
  0xa8   : > { %807 = vmatmul.bf16.gmra.mxu0 %v1653_v45 }
  0xa9   : > { %856 = vmatmul.bf16.gmra.mxu1 %v1657_v46 }
  0xaa   : > { %905 = vmatmul.bf16.gmra.mxu2 %v1661_v47 }
  0xab   : > { %954 = vmatmul.bf16.gmra.mxu3 %v1665_v48 }
  0xb8   : > { %812 = vmatmul.bf16.gmra.mxu0 %v1669_v57 }
  0xb9   : > { %861 = vmatmul.bf16.gmra.mxu1 %v1673_v58 }
  0xba   : > { %910 = vmatmul.bf16.gmra.mxu2 %v1677_v59  ;;  %v322_v59 = vld [vmem:[#allocation2 + $0x10] sm:$0xff] }
  0xbb   : > { %959 = vmatmul.bf16.gmra.mxu3 %v1681_v60 }
  0xc8   : > { %817 = vmatmul.bf16.gmra.mxu0 %v1685_v5 }
  0xc9   : > { %866 = vmatmul.bf16.gmra.mxu1 %v1689_v6 }
  0xca   : > { %915 = vmatmul.bf16.gmra.mxu2 %v1693_v7 }
  0xcb   : > { %964 = vmatmul.bf16.gmra.mxu3 %v1697_v8 }
  0xd8   : > { %822 = vmatmul.bf16.gmra.mxu0 %v1701_v17 }
  0xd9   : > { %871 = vmatmul.bf16.gmra.mxu1 %v1705_v18 }
  0xda   : > { %920 = vmatmul.bf16.gmra.mxu2 %v1709_v19 }
  0xdb   : > { %969 = vmatmul.bf16.gmra.mxu3 %v1713_v20 }
  0xe8   : > { %827 = vmatmul.bf16.gmra.mxu0 %v1717_v29 }
  0xe9   : > { %876 = vmatmul.bf16.gmra.mxu1 %v1721_v30 }
  0xea   : > { %925 = vmatmul.bf16.gmra.mxu2 %v1725_v31  ;;  %v326_v31 = vld [vmem:[#allocation2 + $0x30] sm:$0xff] }
  0xeb   : > { %974 = vmatmul.bf16.gmra.mxu3 %v1729_v32 }
  0xf5   : > { %v793_v33 = vpop.f32.mrf.mxu0 }
  0xf6   : > { %v842_v34 = vpop.f32.mrf.mxu1 }
  0xf7   : > { %v843_v35 = vadd.f32 %v842_v34, %v793_v33 }
  0xfd   : > { %v891_v36 = vpop.f32.mrf.mxu2  ;;  %v795_v39 = vpop.f32.mrf.mxu0 }
  0xfe   : > { %v940_v37 = vpop.f32.mrf.mxu3  ;;  %v892_v38 = vadd.f32 %v891_v36, %v843_v35  ;;  %v844_v40 = vpop.f32.mrf.mxu1 }
  0xff   : > { %v845_v44 = vadd.f32 %v844_v40, %v795_v39  ;;  %v327_v40 = vld [vmem:[#allocation2 + $0x38] sm:$0xff] }
 0x100   : > { %v941_v42 = vadd.f32 %v940_v37, %v892_v38 }
 0x102   : > { %v980_v43 = vadd.f32 %v941_v42, %v320_v41 }
 0x104   : > { %997 = vst.msk [vmem:[#allocation2] sm:$0xff] %vm996_vm1, %v980_v43 }
 0x105   : > { %v893_v45 = vpop.f32.mrf.mxu2  ;;  %v798_v48 = vpop.f32.mrf.mxu0 }
 0x106   : > { %v942_v46 = vpop.f32.mrf.mxu3  ;;  %v894_v47 = vadd.f32 %v893_v45, %v845_v44  ;;  %v847_v49 = vpop.f32.mrf.mxu1 }
 0x107   : > { %v848_v53 = vadd.f32 %v847_v49, %v798_v48  ;;  %v328_v49 = vld [vmem:[#allocation2 + $0x40] sm:$0xff] }
 0x108   : > { %v943_v51 = vadd.f32 %v942_v46, %v894_v47 }
 0x10a   : > { %v981_v52 = vadd.f32 %v943_v51, %v321_v50 }
 0x10c   : > { %998 = vst.msk [vmem:[#allocation2 + $0x8] sm:$0xff] %vm996_vm1, %v981_v52 }
 0x10d   : > { %v896_v54 = vpop.f32.mrf.mxu2  ;;  %v800_v57 = vpop.f32.mrf.mxu0 }
 0x10e   : > { %v945_v55 = vpop.f32.mrf.mxu3  ;;  %v897_v56 = vadd.f32 %v896_v54, %v848_v53  ;;  %v849_v58 = vpop.f32.mrf.mxu1 }
 0x10f   : > { %v850_v62 = vadd.f32 %v849_v58, %v800_v57  ;;  %v329_v58 = vld [vmem:[#allocation2 + $0x48] sm:$0xff] }
 0x110   : > { %v946_v60 = vadd.f32 %v945_v55, %v897_v56 }
 0x112   : > { %v982_v61 = vadd.f32 %v946_v60, %v322_v59 }
 0x114   : > { %999 = vst.msk [vmem:[#allocation2 + $0x10] sm:$0xff] %vm996_vm1, %v982_v61 }
 0x115   : > { %v898_v63 = vpop.f32.mrf.mxu2  ;;  %v803_v2 = vpop.f32.mrf.mxu0 }
 0x116   : > { %v947_v0 = vpop.f32.mrf.mxu3  ;;  %v899_v1 = vadd.f32 %v898_v63, %v850_v62  ;;  %v852_v3 = vpop.f32.mrf.mxu1 }
 0x117   : > { %v853_v7 = vadd.f32 %v852_v3, %v803_v2  ;;  %v330_v3 = vld [vmem:[#allocation2 + $0x50] sm:$0xff] }
 0x118   : > { %v948_v5 = vadd.f32 %v947_v0, %v899_v1 }
 0x11a   : > { %v983_v6 = vadd.f32 %v948_v5, %v323_v4 }
 0x11c   : > { %1000 = vst.msk [vmem:[#allocation2 + $0x18] sm:$0xff] %vm996_vm1, %v983_v6 }
 0x11d   : > { %v901_v8 = vpop.f32.mrf.mxu2  ;;  %v805_v11 = vpop.f32.mrf.mxu0 }
 0x11e   : > { %v950_v9 = vpop.f32.mrf.mxu3  ;;  %v902_v10 = vadd.f32 %v901_v8, %v853_v7  ;;  %v854_v12 = vpop.f32.mrf.mxu1 }
 0x11f   : > { %v855_v16 = vadd.f32 %v854_v12, %v805_v11  ;;  %v331_v12 = vld [vmem:[#allocation2 + $0x58] sm:$0xff] }
 0x120   : > { %v951_v14 = vadd.f32 %v950_v9, %v902_v10 }
 0x122   : > { %v984_v15 = vadd.f32 %v951_v14, %v324_v13 }
 0x124   : > { %1001 = vst.msk [vmem:[#allocation2 + $0x20] sm:$0xff] %vm996_vm1, %v984_v15 }
 0x125   : > { %v903_v17 = vpop.f32.mrf.mxu2  ;;  %v808_v20 = vpop.f32.mrf.mxu0 }
 0x126   : > { %v952_v18 = vpop.f32.mrf.mxu3  ;;  %v904_v19 = vadd.f32 %v903_v17, %v855_v16  ;;  %v857_v21 = vpop.f32.mrf.mxu1 }
 0x127   : > { %v858_v25 = vadd.f32 %v857_v21, %v808_v20  ;;  %v332_v21 = vld [vmem:[#allocation2 + $0x60] sm:$0xff] }
 0x128   : > { %v953_v23 = vadd.f32 %v952_v18, %v904_v19 }
 0x12a   : > { %v985_v24 = vadd.f32 %v953_v23, %v325_v22 }
 0x12c   : > { %1002 = vst.msk [vmem:[#allocation2 + $0x28] sm:$0xff] %vm996_vm1, %v985_v24 }
 0x12d   : > { %v906_v26 = vpop.f32.mrf.mxu2  ;;  %v810_v29 = vpop.f32.mrf.mxu0 }
 0x12e   : > { %v955_v27 = vpop.f32.mrf.mxu3  ;;  %v907_v28 = vadd.f32 %v906_v26, %v858_v25  ;;  %v859_v30 = vpop.f32.mrf.mxu1 }
 0x12f   : > { %v860_v34 = vadd.f32 %v859_v30, %v810_v29 }
 0x130   : > { %v956_v32 = vadd.f32 %v955_v27, %v907_v28  ;;  %v333_v28 = vld [vmem:[#allocation2 + $0x68] sm:$0xff] }
 0x132   : > { %v986_v33 = vadd.f32 %v956_v32, %v326_v31 }
 0x134   : > { %1003 = vst.msk [vmem:[#allocation2 + $0x30] sm:$0xff] %vm996_vm1, %v986_v33 }
 0x135   : > { %v908_v35 = vpop.f32.mrf.mxu2  ;;  %v813_v38 = vpop.f32.mrf.mxu0 }
 0x136   : > { %v957_v36 = vpop.f32.mrf.mxu3  ;;  %v909_v37 = vadd.f32 %v908_v35, %v860_v34  ;;  %v862_v39 = vpop.f32.mrf.mxu1 }
 0x137   : > { %v863_v43 = vadd.f32 %v862_v39, %v813_v38 }
 0x138   : > { %v958_v41 = vadd.f32 %v957_v36, %v909_v37  ;;  %v334_v37 = vld [vmem:[#allocation2 + $0x70] sm:$0xff] }
 0x13a   : > { %v987_v42 = vadd.f32 %v958_v41, %v327_v40 }
 0x13c   : > { %1004 = vst.msk [vmem:[#allocation2 + $0x38] sm:$0xff] %vm996_vm1, %v987_v42 }
 0x13d   : > { %v911_v44 = vpop.f32.mrf.mxu2  ;;  %v815_v47 = vpop.f32.mrf.mxu0 }
 0x13e   : > { %v960_v45 = vpop.f32.mrf.mxu3  ;;  %v912_v46 = vadd.f32 %v911_v44, %v863_v43  ;;  %v864_v48 = vpop.f32.mrf.mxu1 }
 0x13f   : > { %v865_v52 = vadd.f32 %v864_v48, %v815_v47 }
 0x140   : > { %v961_v50 = vadd.f32 %v960_v45, %v912_v46  ;;  %v335_v45 = vld [vmem:[#allocation2 + $0x78] sm:$0xff] }
 0x142   : > { %v988_v51 = vadd.f32 %v961_v50, %v328_v49 }
 0x144   : > { %1005 = vst.msk [vmem:[#allocation2 + $0x40] sm:$0xff] %vm996_vm1, %v988_v51 }
 0x145   : > { %v913_v53 = vpop.f32.mrf.mxu2  ;;  %v818_v56 = vpop.f32.mrf.mxu0 }
 0x146   : > { %v962_v54 = vpop.f32.mrf.mxu3  ;;  %v914_v55 = vadd.f32 %v913_v53, %v865_v52  ;;  %v867_v57 = vpop.f32.mrf.mxu1 }
 0x147   : > { %v868_v61 = vadd.f32 %v867_v57, %v818_v56 }
 0x148   : > { %v963_v59 = vadd.f32 %v962_v54, %v914_v55 }
 0x14a   : > { %v989_v60 = vadd.f32 %v963_v59, %v329_v58 }
 0x14c   : > { %1006 = vst.msk [vmem:[#allocation2 + $0x48] sm:$0xff] %vm996_vm1, %v989_v60 }
 0x14d   : > { %v916_v62 = vpop.f32.mrf.mxu2  ;;  %v820_v1 = vpop.f32.mrf.mxu0 }
 0x14e   : > { %v965_v63 = vpop.f32.mrf.mxu3  ;;  %v917_v0 = vadd.f32 %v916_v62, %v868_v61  ;;  %v869_v2 = vpop.f32.mrf.mxu1 }
 0x14f   : > { %v870_v6 = vadd.f32 %v869_v2, %v820_v1 }
 0x150   : > { %v966_v4 = vadd.f32 %v965_v63, %v917_v0 }
 0x152   : > { %v990_v5 = vadd.f32 %v966_v4, %v330_v3 }
 0x154   : > { %1007 = vst.msk [vmem:[#allocation2 + $0x50] sm:$0xff] %vm996_vm1, %v990_v5 }
 0x155   : > { %v918_v7 = vpop.f32.mrf.mxu2  ;;  %v823_v10 = vpop.f32.mrf.mxu0 }
 0x156   : > { %v967_v8 = vpop.f32.mrf.mxu3  ;;  %v919_v9 = vadd.f32 %v918_v7, %v870_v6  ;;  %v872_v11 = vpop.f32.mrf.mxu1 }
 0x157   : > { %v873_v15 = vadd.f32 %v872_v11, %v823_v10 }
 0x158   : > { %v968_v13 = vadd.f32 %v967_v8, %v919_v9 }
 0x15a   : > { %v991_v14 = vadd.f32 %v968_v13, %v331_v12 }
 0x15c   : > { %1008 = vst.msk [vmem:[#allocation2 + $0x58] sm:$0xff] %vm996_vm1, %v991_v14 }
 0x15d   : > { %v921_v16 = vpop.f32.mrf.mxu2  ;;  %v825_v19 = vpop.f32.mrf.mxu0 }
 0x15e   : > { %v970_v17 = vpop.f32.mrf.mxu3  ;;  %v922_v18 = vadd.f32 %v921_v16, %v873_v15  ;;  %v874_v20 = vpop.f32.mrf.mxu1 }
 0x15f   : > { %v875_v24 = vadd.f32 %v874_v20, %v825_v19 }
 0x160   : > { %v971_v22 = vadd.f32 %v970_v17, %v922_v18 }
 0x162   : > { %v992_v23 = vadd.f32 %v971_v22, %v332_v21 }
 0x164   : > { %1009 = vst.msk [vmem:[#allocation2 + $0x60] sm:$0xff] %vm996_vm1, %v992_v23 }
 0x165   : > { %v923_v25 = vpop.f32.mrf.mxu2  ;;  %v828_v29 = vpop.f32.mrf.mxu0 }
 0x166   : > { %v972_v26 = vpop.f32.mrf.mxu3  ;;  %v924_v27 = vadd.f32 %v923_v25, %v875_v24  ;;  %v877_v30 = vpop.f32.mrf.mxu1 }
 0x167   : > { %v878_v33 = vadd.f32 %v877_v30, %v828_v29 }
 0x168   : > { %v973_v31 = vadd.f32 %v972_v26, %v924_v27 }
 0x16a   : > { %v993_v32 = vadd.f32 %v973_v31, %v333_v28 }
 0x16c   : > { %1010 = vst.msk [vmem:[#allocation2 + $0x68] sm:$0xff] %vm996_vm1, %v993_v32 }
 0x16d   : > { %v926_v34 = vpop.f32.mrf.mxu2  ;;  %v830_v39 = vpop.f32.mrf.mxu0 }
 0x16e   : > { %v975_v35 = vpop.f32.mrf.mxu3  ;;  %v927_v36 = vadd.f32 %v926_v34, %v878_v33  ;;  %v879_v40 = vpop.f32.mrf.mxu1 }
 0x16f   : > { %v880_v42 = vadd.f32 %v879_v40, %v830_v39 }
 0x170   : > { %v976_v38 = vadd.f32 %v975_v35, %v927_v36 }
 0x172   : > { %v994_v41 = vadd.f32 %v976_v38, %v334_v37 }
 0x174   : > { %1011 = vst.msk [vmem:[#allocation2 + $0x70] sm:$0xff] %vm996_vm1, %v994_v41 }
 0x175   : > { %v928_v43 = vpop.f32.mrf.mxu2 }
 0x176   : > { %v929_v44 = vadd.f32 %v928_v43, %v880_v42  ;;  %v977_v46 = vpop.f32.mrf.mxu3 }
 0x178   : > { %v978_v47 = vadd.f32 %v977_v46, %v929_v44  ;;  %1016 = sbr.rel (%p1858_p13) target bundleno = 705 (0x2c1), region = 59 }
 0x17a   : > { %v995_v48 = vadd.f32 %v978_v47, %v335_v45 }
 0x17c   : > { %1012 = vst.msk [vmem:[#allocation2 + $0x78] sm:$0xff] %vm996_vm1, %v995_v48 }
 0x17d   : > { %v2365_v49 = vld [vmem:[#allocation2 + $0x20] sm:$0xff]  ;;  %v1019_v50 = vld [vmem:[#allocation2 + $0x10] sm:$0xff]  ;;  %v2371_v55 = vld [vmem:[#allocation2 + $0x28] sm:$0xff]  ;;  %v2076_v17 = vmov 9.0   ;;  %vm1456_vm4 = vcmask 68608  }
 0x17e   : > { %v1017_v51 = vld [vmem:[#allocation2] sm:$0xff]  ;;  %v1045_v52 = vsel %vm996_vm1, %v2365_v49, 0.0  ;;  %v1039_v53 = vsel %vm996_vm1, %v1019_v50, 0.0  ;;  %v2373_v56 = vld [vmem:[#allocation2 + $0x18] sm:$0xff]  ;;  %v2375_v57 = vld [vmem:[#allocation2 + $0x8] sm:$0xff]  ;;  %v1048_v58 = vsel %vm996_vm1, %v2371_v55, 0.0  ;;  %1985 = vrcp.f32 %v2076_v17 }
 0x17f   : > { %v1033_v54 = vsel %vm996_vm1, %v1017_v51, 0.0  ;;  %1046 = vadd.xlane.f32.xlu2 %v1045_v52  ;;  %1040 = vadd.xlane.f32.xlu1 %v1039_v53  ;;  %v1042_v59 = vsel %vm996_vm1, %v2373_v56, 0.0  ;;  %v1036_v60 = vsel %vm996_vm1, %v2375_v57, 0.0  ;;  %v2383_v61 = vld [vmem:[#allocation2 + $0x40] sm:$0xff]  ;;  %v2385_v62 = vld [vmem:[#allocation2 + $0x38] sm:$0xff]  ;;  %v2387_v63 = vld [vmem:[#allocation2 + $0x30] sm:$0xff] }
 0x180   : > { %1034 = vadd.xlane.f32.xlu0 %v1033_v54  ;;  %v1057_v0 = vsel %vm996_vm1, %v2383_v61, 0.0  ;;  %v1054_v1 = vsel %vm996_vm1, %v2385_v62, 0.0  ;;  %v1051_v2 = vsel %vm996_vm1, %v2387_v63, 0.0  ;;  %v2395_v3 = vld [vmem:[#allocation2 + $0x58] sm:$0xff]  ;;  %v2397_v4 = vld [vmem:[#allocation2 + $0x50] sm:$0xff]  ;;  %v2399_v5 = vld [vmem:[#allocation2 + $0x48] sm:$0xff] }
 0x181   : > { %v1066_v6 = vsel %vm996_vm1, %v2395_v3, 0.0  ;;  %v1063_v7 = vsel %vm996_vm1, %v2397_v4, 0.0  ;;  %v1060_v8 = vsel %vm996_vm1, %v2399_v5, 0.0  ;;  %v2407_v9 = vld [vmem:[#allocation2 + $0x70] sm:$0xff]  ;;  %v2409_v10 = vld [vmem:[#allocation2 + $0x68] sm:$0xff]  ;;  %v2411_v11 = vld [vmem:[#allocation2 + $0x60] sm:$0xff] }
 0x182   : > { %v1075_v12 = vsel %vm996_vm1, %v2407_v9, 0.0  ;;  %v1072_v13 = vsel %vm996_vm1, %v2409_v10, 0.0  ;;  %v1069_v14 = vsel %vm996_vm1, %v2411_v11, 0.0 }
 0x183   : > { %v2419_v15 = vld [vmem:[#allocation2 + $0x78] sm:$0xff] }
 0x184   : > { %v1078_v16 = vsel %vm996_vm1, %v2419_v15, 0.0  ;;  %v1986_v18 = vpop.eup %1985 }
 0x185   : > { %v1082_v19 = vmul.f32 9.0, %v1986_v18  ;;  %vm1086_vm2 = vweird.f32 %v1986_v18 }
 0x187   : > { %1049 = vadd.xlane.f32.xlu2 %v1048_v58  ;;  %1043 = vadd.xlane.f32.xlu1 %v1042_v59  ;;  %v1083_v20 = vsub.f32 1.0, %v1082_v19 }
 0x188   : > { %1037 = vadd.xlane.f32.xlu0 %v1036_v60 }
 0x189   : > { %v1084_v21 = vmul.f32 %v1986_v18, %v1083_v20 }
 0x18b   : > { %v1085_v22 = vadd.f32 %v1986_v18, %v1084_v21 }
 0x18d   : > { %v2423_v23 = vsel %vm1086_vm2, %v1986_v18, %v1085_v22 }
 0x18f   : > { %1058 = vadd.xlane.f32.xlu2 %v1057_v0  ;;  %1055 = vadd.xlane.f32.xlu1 %v1054_v1 }
 0x190   : > { %1052 = vadd.xlane.f32.xlu0 %v1051_v2 }
 0x197   : > { %1067 = vadd.xlane.f32.xlu2 %v1066_v6  ;;  %1064 = vadd.xlane.f32.xlu1 %v1063_v7 }
 0x198   : > { %1061 = vadd.xlane.f32.xlu0 %v1060_v8 }
 0x19f   : > { %1076 = vadd.xlane.f32.xlu2 %v1075_v12  ;;  %1073 = vadd.xlane.f32.xlu1 %v1072_v13 }
 0x1a0   : > { %1070 = vadd.xlane.f32.xlu0 %v1069_v14 }
 0x1a8   : > { %1079 = vadd.xlane.f32.xlu0 %v1078_v16 }
 0x1f2   : > { %v1047_v24 = vpop.xlane.xlu2 %1046  ;;  %v1041_v25 = vpop.xlane.xlu1 %1040 }
 0x1f3   : > { %v1090_v26 = vmul.f32 %v2423_v23, %v1041_v25  ;;  %v1035_v27 = vpop.xlane.xlu0 %1034  ;;  %v1092_v43 = vmul.f32 %v2423_v23, %v1047_v24 }
 0x1f4   : > { %v1088_v28 = vmul.f32 %v2423_v23, %v1035_v27 }
 0x1f5   : > { %v2427_v29 = vsub.f32 %v1019_v50, %v1090_v26 }
 0x1f6   : > { %v2429_v30 = vsub.f32 %v1017_v51, %v1088_v28  ;;  %v2459_v51 = vsub.f32 %v2365_v49, %v1092_v43 }
 0x1f7   : > { %v1122_v31 = vmul.f32 %v2427_v29, %v2427_v29 }
 0x1f8   : > { %v1120_v32 = vmul.f32 %v2429_v30, %v2429_v30  ;;  %v1124_v60 = vmul.f32 %v2459_v51, %v2459_v51 }
 0x1f9   : > { %v1142_v33 = vsel %vm996_vm1, %v1122_v31, 0.0 }
 0x1fa   : > { %v1050_v34 = vpop.xlane.xlu2 %1049  ;;  %v1044_v35 = vpop.xlane.xlu1 %1043  ;;  %1143 = vadd.xlane.f32.xlu0 %v1142_v33  ;;  %v1136_v36 = vsel %vm996_vm1, %v1120_v32, 0.0 }
 0x1fb   : > { %v1093_v37 = vmul.f32 %v2423_v23, %v1050_v34  ;;  %v1091_v38 = vmul.f32 %v2423_v23, %v1044_v35  ;;  %1137 = vadd.xlane.f32.xlu1 %v1136_v36  ;;  %v1038_v39 = vpop.xlane.xlu0 %1037 }
 0x1fc   : > { %v1089_v40 = vmul.f32 %v2423_v23, %v1038_v39 }
 0x1fd   : > { %v2441_v41 = vsub.f32 %v2371_v55, %v1093_v37  ;;  %v2444_v42 = vsub.f32 %v2373_v56, %v1091_v38 }
 0x1fe   : > { %v2448_v44 = vsub.f32 %v2375_v57, %v1089_v40 }
 0x1ff   : > { %v1125_v45 = vmul.f32 %v2441_v41, %v2441_v41  ;;  %v1123_v46 = vmul.f32 %v2444_v42, %v2444_v42 }
 0x200   : > { %v1121_v47 = vmul.f32 %v2448_v44, %v2448_v44 }
 0x201   : > { %v1151_v48 = vsel %vm996_vm1, %v1125_v45, 0.0  ;;  %v1145_v50 = vsel %vm996_vm1, %v1123_v46, 0.0 }
 0x202   : > { %v1059_v52 = vpop.xlane.xlu2 %1058  ;;  %1152 = vadd.xlane.f32.xlu0 %v1151_v48  ;;  %v1139_v53 = vsel %vm996_vm1, %v1121_v47, 0.0  ;;  %v1056_v54 = vpop.xlane.xlu1 %1055 }
 0x203   : > { %v1096_v55 = vmul.f32 %v2423_v23, %v1059_v52  ;;  %1146 = vadd.xlane.f32.xlu1 %v1145_v50  ;;  %1140 = vadd.xlane.f32.xlu2 %v1139_v53  ;;  %v1053_v56 = vpop.xlane.xlu0 %1052  ;;  %v1095_v58 = vmul.f32 %v2423_v23, %v1056_v54 }
 0x204   : > { %v1094_v57 = vmul.f32 %v2423_v23, %v1053_v56 }
 0x205   : > { %v2466_v59 = vsub.f32 %v2383_v61, %v1096_v55  ;;  %v2476_v1 = vsub.f32 %v2385_v62, %v1095_v58  ;;  %v1148_v61 = vsel %vm996_vm1, %v1124_v60, 0.0 }
 0x206   : > { %v2469_v49 = vsub.f32 %v2387_v63, %v1094_v57 }
 0x207   : > { %v1128_v0 = vmul.f32 %v2466_v59, %v2466_v59  ;;  %v1127_v16 = vmul.f32 %v2476_v1, %v2476_v1 }
 0x208   : > { %v1126_v2 = vmul.f32 %v2469_v49, %v2469_v49 }
 0x209   : > { %v1160_v6 = vsel %vm996_vm1, %v1128_v0, 0.0  ;;  %v1157_v21 = vsel %vm996_vm1, %v1127_v16, 0.0 }
 0x20a   : > { %v1068_v7 = vpop.xlane.xlu2 %1067  ;;  %1161 = vadd.xlane.f32.xlu0 %v1160_v6  ;;  %v1154_v63 = vsel %vm996_vm1, %v1126_v2, 0.0  ;;  %v1065_v8 = vpop.xlane.xlu1 %1064 }
 0x20b   : > { %v1099_v12 = vmul.f32 %v2423_v23, %v1068_v7  ;;  %1149 = vadd.xlane.f32.xlu2 %v1148_v61  ;;  %1155 = vadd.xlane.f32.xlu1 %v1154_v63  ;;  %v1062_v13 = vpop.xlane.xlu0 %1061  ;;  %v1098_v14 = vmul.f32 %v2423_v23, %v1065_v8 }
 0x20c   : > { %v1097_v62 = vmul.f32 %v2423_v23, %v1062_v13 }
 0x20d   : > { %v2489_v17 = vsub.f32 %v2395_v3, %v1099_v12  ;;  %v2497_v20 = vsub.f32 %v2397_v4, %v1098_v14 }
 0x20e   : > { %v2492_v18 = vsub.f32 %v2399_v5, %v1097_v62 }
 0x20f   : > { %v1131_v19 = vmul.f32 %v2489_v17, %v2489_v17  ;;  %v1130_v31 = vmul.f32 %v2497_v20, %v2497_v20 }
 0x210   : > { %v1129_v22 = vmul.f32 %v2492_v18, %v2492_v18 }
 0x211   : > { %v1169_v24 = vsel %vm996_vm1, %v1131_v19, 0.0  ;;  %v1166_v36 = vsel %vm996_vm1, %v1130_v31, 0.0 }
 0x212   : > { %v1077_v25 = vpop.xlane.xlu2 %1076  ;;  %1170 = vadd.xlane.f32.xlu0 %v1169_v24  ;;  %v1163_v3 = vsel %vm996_vm1, %v1129_v22, 0.0  ;;  %v1074_v26 = vpop.xlane.xlu1 %1073 }
 0x213   : > { %v1102_v5 = vmul.f32 %v2423_v23, %v1077_v25  ;;  %1158 = vadd.xlane.f32.xlu2 %v1157_v21  ;;  %1164 = vadd.xlane.f32.xlu1 %v1163_v3  ;;  %v1071_v27 = vpop.xlane.xlu0 %1070  ;;  %v1101_v28 = vmul.f32 %v2423_v23, %v1074_v26 }
 0x214   : > { %v1100_v4 = vmul.f32 %v2423_v23, %v1071_v27 }
 0x215   : > { %v2510_v32 = vsub.f32 %v2407_v9, %v1102_v5  ;;  %v2518_v35 = vsub.f32 %v2409_v10, %v1101_v28 }
 0x216   : > { %v2513_v33 = vsub.f32 %v2411_v11, %v1100_v4 }
 0x217   : > { %v1134_v34 = vmul.f32 %v2510_v32, %v2510_v32  ;;  %v1133_v40 = vmul.f32 %v2518_v35, %v2518_v35 }
 0x218   : > { %v1132_v37 = vmul.f32 %v2513_v33, %v2513_v33 }
 0x219   : > { %v1178_v38 = vsel %vm996_vm1, %v1134_v34, 0.0  ;;  %v1175_v43 = vsel %vm996_vm1, %v1133_v40, 0.0 }
 0x21a   : > { %1179 = vadd.xlane.f32.xlu0 %v1178_v38  ;;  %v1172_v9 = vsel %vm996_vm1, %v1132_v37, 0.0 }
 0x21b   : > { %1167 = vadd.xlane.f32.xlu2 %v1166_v36  ;;  %1173 = vadd.xlane.f32.xlu1 %v1172_v9  ;;  %v1080_v11 = vpop.xlane.xlu0 %1079 }
 0x21c   : > { %v1103_v39 = vmul.f32 %v2423_v23, %v1080_v11 }
 0x21e   : > { %v2529_v10 = vsub.f32 %v2419_v15, %v1103_v39 }
 0x220   : > { %v1135_v45 = vmul.f32 %v2529_v10, %v2529_v10 }
 0x222   : > { %v1181_v46 = vsel %vm996_vm1, %v1135_v45, 0.0 }
 0x223   : > { %1176 = vadd.xlane.f32.xlu2 %v1175_v43  ;;  %1182 = vadd.xlane.f32.xlu1 %v1181_v46 }
 0x26d   : > { %v1144_v47 = vpop.xlane.xlu0 %1143 }
 0x26e   : > { %v1138_v48 = vpop.xlane.xlu1 %1137  ;;  %v1186_v50 = vmul.f32 %v1144_v47, %v2423_v23 }
 0x26f   : > { %v1184_v52 = vmul.f32 %v1138_v48, %v2423_v23 }
 0x270   : > { %v1202_v53 = vadd.f32 1e-05, %v1186_v50 }
 0x271   : > { %v1200_v54 = vadd.f32 1e-05, %v1184_v52 }
 0x272   : > { %1987 = vrsqrt.f32 %v1202_v53  ;;  %vm1242_vm7 = vweird.f32 %v1202_v53 }
 0x273   : > { %1989 = vrsqrt.f32 %v1200_v54  ;;  %vm1222_vm5 = vweird.f32 %v1200_v54 }
 0x275   : > { %v1153_v15 = vpop.xlane.xlu0 %1152 }
 0x276   : > { %v1147_v55 = vpop.xlane.xlu1 %1146  ;;  %v1141_v56 = vpop.xlane.xlu2 %1140  ;;  %v1189_v57 = vmul.f32 %v1153_v15, %v2423_v23 }
 0x277   : > { %v1187_v58 = vmul.f32 %v1147_v55, %v2423_v23  ;;  %v1185_v60 = vmul.f32 %v1141_v56, %v2423_v23 }
 0x278   : > { %v1988_v0 = vpop.eup %1987  ;;  %v2540_v2 = vadd.f32 1e-05, %v1189_v57 }
 0x279   : > { %v1990_v6 = vpop.eup %1989  ;;  %v1237_v7 = vmul.f32 %v1988_v0, %v1202_v53  ;;  %v2542_v61 = vadd.f32 1e-05, %v1187_v58  ;;  %v2544_v63 = vadd.f32 1e-05, %v1185_v60  ;;  %vm1243_vm3 = vweird.f32 %v1988_v0 }
 0x27a   : > { %v1217_v8 = vmul.f32 %v1990_v6, %v1200_v54  ;;  %1991 = vrsqrt.f32 %v2540_v2  ;;  %vm1223_vm6 = vweird.f32 %v1990_v6  ;;  %vm1272_vm8 = vweird.f32 %v2540_v2  ;;  %vm1244_vm9 = vmor %vm1242_vm7, %vm1243_vm3 }
 0x27b   : > { %v1238_v12 = vmul.f32 %v1988_v0, %v1237_v7  ;;  %1993 = vrsqrt.f32 %v2542_v61  ;;  %vm1252_vm10 = vweird.f32 %v2542_v61  ;;  %vm1224_vm11 = vmor %vm1222_vm5, %vm1223_vm6  ;;  %vm1232_vm1 = vweird.f32 %v2544_v63 }
 0x27c   : > { %v1218_v13 = vmul.f32 %v1990_v6, %v1217_v8  ;;  %1995 = vrsqrt.f32 %v2544_v63 }
 0x27d   : > { %v1239_v62 = vmul.f32 0.5, %v1238_v12  ;;  %v1162_v14 = vpop.xlane.xlu0 %1161 }
 0x27e   : > { %v1219_v16 = vmul.f32 0.5, %v1218_v13  ;;  %v1150_v19 = vpop.xlane.xlu2 %1149  ;;  %v1156_v21 = vpop.xlane.xlu1 %1155  ;;  %v1192_v22 = vmul.f32 %v1162_v14, %v2423_v23 }
 0x27f   : > { %v1240_v24 = vsub.f32 1.5, %v1239_v62  ;;  %v1188_v25 = vmul.f32 %v1150_v19, %v2423_v23  ;;  %v1190_v3 = vmul.f32 %v1156_v21, %v2423_v23 }
 0x280   : > { %v2552_v26 = vpop.eup %1991  ;;  %v1220_v5 = vsub.f32 1.5, %v1219_v16  ;;  %v2569_v9 = vadd.f32 1e-05, %v1192_v22 }
 0x281   : > { %v2554_v27 = vpop.eup %1993  ;;  %v1241_v4 = vmul.f32 %v1988_v0, %v1240_v24  ;;  %v1267_v28 = vmul.f32 %v2552_v26, %v2540_v2  ;;  %v2559_v31 = vadd.f32 1e-05, %v1188_v25  ;;  %v2567_v38 = vadd.f32 1e-05, %v1190_v3 }
 0x282   : > { %v2561_v34 = vpop.eup %1995  ;;  %v1221_v36 = vmul.f32 %v1990_v6, %v1220_v5  ;;  %v1247_v37 = vmul.f32 %v2554_v27, %v2542_v61  ;;  %vm1273_vm12 = vweird.f32 %v2552_v26  ;;  %vm1253_vm13 = vweird.f32 %v2554_v27 }
 0x283   : > { %v1245_v11 = vsel %vm1244_vm9, %v1988_v0, %v1241_v4  ;;  %v1227_v39 = vmul.f32 %v2561_v34, %v2544_v63  ;;  %v1268_v40 = vmul.f32 %v2552_v26, %v1267_v28  ;;  %1997 = vrsqrt.f32 %v2559_v31  ;;  %vm1274_vm2 = vmor %vm1272_vm8, %vm1273_vm12 }
 0x284   : > { %v1225_v43 = vsel %vm1224_vm11, %v1990_v6, %v1221_v36  ;;  %v1378_v45 = vmul.f32 %v1245_v11, %v2427_v29  ;;  %v1248_v46 = vmul.f32 %v2554_v27, %v1247_v37  ;;  %1999 = vrsqrt.f32 %v2567_v38  ;;  %vm1254_vm3 = vmor %vm1252_vm10, %vm1253_vm13 }
 0x285   : > { %v1376_v47 = vmul.f32 %v1225_v43, %v2429_v30  ;;  %v1228_v48 = vmul.f32 %v2561_v34, %v1227_v39  ;;  %v1269_v50 = vmul.f32 0.5, %v1268_v40  ;;  %vm1233_vm0 = vweird.f32 %v2561_v34  ;;  %v1171_v28 = vpop.xlane.xlu0 %1170 }
 0x286   : > { %vm1394_vm14 = vcmp.ge.f32.partialorder %v1378_v45, 0.0  ;;  %v1410_v52 = vmul.f32 0.2, %v1378_v45  ;;  %v1249_v53 = vmul.f32 0.5, %v1248_v46  ;;  %v1159_v54 = vpop.xlane.xlu2 %1158  ;;  %2001 = vrsqrt.f32 %v2569_v9  ;;  %v1165_v30 = vpop.xlane.xlu1 %1164  ;;  %vm1234_vm6 = vmor %vm1232_vm1, %vm1233_vm0 }
 0x287   : > { %vm1392_vm15 = vcmp.ge.f32.partialorder %v1376_v47, 0.0  ;;  %v1408_v15 = vmul.f32 0.2, %v1376_v47  ;;  %v1229_v29 = vmul.f32 0.5, %v1228_v48  ;;  %v1270_v55 = vsub.f32 1.5, %v1269_v50 }
 0x288   : > { %v1426_v56 = vsel %vm1394_vm14, %v1378_v45, %v1410_v52  ;;  %v1250_v57 = vsub.f32 1.5, %v1249_v53  ;;  %v1191_v13 = vmul.f32 %v1159_v54, %v2423_v23  ;;  %vm1262_vm5 = vweird.f32 %v2559_v31 }
 0x289   : > { %v1424_v58 = vsel %vm1392_vm15, %v1376_v47, %v1408_v15  ;;  %v1442_v60 = vpack.c.bf16 %v1426_v56, %v1426_v56  ;;  %v1230_v0 = vsub.f32 1.5, %v1229_v29  ;;  %v1271_v6 = vmul.f32 %v2552_v26, %v1270_v55  ;;  %v2586_v7 = vpop.eup %1997 }
 0x28a   : > { %v1440_v8 = vpack.c.bf16 %v1424_v58, %v1424_v58  ;;  %v1251_v12 = vmul.f32 %v2554_v27, %v1250_v57  ;;  %v1257_v63 = vmul.f32 %v2586_v7, %v2559_v31  ;;  %v2606_v2 = vpop.eup %1999  ;;  %vm1263_vm7 = vweird.f32 %v2586_v7 }
 0x28b   : > { %1459 = vst.msk [vmem:[%s2226_s8 + $0x8] sm:$0xf] %vm1456_vm4, %v1442_v60  ;;  %v1231_v62 = vmul.f32 %v2561_v34, %v1230_v0  ;;  %v1275_v14 = vsel %vm1274_vm2, %v2552_v26, %v1271_v6  ;;  %v2615_v19 = vadd.f32 1e-05, %v1191_v13  ;;  %v1277_v25 = vmul.f32 %v2606_v2, %v2567_v38  ;;  %vm1264_vm13 = vmor %vm1262_vm5, %vm1263_vm7 }
 0x28c   : > { %1457 = vst.msk [vmem:[%s2226_s8] sm:$0xf] %vm1456_vm4, %v1440_v8  ;;  %v1255_v16 = vsel %vm1254_vm3, %v2554_v27, %v1251_v12  ;;  %v1381_v61 = vmul.f32 %v1275_v14, %v2441_v41  ;;  %v1258_v24 = vmul.f32 %v2586_v7, %v1257_v63  ;;  %vm1282_vm8 = vweird.f32 %v2567_v38  ;;  %v2623_v3 = vpop.eup %2001 }
 0x28d   : > { %v1379_v21 = vmul.f32 %v1255_v16, %v2444_v42  ;;  %v1235_v22 = vsel %vm1234_vm6, %v2561_v34, %v1231_v62  ;;  %v1193_v5 = vmul.f32 %v1165_v30, %v2423_v23  ;;  %v1278_v4 = vmul.f32 %v2606_v2, %v1277_v25  ;;  %v1180_v13 = vpop.xlane.xlu0 %1179 }
 0x28e   : > { %v1377_v26 = vmul.f32 %v1235_v22, %v2448_v44  ;;  %vm1397_vm9 = vcmp.ge.f32.partialorder %v1381_v61, 0.0  ;;  %v1413_v41 = vmul.f32 0.2, %v1381_v61  ;;  %v1259_v42 = vmul.f32 0.5, %v1258_v24  ;;  %v1168_v34 = vpop.xlane.xlu2 %1167  ;;  %v1174_v48 = vpop.xlane.xlu1 %1173 }
 0x28f   : > { %vm1395_vm10 = vcmp.ge.f32.partialorder %v1379_v21, 0.0  ;;  %v1411_v27 = vmul.f32 0.2, %v1379_v21  ;;  %v1297_v11 = vmul.f32 %v2623_v3, %v2569_v9  ;;  %v1279_v43 = vmul.f32 0.5, %v1278_v4 }
 0x290   : > { %vm1393_vm11 = vcmp.ge.f32.partialorder %v1377_v26, 0.0  ;;  %v1409_v36 = vmul.f32 0.2, %v1377_v26  ;;  %v1429_v37 = vsel %vm1397_vm9, %v1381_v61, %v1413_v41  ;;  %v1260_v40 = vsub.f32 1.5, %v1259_v42 }
 0x291   : > { %v1427_v44 = vsel %vm1395_vm10, %v1379_v21, %v1411_v27  ;;  %v1445_v39 = vpack.c.bf16 %v1429_v37, %v1429_v37  ;;  %vm1283_vm12 = vweird.f32 %v2606_v2  ;;  %v1298_v47 = vmul.f32 %v2623_v3, %v1297_v11 }
 0x292   : > { %v1443_v45 = vpack.c.bf16 %v1427_v44, %v1427_v44  ;;  %v1425_v46 = vsel %vm1393_vm11, %v1377_v26, %v1409_v36  ;;  %v1261_v52 = vmul.f32 %v2586_v7, %v1260_v40  ;;  %v1280_v53 = vsub.f32 1.5, %v1279_v43  ;;  %vm1284_vm15 = vmor %vm1282_vm8, %vm1283_vm12 }
 0x293   : > { %v1441_v50 = vpack.c.bf16 %v1425_v46, %v1425_v46  ;;  %1462 = vst.msk [vmem:[%s2226_s8 + $0x14] sm:$0xf] %vm1456_vm4, %v1445_v39  ;;  %2003 = vrsqrt.f32 %v2615_v19  ;;  %v1299_v54 = vmul.f32 0.5, %v1298_v47  ;;  %vm1302_vm14 = vweird.f32 %v2569_v9 }
 0x294   : > { %1460 = vst.msk [vmem:[%s2226_s8 + $0xc] sm:$0xf] %vm1456_vm4, %v1443_v45  ;;  %v2643_v15 = vadd.f32 1e-05, %v1193_v5  ;;  %v1195_v29 = vmul.f32 %v1171_v28, %v2423_v23  ;;  %v1265_v55 = vsel %vm1264_vm13, %v2586_v7, %v1261_v52  ;;  %v1281_v56 = vmul.f32 %v2606_v2, %v1280_v53 }
 0x295   : > { %1458 = vst.msk [vmem:[%s2226_s8 + $0x4] sm:$0xf] %vm1456_vm4, %v1441_v50  ;;  %v1194_v57 = vmul.f32 %v1168_v34, %v2423_v23  ;;  %v1196_v30 = vmul.f32 %v1174_v48, %v2423_v23  ;;  %v1380_v31 = vmul.f32 %v1265_v55, %v2459_v51  ;;  %v1300_v58 = vsub.f32 1.5, %v1299_v54 }
 0x296   : > { %vm1303_vm0 = vweird.f32 %v2623_v3  ;;  %2005 = vrsqrt.f32 %v2643_v15  ;;  %v1285_v60 = vsel %vm1284_vm15, %v2606_v2, %v1281_v56  ;;  %v2660_v0 = vadd.f32 1e-05, %v1195_v29  ;;  %v1177_v62 = vpop.xlane.xlu2 %1176  ;;  %v1183_v25 = vpop.xlane.xlu1 %1182 }
 0x297   : > { %v2662_v6 = vadd.f32 1e-05, %v1194_v57  ;;  %vm1396_vm1 = vcmp.ge.f32.partialorder %v1380_v31, 0.0  ;;  %v1412_v7 = vmul.f32 0.2, %v1380_v31  ;;  %v1382_v51 = vmul.f32 %v1285_v60, %v2469_v49  ;;  %vm1304_vm2 = vmor %vm1302_vm14, %vm1303_vm0 }
 0x298   : > { %v1301_v8 = vmul.f32 %v2623_v3, %v1300_v58  ;;  %2007 = vrsqrt.f32 %v2660_v0  ;;  %v2669_v38 = vadd.f32 1e-05, %v1196_v30  ;;  %v1198_v22 = vmul.f32 %v1180_v13, %v2423_v23 }
 0x299   : > { %v2004_v12 = vpop.eup %2003  ;;  %v1428_v14 = vsel %vm1396_vm1, %v1380_v31, %v1412_v7  ;;  %vm1398_vm3 = vcmp.ge.f32.partialorder %v1382_v51, 0.0  ;;  %v1414_v63 = vmul.f32 0.2, %v1382_v51  ;;  %2009 = vrsqrt.f32 %v2662_v6 }
 0x29a   : > { %v1305_v2 = vsel %vm1304_vm2, %v2623_v3, %v1301_v8  ;;  %v1444_v16 = vpack.c.bf16 %v1428_v14, %v1428_v14  ;;  %v1287_v61 = vmul.f32 %v2004_v12, %v2615_v19  ;;  %v1197_v24 = vmul.f32 %v1177_v62, %v2423_v23 }
 0x29b   : > { %v1384_v49 = vmul.f32 %v1305_v2, %v2466_v59  ;;  %v1430_v21 = vsel %vm1398_vm3, %v1382_v51, %v1414_v63  ;;  %2011 = vrsqrt.f32 %v2669_v38  ;;  %v2684_v5 = vadd.f32 1e-05, %v1198_v22 }
 0x29c   : > { %v2674_v9 = vpop.eup %2005  ;;  %1461 = vst.msk [vmem:[%s2226_s8 + $0x10] sm:$0xf] %vm1456_vm4, %v1444_v16  ;;  %v1446_v26 = vpack.c.bf16 %v1430_v21, %v1430_v21  ;;  %v1288_v41 = vmul.f32 %v2004_v12, %v1287_v61  ;;  %v2688_v28 = vadd.f32 1e-05, %v1197_v24  ;;  %v1199_v34 = vmul.f32 %v1183_v25, %v2423_v23 }
 0x29d   : > { %vm1400_vm5 = vcmp.ge.f32.partialorder %v1384_v49, 0.0  ;;  %v1416_v3 = vmul.f32 0.2, %v1384_v49  ;;  %v1307_v59 = vmul.f32 %v2674_v9, %v2643_v15  ;;  %vm1292_vm6 = vweird.f32 %v2615_v19 }
 0x29e   : > { %v2008_v27 = vpop.eup %2007  ;;  %1463 = vst.msk [vmem:[%s2226_s8 + $0x18] sm:$0xf] %vm1456_vm4, %v1446_v26  ;;  %v1289_v4 = vmul.f32 0.5, %v1288_v41  ;;  %vm1293_vm7 = vweird.f32 %v2004_v12  ;;  %2013 = vrsqrt.f32 %v2684_v5  ;;  %v2700_v23 = vadd.f32 1e-05, %v1199_v34 }
 0x29f   : > { %v1432_v42 = vsel %vm1400_vm5, %v1384_v49, %v1416_v3  ;;  %v1308_v37 = vmul.f32 %v2674_v9, %v1307_v59  ;;  %v1327_v11 = vmul.f32 %v2008_v27, %v2660_v0  ;;  %v2695_v39 = vpop.eup %2009  ;;  %2015 = vrsqrt.f32 %v2688_v28  ;;  %vm1294_vm10 = vmor %vm1292_vm6, %vm1293_vm7 }
 0x2a0   : > { %v1448_v36 = vpack.c.bf16 %v1432_v42, %v1432_v42  ;;  %v1290_v44 = vsub.f32 1.5, %v1289_v4  ;;  %vm1312_vm8 = vweird.f32 %v2643_v15  ;;  %vm1332_vm9 = vweird.f32 %v2660_v0 }
 0x2a1   : > { %v1309_v40 = vmul.f32 0.5, %v1308_v37  ;;  %v1328_v43 = vmul.f32 %v2008_v27, %v1327_v11  ;;  %v1317_v19 = vmul.f32 %v2695_v39, %v2662_v6  ;;  %v2706_v46 = vpop.eup %2011  ;;  %vm1313_vm11 = vweird.f32 %v2674_v9 }
 0x2a2   : > { %1465 = vst.msk [vmem:[%s2226_s8 + $0x20] sm:$0xf] %vm1456_vm4, %v1448_v36  ;;  %v1291_v45 = vmul.f32 %v2004_v12, %v1290_v44  ;;  %vm1322_vm12 = vweird.f32 %v2662_v6  ;;  %vm1333_vm13 = vweird.f32 %v2008_v27  ;;  %v1337_v53 = vmul.f32 %v2706_v46, %v2669_v38  ;;  %vm1314_vm14 = vmor %vm1312_vm8, %vm1313_vm11 }
 0x2a3   : > { %v1310_v47 = vsub.f32 1.5, %v1309_v40  ;;  %v1329_v48 = vmul.f32 0.5, %v1328_v43  ;;  %v1318_v52 = vmul.f32 %v2695_v39, %v1317_v19  ;;  %2017 = vrsqrt.f32 %v2700_v23  ;;  %vm1334_vm3 = vmor %vm1332_vm9, %vm1333_vm13 }
 0x2a4   : > { %v1295_v50 = vsel %vm1294_vm10, %v2004_v12, %v1291_v45  ;;  %v2716_v56 = vpop.eup %2013  ;;  %vm1323_vm15 = vweird.f32 %v2695_v39  ;;  %v1338_v30 = vmul.f32 %v2706_v46, %v1337_v53  ;;  %vm1342_vm0 = vweird.f32 %v2669_v38 }
 0x2a5   : > { %v1383_v54 = vmul.f32 %v1295_v50, %v2476_v1  ;;  %v1311_v29 = vmul.f32 %v2674_v9, %v1310_v47  ;;  %v1330_v55 = vsub.f32 1.5, %v1329_v48  ;;  %v1319_v57 = vmul.f32 0.5, %v1318_v52  ;;  %v2723_v31 = vpop.eup %2015  ;;  %vm1324_vm8 = vmor %vm1322_vm12, %vm1323_vm15 }
 0x2a6   : > { %vm1362_vm2 = vweird.f32 %v2684_v5  ;;  %v1339_v51 = vmul.f32 0.5, %v1338_v30  ;;  %v1357_v8 = vmul.f32 %v2716_v56, %v2684_v5  ;;  %vm1343_vm5 = vweird.f32 %v2706_v46 }
 0x2a7   : > { %vm1399_vm1 = vcmp.ge.f32.partialorder %v1383_v54, 0.0  ;;  %v1415_v1 = vmul.f32 0.2, %v1383_v54  ;;  %v1315_v58 = vsel %vm1314_vm14, %v2674_v9, %v1311_v29  ;;  %v1331_v60 = vmul.f32 %v2008_v27, %v1330_v55  ;;  %vm1344_vm10 = vmor %vm1342_vm0, %vm1343_vm5 }
 0x2a8   : > { %v1385_v7 = vmul.f32 %v1315_v58, %v2492_v18  ;;  %v1320_v15 = vsub.f32 1.5, %v1319_v57  ;;  %v1347_v62 = vmul.f32 %v2723_v31, %v2688_v28  ;;  %v1340_v16 = vsub.f32 1.5, %v1339_v51 }
 0x2a9   : > { %v1431_v12 = vsel %vm1399_vm1, %v1383_v54, %v1415_v1  ;;  %v1335_v13 = vsel %vm1334_vm3, %v2008_v27, %v1331_v60  ;;  %v2737_v0 = vpop.eup %2017  ;;  %v1358_v49 = vmul.f32 %v2716_v56, %v1357_v8  ;;  %vm1363_vm9 = vweird.f32 %v2716_v56 }
 0x2aa   : > { %v1447_v14 = vpack.c.bf16 %v1431_v12, %v1431_v12  ;;  %vm1401_vm6 = vcmp.ge.f32.partialorder %v1385_v7, 0.0  ;;  %v1417_v18 = vmul.f32 0.2, %v1385_v7  ;;  %v1387_v63 = vmul.f32 %v1335_v13, %v2489_v17  ;;  %vm1364_vm15 = vmor %vm1362_vm2, %vm1363_vm9 }
 0x2ab   : > { %v1321_v2 = vmul.f32 %v2695_v39, %v1320_v15  ;;  %v1348_v61 = vmul.f32 %v2723_v31, %v1347_v62  ;;  %v1341_v24 = vmul.f32 %v2706_v46, %v1340_v16  ;;  %v1359_v25 = vmul.f32 0.5, %v1358_v49 }
 0x2ac   : > { %1464 = vst.msk [vmem:[%s2226_s8 + $0x1c] sm:$0xf] %vm1456_vm4, %v1447_v14  ;;  %v1433_v9 = vsel %vm1401_vm6, %v1385_v7, %v1417_v18  ;;  %vm1403_vm7 = vcmp.ge.f32.partialorder %v1387_v63, 0.0  ;;  %v1419_v21 = vmul.f32 0.2, %v1387_v63  ;;  %v1367_v6 = vmul.f32 %v2737_v0, %v2700_v23 }
 0x2ad   : > { %v1449_v17 = vpack.c.bf16 %v1433_v9, %v1433_v9  ;;  %v1325_v22 = vsel %vm1324_vm8, %v2695_v39, %v1321_v2  ;;  %v1349_v41 = vmul.f32 0.5, %v1348_v61  ;;  %v1345_v27 = vsel %vm1344_vm10, %v2706_v46, %v1341_v24 }
 0x2ae   : > { %v1435_v26 = vsel %vm1403_vm7, %v1387_v63, %v1419_v21  ;;  %v1386_v3 = vmul.f32 %v1325_v22, %v2497_v20  ;;  %v1360_v42 = vsub.f32 1.5, %v1359_v25  ;;  %vm1353_vm11 = vweird.f32 %v2723_v31 }
 0x2af   : > { %1466 = vst.msk [vmem:[%s2226_s8 + $0x24] sm:$0xf] %vm1456_vm4, %v1449_v17  ;;  %v1451_v59 = vpack.c.bf16 %v1435_v26, %v1435_v26  ;;  %v1388_v20 = vmul.f32 %v1345_v27, %v2513_v33  ;;  %v1350_v34 = vsub.f32 1.5, %v1349_v41  ;;  %vm1352_vm13 = vweird.f32 %v2688_v28 }
 0x2b0   : > { %vm1402_vm12 = vcmp.ge.f32.partialorder %v1386_v3, 0.0  ;;  %v1418_v4 = vmul.f32 0.2, %v1386_v3  ;;  %v1361_v38 = vmul.f32 %v2716_v56, %v1360_v42  ;;  %v1368_v36 = vmul.f32 %v2737_v0, %v1367_v6  ;;  %vm1354_vm0 = vmor %vm1352_vm13, %vm1353_vm11 }
 0x2b1   : > { %1468 = vst.msk [vmem:[%s2226_s8 + $0x2c] sm:$0xf] %vm1456_vm4, %v1451_v59  ;;  %vm1404_vm14 = vcmp.ge.f32.partialorder %v1388_v20, 0.0  ;;  %v1420_v11 = vmul.f32 0.2, %v1388_v20  ;;  %v1351_v33 = vmul.f32 %v2723_v31, %v1350_v34  ;;  %vm1373_vm1 = vweird.f32 %v2737_v0 }
 0x2b2   : > { %v1434_v37 = vsel %vm1402_vm12, %v1386_v3, %v1418_v4  ;;  %v1365_v39 = vsel %vm1364_vm15, %v2716_v56, %v1361_v38  ;;  %v1369_v28 = vmul.f32 0.5, %v1368_v36  ;;  %vm1372_vm5 = vweird.f32 %v2700_v23 }
 0x2b3   : > { %v1450_v44 = vpack.c.bf16 %v1434_v37, %v1434_v37  ;;  %v1436_v40 = vsel %vm1404_vm14, %v1388_v20, %v1420_v11  ;;  %v1390_v43 = vmul.f32 %v1365_v39, %v2510_v32  ;;  %v1355_v45 = vsel %vm1354_vm0, %v2723_v31, %v1351_v33  ;;  %vm1374_vm6 = vmor %vm1372_vm5, %vm1373_vm1 }
 0x2b4   : > { %v1452_v19 = vpack.c.bf16 %v1436_v40, %v1436_v40  ;;  %v1389_v5 = vmul.f32 %v1355_v45, %v2518_v35  ;;  %v1370_v46 = vsub.f32 1.5, %v1369_v28 }
 0x2b5   : > { %1467 = vst.msk [vmem:[%s2226_s8 + $0x28] sm:$0xf] %vm1456_vm4, %v1450_v44  ;;  %vm1406_vm2 = vcmp.ge.f32.partialorder %v1390_v43, 0.0  ;;  %v1422_v47 = vmul.f32 0.2, %v1390_v43 }
 0x2b6   : > { %1469 = vst.msk [vmem:[%s2226_s8 + $0x30] sm:$0xf] %vm1456_vm4, %v1452_v19  ;;  %vm1405_vm3 = vcmp.ge.f32.partialorder %v1389_v5, 0.0  ;;  %v1421_v48 = vmul.f32 0.2, %v1389_v5  ;;  %v1371_v32 = vmul.f32 %v2737_v0, %v1370_v46 }
 0x2b7   : > { %v1438_v50 = vsel %vm1406_vm2, %v1390_v43, %v1422_v47 }
 0x2b8   : > { %v1454_v52 = vpack.c.bf16 %v1438_v50, %v1438_v50  ;;  %v1437_v35 = vsel %vm1405_vm3, %v1389_v5, %v1421_v48  ;;  %v1375_v53 = vsel %vm1374_vm6, %v2737_v0, %v1371_v32 }
 0x2b9   : > { %v1453_v54 = vpack.c.bf16 %v1437_v35, %v1437_v35  ;;  %v1391_v29 = vmul.f32 %v1375_v53, %v2529_v10 }
 0x2ba   : > { %1471 = vst.msk [vmem:[%s2226_s8 + $0x38] sm:$0xf] %vm1456_vm4, %v1454_v52 }
 0x2bb   : > { %1470 = vst.msk [vmem:[%s2226_s8 + $0x34] sm:$0xf] %vm1456_vm4, %v1453_v54  ;;  %vm1407_vm7 = vcmp.ge.f32.partialorder %v1391_v29, 0.0  ;;  %v1423_v55 = vmul.f32 0.2, %v1391_v29 }
 0x2bd   : > { %v1439_v56 = vsel %vm1407_vm7, %v1391_v29, %v1423_v55 }
 0x2be   : > { %v1455_v57 = vpack.c.bf16 %v1439_v56, %v1439_v56 }
 0x2c0   : > { %1472 = vst.msk [vmem:[%s2226_s8 + $0x3c] sm:$0xf] %vm1456_vm4, %v1455_v57 }
 0x2c1 PF: > { %s12_s15 = sadd.s32 1, %s2073_s15   ;;  %s2818_s9 = smov %s2053_s10 }
 0x2c2   : > { %p9_p0 = scmp.ge.s32.totalorder %s12_s15, 10   ;;  %s2819_s10 = smov %s2141_s20 }
 0x2c3   : > { %s2820_s11 = smov %s2065_s13  ;;  %s2821_s12 = smov %s2069_s14 }
 0x2c4   : > { %s2822_s13 = smov %s2825_s16  ;;  %s2823_s14 = smov %s2829_s17 }
 0x2c5   :  { %11 = sbr.rel (!%p9_p0) target bundleno = 4 (0x4), region = 97 }

</bundles_post_ra>
